<compile_context>
chip_gen: v5e
topology: v5e:2x2
jax: 0.10.0
libtpu: 0.0.40
codegen_flags: <defaults>
</compile_context>

<pallas_src>
import functools
import math

import jax
import jax.numpy as jnp
from jax.experimental import pallas as pl
from jax.experimental.pallas import tpu as pltpu

# ----------------------------- config ---------------------------------------
VOCAB_SIZE = 50
HIDDEN = 32
MAX_SENT_LEN = 256
NUM_TF_LAYERS = 2
FF_SIZE = 64
NUM_HEADS = 8            # Doc2EDAG's make_transformer_encoder uses 8 heads
HEAD_DIM = HIDDEN // NUM_HEADS
NUM_LABELS = 9
LN_EPS = 1e-6

# rows of the packed per-layer H-wide vector array (L, 9, H)
_VH_LN1_G, _VH_LN1_B = 0, 1
_VH_BQ, _VH_BK, _VH_BV, _VH_BO = 2, 3, 4, 5
_VH_LN2_G, _VH_LN2_B, _VH_B2 = 6, 7, 8


# --------------------------- kernel helpers ----------------------------------
def _layer_norm(x, g, b):
    """Annotated-transformer LayerNorm: a_2*(x-mean)/(std+eps)+b_2; torch.std
    is unbiased (ddof=1) and eps is added to std (not var)."""
    h = x.shape[-1]
    mean = jnp.mean(x, axis=-1, keepdims=True)
    d = x - mean
    var = jnp.sum(d * d, axis=-1, keepdims=True) / (h - 1)
    std = jnp.sqrt(var)
    return g * d / (std + LN_EPS) + b


# ------------------------------ fused kernel ---------------------------------
def ner_fused_kernel(ids_ref, mask_ref, lab_ref,
                     tok_emb_ref, pos_emb_ref, vec_g_ref, vec_h_ref,
                     wq_ref, wk_ref, wv_ref, wo_ref,
                     w1_ref, b1_ref, w2_ref, wc_ref, bc_ref,
                     enc_ref, loss_ref, preds_ref,
                     *, num_heads, num_layers):
    Bt, S, _ = ids_ref.shape               # (Bt, S, 1)
    V, H = tok_emb_ref.shape
    hd = H // num_heads
    N = Bt * S
    f32, bf16 = jnp.float32, jnp.bfloat16
    scale = 1.0 / math.sqrt(hd)

    # ---- token embedding as one-hot matmul (MXU) + position emb + LayerNorm
    #      (dropout = identity); activations folded to (Bt*S, H)
    ids = ids_ref[...]                                               # (Bt,S,1)
    onehot = (ids == jax.lax.broadcasted_iota(jnp.int32, (Bt, S, V), 2)
              ).astype(f32).reshape(N, V)
    tok = jnp.dot(onehot, tok_emb_ref[...], preferred_element_type=f32)
    emb = (tok.reshape(Bt, S, H) + pos_emb_ref[...][None, :, :]).reshape(N, H)

    vg = vec_g_ref[...]                                              # (4,H)
    x = _layer_norm(emb, vg[0:1], vg[1:2])                           # (N,H) f32

    # ---- loop-invariant attention constants (computed ONCE per block) ----
    keep = mask_ref[...] == 1                                        # (Bt,1,S)
    mask_bias = jnp.where(keep, 0.0, -1e9).astype(f32).reshape(Bt, 1, 1, S)
    col = jax.lax.broadcasted_iota(jnp.int32, (num_heads, H), 1)
    row = jax.lax.broadcasted_iota(jnp.int32, (num_heads, H), 0)
    lo = row * hd
    head_sel = ((col >= lo) & (col < lo + hd)).astype(f32)           # (heads,H)

    for l in range(num_layers):                # static Python loop, L=2
        vh = vec_h_ref[l]                                            # (9,H)
        ln1_g, ln1_b = vh[_VH_LN1_G:_VH_LN1_G + 1], vh[_VH_LN1_B:_VH_LN1_B + 1]
        bq = vh[_VH_BQ:_VH_BQ + 1]
        bk = vh[_VH_BK:_VH_BK + 1]
        bv = vh[_VH_BV:_VH_BV + 1]
        bo = vh[_VH_BO:_VH_BO + 1]
        ln2_g, ln2_b = vh[_VH_LN2_G:_VH_LN2_G + 1], vh[_VH_LN2_B:_VH_LN2_B + 1]
        b2 = vh[_VH_B2:_VH_B2 + 1]

        # --- multi-head self-attention sublayer:  x + Wo*MHA(LN(x)) ---
        xn = _layer_norm(x, ln1_g, ln1_b).astype(bf16)
        q = jnp.dot(xn, wq_ref[l], preferred_element_type=f32) + bq  # (N,H)
        k = jnp.dot(xn, wk_ref[l], preferred_element_type=f32) + bk
        v = jnp.dot(xn, wv_ref[l], preferred_element_type=f32) + bv

        # Per-head column-masked expansion: row h*S+s of kexp/vexp is K/V row s
        # restricted to head h's columns.  Keeps everything H-lane dense (no
        # 4-wide lane slices), and the context matmul below directly produces
        # the concatenation of all head contexts.
        kexp = (k.reshape(Bt, 1, S, H) * head_sel[None, :, None, :]
                ).reshape(Bt, num_heads * S, H)
        vexp = (v.reshape(Bt, 1, S, H) * head_sel[None, :, None, :]
                ).reshape(Bt, num_heads * S, H)

        qs = (q * scale).reshape(Bt, S, H).astype(bf16)
        sc = jnp.einsum('bqc,bkc->bqk', qs, kexp.astype(bf16),
                        preferred_element_type=f32)                  # (Bt,S,h*S)
        sc = sc.reshape(Bt, S, num_heads, S) + mask_bias             # hoisted mask
        sc = sc - jnp.max(sc, axis=-1, keepdims=True)
        p = jnp.exp(sc)
        p = p / jnp.sum(p, axis=-1, keepdims=True)                   # exact div
        ctx = jnp.einsum('bqk,bkc->bqc',
                         p.reshape(Bt, S, num_heads * S).astype(bf16),
                         vexp.astype(bf16),
                         preferred_element_type=f32)                 # (Bt,S,H)
        attn = jnp.dot(ctx.reshape(N, H).astype(bf16), wo_ref[l],
                       preferred_element_type=f32) + bo              # single Wo
        x = x + attn

        # --- position-wise feed-forward sublayer:  x + FFN(LN(x)) ---
        xn2 = _layer_norm(x, ln2_g, ln2_b).astype(bf16)
        h1 = jnp.maximum(jnp.dot(xn2, w1_ref[l], preferred_element_type=f32)
                         + b1_ref[l], 0.0)
        x = x + jnp.dot(h1.astype(bf16), w2_ref[l],
                        preferred_element_type=f32) + b2

    # ---- final encoder LayerNorm -> batch_seq_enc
    enc = _layer_norm(x, vg[2:3], vg[3:4])                           # (N,H)
    enc_ref[...] = enc.reshape(Bt, S, H)

    # ---- classifier -> log_softmax -> per-token NLL summed over seq; argmax
    logits = jnp.dot(enc.astype(bf16), wc_ref[...],
                     preferred_element_type=f32) + bc_ref[...]       # (N,Lbl)
    Lbl = logits.shape[-1]
    z = logits - jnp.max(logits, axis=-1, keepdims=True)
    logp = z - jnp.log(jnp.sum(jnp.exp(z), axis=-1, keepdims=True))

    lab_iota = jax.lax.broadcasted_iota(jnp.int32, (N, Lbl), 1)
    onehot_l = (lab_ref[...].reshape(N, 1) == lab_iota).astype(f32)
    loss_tok = -jnp.sum(logp * onehot_l, axis=-1, keepdims=True)     # (N,1)
    loss_seq = jnp.sum(loss_tok.reshape(Bt, S), axis=-1, keepdims=True)  # (Bt,1)
    loss_ref[...] = loss_seq.reshape(1, 1, Bt)                       # lane-dense

    # argmax with first-occurrence tie-break (matches torch.argmax)
    maxv = jnp.max(logp, axis=-1, keepdims=True)
    cand = jnp.where(logp == maxv, lab_iota, Lbl)
    preds = jnp.min(cand, axis=-1, keepdims=True)                    # (N,1) i32
    preds_ref[...] = preds.reshape(Bt, 1, S)                         # lane-dense


# --------------------------- parameter init -----------------------------------
def init_params(key):
    ks = iter(jax.random.split(key, 32))

    def nrm(shape, scale=0.02, dtype=jnp.float32):
        return (scale * jax.random.normal(next(ks), shape, jnp.float32)
                ).astype(dtype)

    L, H, F = NUM_TF_LAYERS, HIDDEN, FF_SIZE
    bf16 = jnp.bfloat16

    # packed per-layer H-wide vectors: [ln1_g, ln1_b, bq, bk, bv, bo,
    #                                   ln2_g, ln2_b, b2]
    vec_h = jnp.zeros((L, 9, H), jnp.float32)
    vec_h = vec_h.at[:, _VH_LN1_G, :].set(1.0).at[:, _VH_LN2_G, :].set(1.0)
    # packed global H-wide vectors: [emb_ln_g, emb_ln_b, final_ln_g, final_ln_b]
    vec_g = jnp.concatenate([jnp.ones((1, H)), jnp.zeros((1, H)),
                             jnp.ones((1, H)), jnp.zeros((1, H))],
                            axis=0).astype(jnp.float32)

    params = dict(
        tok_emb=nrm((VOCAB_SIZE, H)),
        pos_emb=nrm((MAX_SENT_LEN, H)),
        vec_g=vec_g,
        vec_h=vec_h,
        # dense matmul weights stored bf16 (f32 accumulation in-kernel)
        wq=nrm((L, H, H), dtype=bf16), wk=nrm((L, H, H), dtype=bf16),
        wv=nrm((L, H, H), dtype=bf16), wo=nrm((L, H, H), dtype=bf16),
        w1=nrm((L, H, F), dtype=bf16),
        b1=jnp.zeros((L, 1, F), jnp.float32),
        w2=nrm((L, F, H), dtype=bf16),
        wc=nrm((H, NUM_LABELS), dtype=bf16),
        bc=jnp.zeros((1, NUM_LABELS), jnp.float32),
    )
    return params


_WEIGHT_ORDER = ('tok_emb', 'pos_emb', 'vec_g', 'vec_h',
                 'wq', 'wk', 'wv', 'wo', 'w1', 'b1', 'w2', 'wc', 'bc')


def _full_spec(shape):
    nd = len(shape)
    return pl.BlockSpec(tuple(shape), lambda b: (0,) * nd)


def _choose_block_b(B, S):
    """Pick a batch block that (a) divides B, (b) keeps the dominant live
    attention intermediates (scores + probs + expanded K/V) under ~8 MiB so the
    scoped-VMEM limit is comfortable on all generations (v7x has the least
    VMEM), and (c) leaves a grid of length >= 2 so both v7x TCs get work."""
    per_seq = 4 * (2 * NUM_HEADS * S * S        # scores + probs (f32)
                   + 2 * NUM_HEADS * S * HIDDEN  # expanded K/V (f32)
                   + 8 * S * HIDDEN)             # misc activations
    cap = max(1, min(8, (8 << 20) // max(per_seq, 1)))
    bt = min(cap, B)
    while B % bt:
        bt -= 1
    if B // bt < 2 and B > 1:                    # give both v7x cores work
        bt2 = max(1, bt // 2)
        while B % bt2:
            bt2 -= 1
        bt = bt2
    return bt


# ------------------------------ forward ---------------------------------------
def ner_model_forward(params, input_ids, input_masks, label_ids, *, block_b=None):
    """Returns (batch_seq_enc, ner_loss, batch_seq_preds) like NERModel.forward
    with train_flag=True, decode_flag=True, use_crf_layer=False."""
    B, S = input_ids.shape
    H = HIDDEN
    assert S <= MAX_SENT_LEN and S % 8 == 0, "seq len must be <=256 and 8-aligned"

    Bt = _choose_block_b(B, S) if block_b is None else block_b
    assert B % Bt == 0
    nb = B // Bt

    ids3 = input_ids.astype(jnp.int32).reshape(B, S, 1)
    mask3 = input_masks.astype(jnp.int32).reshape(B, 1, S)   # unsqueeze(-2)
    lab3 = label_ids.astype(jnp.int32).reshape(B, S, 1)
    weights = [params[k] for k in _WEIGHT_ORDER]

    in_specs = [
        pl.BlockSpec((Bt, S, 1), lambda b: (b, 0, 0)),       # token ids
        pl.BlockSpec((Bt, 1, S), lambda b: (b, 0, 0)),       # key mask
        pl.BlockSpec((Bt, S, 1), lambda b: (b, 0, 0)),       # labels
    ]
    for name, w in zip(_WEIGHT_ORDER, weights):
        if name == 'pos_emb':
            # only the first S rows of the position table are needed
            in_specs.append(pl.BlockSpec((S, H), lambda b: (0, 0)))
        else:
            in_specs.append(_full_spec(w.shape))

    out_specs = (
        pl.BlockSpec((Bt, S, H), lambda b: (b, 0, 0)),       # batch_seq_enc
        pl.BlockSpec((1, 1, Bt), lambda b: (b, 0, 0)),       # per-seq loss (lane-dense)
        pl.BlockSpec((Bt, 1, S), lambda b: (b, 0, 0)),       # preds (lane-dense)
    )
    out_shape = (
        jax.ShapeDtypeStruct((B, S, H), jnp.float32),
        jax.ShapeDtypeStruct((nb, 1, Bt), jnp.float32),
        jax.ShapeDtypeStruct((B, 1, S), jnp.int32),
    )

    kernel = functools.partial(ner_fused_kernel,
                               num_heads=NUM_HEADS, num_layers=NUM_TF_LAYERS)
    enc, loss, preds = pl.pallas_call(
        kernel,
        grid=(nb,),                               # batch-blocked grid
        in_specs=in_specs,
        out_specs=out_specs,
        out_shape=out_shape,
        compiler_params=pltpu.CompilerParams(
            dimension_semantics=("parallel",),    # 2 TCs split the grid on v7x
            vmem_limit_bytes=32 << 20),           # mild raise (helps v5e), safe on all gens
    )(ids3, mask3, lab3, *weights)

    ner_loss = loss.reshape(B)                    # (B,) sum of per-token NLL
    batch_seq_preds = preds[:, 0, :]              # (B,S)
    return enc, ner_loss, batch_seq_preds


# -------------------------------- main ----------------------------------------
if __name__ == "__main__":
    B, S = 4, 8
    key = jax.random.PRNGKey(0)
    kp, kid, klab = jax.random.split(key, 3)

    params = init_params(kp)
    input_ids = jax.random.randint(kid, (B, S), 0, VOCAB_SIZE, dtype=jnp.int32)
    label_ids = jax.random.randint(klab, (B, S), 0, NUM_LABELS, dtype=jnp.int32)
    input_masks = (jnp.ones((B, S), jnp.int32)
                   .at[1, 6:].set(0)              # pad tail of seq 1
                   .at[3, 5:].set(0))             # pad tail of seq 3

    enc, ner_loss, preds = ner_model_forward(params, input_ids, input_masks,
                                             label_ids)
    jax.block_until_ready((enc, ner_loss, preds))

    assert enc.shape == (B, S, HIDDEN) and ner_loss.shape == (B,) \
        and preds.shape == (B, S)
    assert bool(jnp.all(jnp.isfinite(enc))) and bool(jnp.all(jnp.isfinite(ner_loss)))
    assert bool(jnp.all((preds >= 0) & (preds < NUM_LABELS)))
    print("KERNEL_OK")
</pallas_src>

<mosaic_0001>
module attributes {stable_mosaic.version = 11 : i64} {
  func.func @ner_fused_kernel(%arg0: i32, %arg1: memref<2x8x1xi32, #tpu.memory_space<vmem>>, %arg2: memref<2x1x8xi32, #tpu.memory_space<vmem>>, %arg3: memref<2x8x1xi32, #tpu.memory_space<vmem>>, %arg4: memref<50x32xf32, #tpu.memory_space<vmem>>, %arg5: memref<8x32xf32, #tpu.memory_space<vmem>>, %arg6: memref<4x32xf32, #tpu.memory_space<vmem>>, %arg7: memref<2x9x32xf32, #tpu.memory_space<vmem>>, %arg8: memref<2x32x32xbf16, #tpu.memory_space<vmem>>, %arg9: memref<2x32x32xbf16, #tpu.memory_space<vmem>>, %arg10: memref<2x32x32xbf16, #tpu.memory_space<vmem>>, %arg11: memref<2x32x32xbf16, #tpu.memory_space<vmem>>, %arg12: memref<2x32x64xbf16, #tpu.memory_space<vmem>>, %arg13: memref<2x1x64xf32, #tpu.memory_space<vmem>>, %arg14: memref<2x64x32xbf16, #tpu.memory_space<vmem>>, %arg15: memref<32x9xbf16, #tpu.memory_space<vmem>>, %arg16: memref<1x9xf32, #tpu.memory_space<vmem>>, %arg17: memref<2x8x32xf32, #tpu.memory_space<vmem>>, %arg18: memref<1x1x2xf32, #tpu.memory_space<vmem>>, %arg19: memref<2x1x8xi32, #tpu.memory_space<vmem>>) attributes {dimension_semantics = [#tpu.dimension_semantics<parallel>], iteration_bounds = array<i64: 2>, scalar_prefetch = 0 : i64, scratch_operands = 0 : i64, tpu.core_type = #tpu.core_type<tc>, window_params = [{transform_indices = @transform_0, window_bounds = array<i64: 2, 8, 1>}, {transform_indices = @transform_1, window_bounds = array<i64: 2, 1, 8>}, {transform_indices = @transform_2, window_bounds = array<i64: 2, 8, 1>}, {pipeline_mode = #tpu.pipeline_mode<synchronous>, transform_indices = @transform_3, window_bounds = array<i64: 50, 32>}, {transform_indices = @transform_4, window_bounds = array<i64: 8, 32>}, {pipeline_mode = #tpu.pipeline_mode<synchronous>, transform_indices = @transform_5, window_bounds = array<i64: 4, 32>}, {pipeline_mode = #tpu.pipeline_mode<synchronous>, transform_indices = @transform_6, window_bounds = array<i64: 2, 9, 32>}, {pipeline_mode = #tpu.pipeline_mode<synchronous>, transform_indices = @transform_7, window_bounds = array<i64: 2, 32, 32>}, {pipeline_mode = #tpu.pipeline_mode<synchronous>, transform_indices = @transform_8, window_bounds = array<i64: 2, 32, 32>}, {pipeline_mode = #tpu.pipeline_mode<synchronous>, transform_indices = @transform_9, window_bounds = array<i64: 2, 32, 32>}, {pipeline_mode = #tpu.pipeline_mode<synchronous>, transform_indices = @transform_10, window_bounds = array<i64: 2, 32, 32>}, {pipeline_mode = #tpu.pipeline_mode<synchronous>, transform_indices = @transform_11, window_bounds = array<i64: 2, 32, 64>}, {pipeline_mode = #tpu.pipeline_mode<synchronous>, transform_indices = @transform_12, window_bounds = array<i64: 2, 1, 64>}, {pipeline_mode = #tpu.pipeline_mode<synchronous>, transform_indices = @transform_13, window_bounds = array<i64: 2, 64, 32>}, {pipeline_mode = #tpu.pipeline_mode<synchronous>, transform_indices = @transform_14, window_bounds = array<i64: 32, 9>}, {pipeline_mode = #tpu.pipeline_mode<synchronous>, transform_indices = @transform_15, window_bounds = array<i64: 1, 9>}, {transform_indices = @transform_16, window_bounds = array<i64: 2, 8, 32>}, {transform_indices = @transform_17, window_bounds = array<i64: 1, 1, 2>}, {transform_indices = @transform_18, window_bounds = array<i64: 2, 1, 8>}]} {
    %c0 = arith.constant 0 : index
    %c0_0 = arith.constant 0 : index
    %c0_1 = arith.constant 0 : index
    %0 = vector.load %arg1[%c0, %c0_0, %c0_1] : memref<2x8x1xi32, #tpu.memory_space<vmem>>, vector<2x8x1xi32>
    %1 = tpu.iota {dimensions = array<i32: 2>} : vector<2x8x50xi32>
    %2 = vector.broadcast %0 : vector<2x8x1xi32> to vector<2x8x50xi32>
    %3 = arith.cmpi eq, %2, %1 : vector<2x8x50xi32>
    %4 = arith.extui %3 : vector<2x8x50xi1> to vector<2x8x50xi32>
    %5 = arith.sitofp %4 : vector<2x8x50xi32> to vector<2x8x50xf32>
    %6 = vector.shape_cast %5 : vector<2x8x50xf32> to vector<16x50xf32>
    %c0_2 = arith.constant 0 : index
    %c0_3 = arith.constant 0 : index
    %7 = vector.load %arg4[%c0_2, %c0_3] : memref<50x32xf32, #tpu.memory_space<vmem>>, vector<50x32xf32>
    %cst = arith.constant dense<0.000000e+00> : vector<16x32xf32>
    %8 = tpu.matmul %6, %7, %cst {dimension_numbers = #tpu.dot_dimension_numbers<[1], [0], [0], [1], [0, 0, 1, 1], [], []>} : vector<16x50xf32>, vector<50x32xf32>, vector<16x32xf32> -> vector<16x32xf32>
    %9 = vector.shape_cast %8 : vector<16x32xf32> to vector<2x8x32xf32>
    %c0_4 = arith.constant 0 : index
    %c0_5 = arith.constant 0 : index
    %10 = vector.load %arg5[%c0_4, %c0_5] : memref<8x32xf32, #tpu.memory_space<vmem>>, vector<8x32xf32>
    %11 = vector.shape_cast %10 : vector<8x32xf32> to vector<1x8x32xf32>
    %12 = vector.broadcast %11 : vector<1x8x32xf32> to vector<2x8x32xf32>
    %13 = arith.addf %9, %12 : vector<2x8x32xf32>
    %14 = vector.shape_cast %13 : vector<2x8x32xf32> to vector<16x32xf32>
    %c0_6 = arith.constant 0 : index
    %c0_7 = arith.constant 0 : index
    %15 = vector.load %arg6[%c0_6, %c0_7] : memref<4x32xf32, #tpu.memory_space<vmem>>, vector<4x32xf32>
    %16 = vector.extract_strided_slice %15 {offsets = [0, 0], sizes = [1, 32], strides = [1, 1]} : vector<4x32xf32> to vector<1x32xf32>
    %17 = vector.extract_strided_slice %15 {offsets = [1, 0], sizes = [1, 32], strides = [1, 1]} : vector<4x32xf32> to vector<1x32xf32>
    %cst_8 = arith.constant dense<0.000000e+00> : vector<16xf32>
    %18 = vector.multi_reduction <add>, %14, %cst_8 [1] : vector<16x32xf32> to vector<16xf32>
    %19 = vector.shape_cast %18 : vector<16xf32> to vector<16x1xf32>
    %cst_9 = arith.constant 3.200000e+01 : f32
    %20 = vector.broadcast %cst_9 : f32 to vector<16x1xf32>
    %21 = arith.divf %19, %20 : vector<16x1xf32>
    %22 = vector.broadcast %21 : vector<16x1xf32> to vector<16x32xf32>
    %23 = arith.subf %14, %22 : vector<16x32xf32>
    %24 = arith.mulf %23, %23 : vector<16x32xf32>
    %cst_10 = arith.constant dense<0.000000e+00> : vector<16xf32>
    %25 = vector.multi_reduction <add>, %24, %cst_10 [1] : vector<16x32xf32> to vector<16xf32>
    %26 = vector.shape_cast %25 : vector<16xf32> to vector<16x1xf32>
    %cst_11 = arith.constant 3.100000e+01 : f32
    %27 = vector.broadcast %cst_11 : f32 to vector<16x1xf32>
    %28 = arith.divf %26, %27 : vector<16x1xf32>
    %29 = math.sqrt %28 : vector<16x1xf32>
    %30 = vector.broadcast %16 : vector<1x32xf32> to vector<16x32xf32>
    %31 = arith.mulf %30, %23 : vector<16x32xf32>
    %cst_12 = arith.constant 9.99999997E-7 : f32
    %32 = vector.broadcast %cst_12 : f32 to vector<16x1xf32>
    %33 = arith.addf %29, %32 : vector<16x1xf32>
    %34 = vector.broadcast %33 : vector<16x1xf32> to vector<16x32xf32>
    %35 = arith.divf %31, %34 : vector<16x32xf32>
    %36 = vector.broadcast %17 : vector<1x32xf32> to vector<16x32xf32>
    %37 = arith.addf %35, %36 : vector<16x32xf32>
    %c0_13 = arith.constant 0 : index
    %c0_14 = arith.constant 0 : index
    %c0_15 = arith.constant 0 : index
    %38 = vector.load %arg2[%c0_13, %c0_14, %c0_15] : memref<2x1x8xi32, #tpu.memory_space<vmem>>, vector<2x1x8xi32>
    %c1_i32 = arith.constant 1 : i32
    %39 = vector.broadcast %c1_i32 : i32 to vector<2x1x8xi32>
    %40 = arith.cmpi eq, %38, %39 : vector<2x1x8xi32>
    %cst_16 = arith.constant 0.000000e+00 : f32
    %cst_17 = arith.constant -1.000000e+09 : f32
    %41 = vector.broadcast %cst_16 : f32 to vector<2x1x8xf32>
    %42 = vector.broadcast %cst_17 : f32 to vector<2x1x8xf32>
    %43 = arith.select %40, %41, %42 : vector<2x1x8xi1>, vector<2x1x8xf32>
    %44 = vector.shape_cast %43 : vector<2x1x8xf32> to vector<2x1x1x8xf32>
    %45 = tpu.iota {dimensions = array<i32: 1>} : vector<8x32xi32>
    %46 = tpu.iota {dimensions = array<i32: 0>} : vector<8x32xi32>
    %c4_i32 = arith.constant 4 : i32
    %47 = vector.broadcast %c4_i32 : i32 to vector<8x32xi32>
    %48 = arith.muli %46, %47 : vector<8x32xi32>
    %49 = arith.cmpi sge, %45, %48 : vector<8x32xi32>
    %c4_i32_18 = arith.constant 4 : i32
    %50 = vector.broadcast %c4_i32_18 : i32 to vector<8x32xi32>
    %51 = arith.addi %48, %50 : vector<8x32xi32>
    %52 = arith.cmpi slt, %45, %51 : vector<8x32xi32>
    %53 = arith.andi %49, %52 : vector<8x32xi1>
    %54 = arith.extui %53 : vector<8x32xi1> to vector<8x32xi32>
    %55 = arith.sitofp %54 : vector<8x32xi32> to vector<8x32xf32>
    %c0_19 = arith.constant 0 : index
    %c0_20 = arith.constant 0 : index
    %c0_21 = arith.constant 0 : index
    %56 = vector.load %arg7[%c0_19, %c0_20, %c0_21] : memref<2x9x32xf32, #tpu.memory_space<vmem>>, vector<1x9x32xf32>
    %57 = vector.shape_cast %56 : vector<1x9x32xf32> to vector<9x32xf32>
    %58 = vector.extract_strided_slice %57 {offsets = [0, 0], sizes = [1, 32], strides = [1, 1]} : vector<9x32xf32> to vector<1x32xf32>
    %59 = vector.extract_strided_slice %57 {offsets = [1, 0], sizes = [1, 32], strides = [1, 1]} : vector<9x32xf32> to vector<1x32xf32>
    %60 = vector.extract_strided_slice %57 {offsets = [2, 0], sizes = [1, 32], strides = [1, 1]} : vector<9x32xf32> to vector<1x32xf32>
    %61 = vector.extract_strided_slice %57 {offsets = [3, 0], sizes = [1, 32], strides = [1, 1]} : vector<9x32xf32> to vector<1x32xf32>
    %62 = vector.extract_strided_slice %57 {offsets = [4, 0], sizes = [1, 32], strides = [1, 1]} : vector<9x32xf32> to vector<1x32xf32>
    %63 = vector.extract_strided_slice %57 {offsets = [5, 0], sizes = [1, 32], strides = [1, 1]} : vector<9x32xf32> to vector<1x32xf32>
    %64 = vector.extract_strided_slice %57 {offsets = [6, 0], sizes = [1, 32], strides = [1, 1]} : vector<9x32xf32> to vector<1x32xf32>
    %65 = vector.extract_strided_slice %57 {offsets = [7, 0], sizes = [1, 32], strides = [1, 1]} : vector<9x32xf32> to vector<1x32xf32>
    %66 = vector.extract_strided_slice %57 {offsets = [8, 0], sizes = [1, 32], strides = [1, 1]} : vector<9x32xf32> to vector<1x32xf32>
    %cst_22 = arith.constant dense<0.000000e+00> : vector<16xf32>
    %67 = vector.multi_reduction <add>, %37, %cst_22 [1] : vector<16x32xf32> to vector<16xf32>
    %68 = vector.shape_cast %67 : vector<16xf32> to vector<16x1xf32>
    %cst_23 = arith.constant 3.200000e+01 : f32
    %69 = vector.broadcast %cst_23 : f32 to vector<16x1xf32>
    %70 = arith.divf %68, %69 : vector<16x1xf32>
    %71 = vector.broadcast %70 : vector<16x1xf32> to vector<16x32xf32>
    %72 = arith.subf %37, %71 : vector<16x32xf32>
    %73 = arith.mulf %72, %72 : vector<16x32xf32>
    %cst_24 = arith.constant dense<0.000000e+00> : vector<16xf32>
    %74 = vector.multi_reduction <add>, %73, %cst_24 [1] : vector<16x32xf32> to vector<16xf32>
    %75 = vector.shape_cast %74 : vector<16xf32> to vector<16x1xf32>
    %cst_25 = arith.constant 3.100000e+01 : f32
    %76 = vector.broadcast %cst_25 : f32 to vector<16x1xf32>
    %77 = arith.divf %75, %76 : vector<16x1xf32>
    %78 = math.sqrt %77 : vector<16x1xf32>
    %79 = vector.broadcast %58 : vector<1x32xf32> to vector<16x32xf32>
    %80 = arith.mulf %79, %72 : vector<16x32xf32>
    %cst_26 = arith.constant 9.99999997E-7 : f32
    %81 = vector.broadcast %cst_26 : f32 to vector<16x1xf32>
    %82 = arith.addf %78, %81 : vector<16x1xf32>
    %83 = vector.broadcast %82 : vector<16x1xf32> to vector<16x32xf32>
    %84 = arith.divf %80, %83 : vector<16x32xf32>
    %85 = vector.broadcast %59 : vector<1x32xf32> to vector<16x32xf32>
    %86 = arith.addf %84, %85 : vector<16x32xf32>
    %87 = arith.truncf %86 : vector<16x32xf32> to vector<16x32xbf16>
    %c0_27 = arith.constant 0 : index
    %c0_28 = arith.constant 0 : index
    %c0_29 = arith.constant 0 : index
    %88 = vector.load %arg8[%c0_27, %c0_28, %c0_29] : memref<2x32x32xbf16, #tpu.memory_space<vmem>>, vector<1x32x32xbf16>
    %89 = vector.shape_cast %88 : vector<1x32x32xbf16> to vector<32x32xbf16>
    %cst_30 = arith.constant dense<0.000000e+00> : vector<16x32xf32>
    %90 = tpu.matmul %87, %89, %cst_30 {dimension_numbers = #tpu.dot_dimension_numbers<[1], [0], [0], [1], [0, 0, 1, 1], [], []>} : vector<16x32xbf16>, vector<32x32xbf16>, vector<16x32xf32> -> vector<16x32xf32>
    %91 = vector.broadcast %60 : vector<1x32xf32> to vector<16x32xf32>
    %92 = arith.addf %90, %91 : vector<16x32xf32>
    %c0_31 = arith.constant 0 : index
    %c0_32 = arith.constant 0 : index
    %c0_33 = arith.constant 0 : index
    %93 = vector.load %arg9[%c0_31, %c0_32, %c0_33] : memref<2x32x32xbf16, #tpu.memory_space<vmem>>, vector<1x32x32xbf16>
    %94 = vector.shape_cast %93 : vector<1x32x32xbf16> to vector<32x32xbf16>
    %cst_34 = arith.constant dense<0.000000e+00> : vector<16x32xf32>
    %95 = tpu.matmul %87, %94, %cst_34 {dimension_numbers = #tpu.dot_dimension_numbers<[1], [0], [0], [1], [0, 0, 1, 1], [], []>} : vector<16x32xbf16>, vector<32x32xbf16>, vector<16x32xf32> -> vector<16x32xf32>
    %96 = vector.broadcast %61 : vector<1x32xf32> to vector<16x32xf32>
    %97 = arith.addf %95, %96 : vector<16x32xf32>
    %c0_35 = arith.constant 0 : index
    %c0_36 = arith.constant 0 : index
    %c0_37 = arith.constant 0 : index
    %98 = vector.load %arg10[%c0_35, %c0_36, %c0_37] : memref<2x32x32xbf16, #tpu.memory_space<vmem>>, vector<1x32x32xbf16>
    %99 = vector.shape_cast %98 : vector<1x32x32xbf16> to vector<32x32xbf16>
    %cst_38 = arith.constant dense<0.000000e+00> : vector<16x32xf32>
    %100 = tpu.matmul %87, %99, %cst_38 {dimension_numbers = #tpu.dot_dimension_numbers<[1], [0], [0], [1], [0, 0, 1, 1], [], []>} : vector<16x32xbf16>, vector<32x32xbf16>, vector<16x32xf32> -> vector<16x32xf32>
    %101 = vector.broadcast %62 : vector<1x32xf32> to vector<16x32xf32>
    %102 = arith.addf %100, %101 : vector<16x32xf32>
    %103 = vector.shape_cast %97 : vector<16x32xf32> to vector<2x1x8x32xf32>
    %104 = vector.shape_cast %55 : vector<8x32xf32> to vector<1x8x1x32xf32>
    %105 = vector.broadcast %103 : vector<2x1x8x32xf32> to vector<2x8x8x32xf32>
    %106 = vector.broadcast %104 : vector<1x8x1x32xf32> to vector<2x8x8x32xf32>
    %107 = arith.mulf %105, %106 : vector<2x8x8x32xf32>
    %108 = vector.shape_cast %107 : vector<2x8x8x32xf32> to vector<2x64x32xf32>
    %109 = vector.shape_cast %102 : vector<16x32xf32> to vector<2x1x8x32xf32>
    %110 = vector.shape_cast %55 : vector<8x32xf32> to vector<1x8x1x32xf32>
    %111 = vector.broadcast %109 : vector<2x1x8x32xf32> to vector<2x8x8x32xf32>
    %112 = vector.broadcast %110 : vector<1x8x1x32xf32> to vector<2x8x8x32xf32>
    %113 = arith.mulf %111, %112 : vector<2x8x8x32xf32>
    %114 = vector.shape_cast %113 : vector<2x8x8x32xf32> to vector<2x64x32xf32>
    %cst_39 = arith.constant 5.000000e-01 : f32
    %115 = vector.broadcast %cst_39 : f32 to vector<16x32xf32>
    %116 = arith.mulf %92, %115 : vector<16x32xf32>
    %117 = vector.shape_cast %116 : vector<16x32xf32> to vector<2x8x32xf32>
    %118 = arith.truncf %117 : vector<2x8x32xf32> to vector<2x8x32xbf16>
    %119 = arith.truncf %108 : vector<2x64x32xf32> to vector<2x64x32xbf16>
    "tpu.trace_start"() <{level = 10 : i32, message = "bqc,bkc->bqk"}> : () -> ()
    %cst_40 = arith.constant dense<0.000000e+00> : vector<2x8x64xf32>
    %120 = tpu.matmul %118, %119, %cst_40 {dimension_numbers = #tpu.dot_dimension_numbers<[2], [2], [1], [1], [0, 0, 0, 1, 1, 1], [0], [0]>} : vector<2x8x32xbf16>, vector<2x64x32xbf16>, vector<2x8x64xf32> -> vector<2x8x64xf32>
    "tpu.trace_stop"() : () -> ()
    %121 = vector.shape_cast %120 : vector<2x8x64xf32> to vector<2x8x8x8xf32>
    %122 = vector.broadcast %44 : vector<2x1x1x8xf32> to vector<2x8x8x8xf32>
    %123 = arith.addf %121, %122 : vector<2x8x8x8xf32>
    %cst_41 = arith.constant dense<0xFF800000> : vector<2x8x8xf32>
    %124 = vector.multi_reduction <maximumf>, %123, %cst_41 [3] : vector<2x8x8x8xf32> to vector<2x8x8xf32>
    %125 = vector.shape_cast %124 : vector<2x8x8xf32> to vector<2x8x8x1xf32>
    %126 = vector.broadcast %125 : vector<2x8x8x1xf32> to vector<2x8x8x8xf32>
    %127 = arith.subf %123, %126 : vector<2x8x8x8xf32>
    %128 = math.exp %127 : vector<2x8x8x8xf32>
    %cst_42 = arith.constant dense<0.000000e+00> : vector<2x8x8xf32>
    %129 = vector.multi_reduction <add>, %128, %cst_42 [3] : vector<2x8x8x8xf32> to vector<2x8x8xf32>
    %130 = vector.shape_cast %129 : vector<2x8x8xf32> to vector<2x8x8x1xf32>
    %131 = vector.broadcast %130 : vector<2x8x8x1xf32> to vector<2x8x8x8xf32>
    %132 = arith.divf %128, %131 : vector<2x8x8x8xf32>
    %133 = vector.shape_cast %132 : vector<2x8x8x8xf32> to vector<2x8x64xf32>
    %134 = arith.truncf %133 : vector<2x8x64xf32> to vector<2x8x64xbf16>
    %135 = arith.truncf %114 : vector<2x64x32xf32> to vector<2x64x32xbf16>
    "tpu.trace_start"() <{level = 10 : i32, message = "bqk,bkc->bqc"}> : () -> ()
    %cst_43 = arith.constant dense<0.000000e+00> : vector<2x8x32xf32>
    %136 = tpu.matmul %134, %135, %cst_43 {dimension_numbers = #tpu.dot_dimension_numbers<[2], [1], [1], [2], [0, 0, 0, 1, 1, 2], [0], [0]>} : vector<2x8x64xbf16>, vector<2x64x32xbf16>, vector<2x8x32xf32> -> vector<2x8x32xf32>
    "tpu.trace_stop"() : () -> ()
    %137 = vector.shape_cast %136 : vector<2x8x32xf32> to vector<16x32xf32>
    %138 = arith.truncf %137 : vector<16x32xf32> to vector<16x32xbf16>
    %c0_44 = arith.constant 0 : index
    %c0_45 = arith.constant 0 : index
    %c0_46 = arith.constant 0 : index
    %139 = vector.load %arg11[%c0_44, %c0_45, %c0_46] : memref<2x32x32xbf16, #tpu.memory_space<vmem>>, vector<1x32x32xbf16>
    %140 = vector.shape_cast %139 : vector<1x32x32xbf16> to vector<32x32xbf16>
    %cst_47 = arith.constant dense<0.000000e+00> : vector<16x32xf32>
    %141 = tpu.matmul %138, %140, %cst_47 {dimension_numbers = #tpu.dot_dimension_numbers<[1], [0], [0], [1], [0, 0, 1, 1], [], []>} : vector<16x32xbf16>, vector<32x32xbf16>, vector<16x32xf32> -> vector<16x32xf32>
    %142 = vector.broadcast %63 : vector<1x32xf32> to vector<16x32xf32>
    %143 = arith.addf %141, %142 : vector<16x32xf32>
    %144 = arith.addf %37, %143 : vector<16x32xf32>
    %cst_48 = arith.constant dense<0.000000e+00> : vector<16xf32>
    %145 = vector.multi_reduction <add>, %144, %cst_48 [1] : vector<16x32xf32> to vector<16xf32>
    %146 = vector.shape_cast %145 : vector<16xf32> to vector<16x1xf32>
    %cst_49 = arith.constant 3.200000e+01 : f32
    %147 = vector.broadcast %cst_49 : f32 to vector<16x1xf32>
    %148 = arith.divf %146, %147 : vector<16x1xf32>
    %149 = vector.broadcast %148 : vector<16x1xf32> to vector<16x32xf32>
    %150 = arith.subf %144, %149 : vector<16x32xf32>
    %151 = arith.mulf %150, %150 : vector<16x32xf32>
    %cst_50 = arith.constant dense<0.000000e+00> : vector<16xf32>
    %152 = vector.multi_reduction <add>, %151, %cst_50 [1] : vector<16x32xf32> to vector<16xf32>
    %153 = vector.shape_cast %152 : vector<16xf32> to vector<16x1xf32>
    %cst_51 = arith.constant 3.100000e+01 : f32
    %154 = vector.broadcast %cst_51 : f32 to vector<16x1xf32>
    %155 = arith.divf %153, %154 : vector<16x1xf32>
    %156 = math.sqrt %155 : vector<16x1xf32>
    %157 = vector.broadcast %64 : vector<1x32xf32> to vector<16x32xf32>
    %158 = arith.mulf %157, %150 : vector<16x32xf32>
    %cst_52 = arith.constant 9.99999997E-7 : f32
    %159 = vector.broadcast %cst_52 : f32 to vector<16x1xf32>
    %160 = arith.addf %156, %159 : vector<16x1xf32>
    %161 = vector.broadcast %160 : vector<16x1xf32> to vector<16x32xf32>
    %162 = arith.divf %158, %161 : vector<16x32xf32>
    %163 = vector.broadcast %65 : vector<1x32xf32> to vector<16x32xf32>
    %164 = arith.addf %162, %163 : vector<16x32xf32>
    %165 = arith.truncf %164 : vector<16x32xf32> to vector<16x32xbf16>
    %c0_53 = arith.constant 0 : index
    %c0_54 = arith.constant 0 : index
    %c0_55 = arith.constant 0 : index
    %166 = vector.load %arg12[%c0_53, %c0_54, %c0_55] : memref<2x32x64xbf16, #tpu.memory_space<vmem>>, vector<1x32x64xbf16>
    %167 = vector.shape_cast %166 : vector<1x32x64xbf16> to vector<32x64xbf16>
    %cst_56 = arith.constant dense<0.000000e+00> : vector<16x64xf32>
    %168 = tpu.matmul %165, %167, %cst_56 {dimension_numbers = #tpu.dot_dimension_numbers<[1], [0], [0], [1], [0, 0, 1, 1], [], []>} : vector<16x32xbf16>, vector<32x64xbf16>, vector<16x64xf32> -> vector<16x64xf32>
    %c0_57 = arith.constant 0 : index
    %c0_58 = arith.constant 0 : index
    %c0_59 = arith.constant 0 : index
    %169 = vector.load %arg13[%c0_57, %c0_58, %c0_59] : memref<2x1x64xf32, #tpu.memory_space<vmem>>, vector<1x1x64xf32>
    %170 = vector.shape_cast %169 : vector<1x1x64xf32> to vector<1x64xf32>
    %171 = vector.broadcast %170 : vector<1x64xf32> to vector<16x64xf32>
    %172 = arith.addf %168, %171 : vector<16x64xf32>
    %cst_60 = arith.constant 0.000000e+00 : f32
    %173 = vector.broadcast %cst_60 : f32 to vector<16x64xf32>
    %174 = arith.maximumf %172, %173 : vector<16x64xf32>
    %175 = arith.truncf %174 : vector<16x64xf32> to vector<16x64xbf16>
    %c0_61 = arith.constant 0 : index
    %c0_62 = arith.constant 0 : index
    %c0_63 = arith.constant 0 : index
    %176 = vector.load %arg14[%c0_61, %c0_62, %c0_63] : memref<2x64x32xbf16, #tpu.memory_space<vmem>>, vector<1x64x32xbf16>
    %177 = vector.shape_cast %176 : vector<1x64x32xbf16> to vector<64x32xbf16>
    %cst_64 = arith.constant dense<0.000000e+00> : vector<16x32xf32>
    %178 = tpu.matmul %175, %177, %cst_64 {dimension_numbers = #tpu.dot_dimension_numbers<[1], [0], [0], [1], [0, 0, 1, 1], [], []>} : vector<16x64xbf16>, vector<64x32xbf16>, vector<16x32xf32> -> vector<16x32xf32>
    %179 = arith.addf %144, %178 : vector<16x32xf32>
    %180 = vector.broadcast %66 : vector<1x32xf32> to vector<16x32xf32>
    %181 = arith.addf %179, %180 : vector<16x32xf32>
    %c1 = arith.constant 1 : index
    %c0_65 = arith.constant 0 : index
    %c0_66 = arith.constant 0 : index
    %182 = vector.load %arg7[%c1, %c0_65, %c0_66] : memref<2x9x32xf32, #tpu.memory_space<vmem>>, vector<1x9x32xf32>
    %183 = vector.shape_cast %182 : vector<1x9x32xf32> to vector<9x32xf32>
    %184 = vector.extract_strided_slice %183 {offsets = [0, 0], sizes = [1, 32], strides = [1, 1]} : vector<9x32xf32> to vector<1x32xf32>
    %185 = vector.extract_strided_slice %183 {offsets = [1, 0], sizes = [1, 32], strides = [1, 1]} : vector<9x32xf32> to vector<1x32xf32>
    %186 = vector.extract_strided_slice %183 {offsets = [2, 0], sizes = [1, 32], strides = [1, 1]} : vector<9x32xf32> to vector<1x32xf32>
    %187 = vector.extract_strided_slice %183 {offsets = [3, 0], sizes = [1, 32], strides = [1, 1]} : vector<9x32xf32> to vector<1x32xf32>
    %188 = vector.extract_strided_slice %183 {offsets = [4, 0], sizes = [1, 32], strides = [1, 1]} : vector<9x32xf32> to vector<1x32xf32>
    %189 = vector.extract_strided_slice %183 {offsets = [5, 0], sizes = [1, 32], strides = [1, 1]} : vector<9x32xf32> to vector<1x32xf32>
    %190 = vector.extract_strided_slice %183 {offsets = [6, 0], sizes = [1, 32], strides = [1, 1]} : vector<9x32xf32> to vector<1x32xf32>
    %191 = vector.extract_strided_slice %183 {offsets = [7, 0], sizes = [1, 32], strides = [1, 1]} : vector<9x32xf32> to vector<1x32xf32>
    %192 = vector.extract_strided_slice %183 {offsets = [8, 0], sizes = [1, 32], strides = [1, 1]} : vector<9x32xf32> to vector<1x32xf32>
    %cst_67 = arith.constant dense<0.000000e+00> : vector<16xf32>
    %193 = vector.multi_reduction <add>, %181, %cst_67 [1] : vector<16x32xf32> to vector<16xf32>
    %194 = vector.shape_cast %193 : vector<16xf32> to vector<16x1xf32>
    %cst_68 = arith.constant 3.200000e+01 : f32
    %195 = vector.broadcast %cst_68 : f32 to vector<16x1xf32>
    %196 = arith.divf %194, %195 : vector<16x1xf32>
    %197 = vector.broadcast %196 : vector<16x1xf32> to vector<16x32xf32>
    %198 = arith.subf %181, %197 : vector<16x32xf32>
    %199 = arith.mulf %198, %198 : vector<16x32xf32>
    %cst_69 = arith.constant dense<0.000000e+00> : vector<16xf32>
    %200 = vector.multi_reduction <add>, %199, %cst_69 [1] : vector<16x32xf32> to vector<16xf32>
    %201 = vector.shape_cast %200 : vector<16xf32> to vector<16x1xf32>
    %cst_70 = arith.constant 3.100000e+01 : f32
    %202 = vector.broadcast %cst_70 : f32 to vector<16x1xf32>
    %203 = arith.divf %201, %202 : vector<16x1xf32>
    %204 = math.sqrt %203 : vector<16x1xf32>
    %205 = vector.broadcast %184 : vector<1x32xf32> to vector<16x32xf32>
    %206 = arith.mulf %205, %198 : vector<16x32xf32>
    %cst_71 = arith.constant 9.99999997E-7 : f32
    %207 = vector.broadcast %cst_71 : f32 to vector<16x1xf32>
    %208 = arith.addf %204, %207 : vector<16x1xf32>
    %209 = vector.broadcast %208 : vector<16x1xf32> to vector<16x32xf32>
    %210 = arith.divf %206, %209 : vector<16x32xf32>
    %211 = vector.broadcast %185 : vector<1x32xf32> to vector<16x32xf32>
    %212 = arith.addf %210, %211 : vector<16x32xf32>
    %213 = arith.truncf %212 : vector<16x32xf32> to vector<16x32xbf16>
    %c1_72 = arith.constant 1 : index
    %c0_73 = arith.constant 0 : index
    %c0_74 = arith.constant 0 : index
    %214 = vector.load %arg8[%c1_72, %c0_73, %c0_74] : memref<2x32x32xbf16, #tpu.memory_space<vmem>>, vector<1x32x32xbf16>
    %215 = vector.shape_cast %214 : vector<1x32x32xbf16> to vector<32x32xbf16>
    %cst_75 = arith.constant dense<0.000000e+00> : vector<16x32xf32>
    %216 = tpu.matmul %213, %215, %cst_75 {dimension_numbers = #tpu.dot_dimension_numbers<[1], [0], [0], [1], [0, 0, 1, 1], [], []>} : vector<16x32xbf16>, vector<32x32xbf16>, vector<16x32xf32> -> vector<16x32xf32>
    %217 = vector.broadcast %186 : vector<1x32xf32> to vector<16x32xf32>
    %218 = arith.addf %216, %217 : vector<16x32xf32>
    %c1_76 = arith.constant 1 : index
    %c0_77 = arith.constant 0 : index
    %c0_78 = arith.constant 0 : index
    %219 = vector.load %arg9[%c1_76, %c0_77, %c0_78] : memref<2x32x32xbf16, #tpu.memory_space<vmem>>, vector<1x32x32xbf16>
    %220 = vector.shape_cast %219 : vector<1x32x32xbf16> to vector<32x32xbf16>
    %cst_79 = arith.constant dense<0.000000e+00> : vector<16x32xf32>
    %221 = tpu.matmul %213, %220, %cst_79 {dimension_numbers = #tpu.dot_dimension_numbers<[1], [0], [0], [1], [0, 0, 1, 1], [], []>} : vector<16x32xbf16>, vector<32x32xbf16>, vector<16x32xf32> -> vector<16x32xf32>
    %222 = vector.broadcast %187 : vector<1x32xf32> to vector<16x32xf32>
    %223 = arith.addf %221, %222 : vector<16x32xf32>
    %c1_80 = arith.constant 1 : index
    %c0_81 = arith.constant 0 : index
    %c0_82 = arith.constant 0 : index
    %224 = vector.load %arg10[%c1_80, %c0_81, %c0_82] : memref<2x32x32xbf16, #tpu.memory_space<vmem>>, vector<1x32x32xbf16>
    %225 = vector.shape_cast %224 : vector<1x32x32xbf16> to vector<32x32xbf16>
    %cst_83 = arith.constant dense<0.000000e+00> : vector<16x32xf32>
    %226 = tpu.matmul %213, %225, %cst_83 {dimension_numbers = #tpu.dot_dimension_numbers<[1], [0], [0], [1], [0, 0, 1, 1], [], []>} : vector<16x32xbf16>, vector<32x32xbf16>, vector<16x32xf32> -> vector<16x32xf32>
    %227 = vector.broadcast %188 : vector<1x32xf32> to vector<16x32xf32>
    %228 = arith.addf %226, %227 : vector<16x32xf32>
    %229 = vector.shape_cast %223 : vector<16x32xf32> to vector<2x1x8x32xf32>
    %230 = vector.shape_cast %55 : vector<8x32xf32> to vector<1x8x1x32xf32>
    %231 = vector.broadcast %229 : vector<2x1x8x32xf32> to vector<2x8x8x32xf32>
    %232 = vector.broadcast %230 : vector<1x8x1x32xf32> to vector<2x8x8x32xf32>
    %233 = arith.mulf %231, %232 : vector<2x8x8x32xf32>
    %234 = vector.shape_cast %233 : vector<2x8x8x32xf32> to vector<2x64x32xf32>
    %235 = vector.shape_cast %228 : vector<16x32xf32> to vector<2x1x8x32xf32>
    %236 = vector.shape_cast %55 : vector<8x32xf32> to vector<1x8x1x32xf32>
    %237 = vector.broadcast %235 : vector<2x1x8x32xf32> to vector<2x8x8x32xf32>
    %238 = vector.broadcast %236 : vector<1x8x1x32xf32> to vector<2x8x8x32xf32>
    %239 = arith.mulf %237, %238 : vector<2x8x8x32xf32>
    %240 = vector.shape_cast %239 : vector<2x8x8x32xf32> to vector<2x64x32xf32>
    %cst_84 = arith.constant 5.000000e-01 : f32
    %241 = vector.broadcast %cst_84 : f32 to vector<16x32xf32>
    %242 = arith.mulf %218, %241 : vector<16x32xf32>
    %243 = vector.shape_cast %242 : vector<16x32xf32> to vector<2x8x32xf32>
    %244 = arith.truncf %243 : vector<2x8x32xf32> to vector<2x8x32xbf16>
    %245 = arith.truncf %234 : vector<2x64x32xf32> to vector<2x64x32xbf16>
    "tpu.trace_start"() <{level = 10 : i32, message = "bqc,bkc->bqk"}> : () -> ()
    %cst_85 = arith.constant dense<0.000000e+00> : vector<2x8x64xf32>
    %246 = tpu.matmul %244, %245, %cst_85 {dimension_numbers = #tpu.dot_dimension_numbers<[2], [2], [1], [1], [0, 0, 0, 1, 1, 1], [0], [0]>} : vector<2x8x32xbf16>, vector<2x64x32xbf16>, vector<2x8x64xf32> -> vector<2x8x64xf32>
    "tpu.trace_stop"() : () -> ()
    %247 = vector.shape_cast %246 : vector<2x8x64xf32> to vector<2x8x8x8xf32>
    %248 = vector.broadcast %44 : vector<2x1x1x8xf32> to vector<2x8x8x8xf32>
    %249 = arith.addf %247, %248 : vector<2x8x8x8xf32>
    %cst_86 = arith.constant dense<0xFF800000> : vector<2x8x8xf32>
    %250 = vector.multi_reduction <maximumf>, %249, %cst_86 [3] : vector<2x8x8x8xf32> to vector<2x8x8xf32>
    %251 = vector.shape_cast %250 : vector<2x8x8xf32> to vector<2x8x8x1xf32>
    %252 = vector.broadcast %251 : vector<2x8x8x1xf32> to vector<2x8x8x8xf32>
    %253 = arith.subf %249, %252 : vector<2x8x8x8xf32>
    %254 = math.exp %253 : vector<2x8x8x8xf32>
    %cst_87 = arith.constant dense<0.000000e+00> : vector<2x8x8xf32>
    %255 = vector.multi_reduction <add>, %254, %cst_87 [3] : vector<2x8x8x8xf32> to vector<2x8x8xf32>
    %256 = vector.shape_cast %255 : vector<2x8x8xf32> to vector<2x8x8x1xf32>
    %257 = vector.broadcast %256 : vector<2x8x8x1xf32> to vector<2x8x8x8xf32>
    %258 = arith.divf %254, %257 : vector<2x8x8x8xf32>
    %259 = vector.shape_cast %258 : vector<2x8x8x8xf32> to vector<2x8x64xf32>
    %260 = arith.truncf %259 : vector<2x8x64xf32> to vector<2x8x64xbf16>
    %261 = arith.truncf %240 : vector<2x64x32xf32> to vector<2x64x32xbf16>
    "tpu.trace_start"() <{level = 10 : i32, message = "bqk,bkc->bqc"}> : () -> ()
    %cst_88 = arith.constant dense<0.000000e+00> : vector<2x8x32xf32>
    %262 = tpu.matmul %260, %261, %cst_88 {dimension_numbers = #tpu.dot_dimension_numbers<[2], [1], [1], [2], [0, 0, 0, 1, 1, 2], [0], [0]>} : vector<2x8x64xbf16>, vector<2x64x32xbf16>, vector<2x8x32xf32> -> vector<2x8x32xf32>
    "tpu.trace_stop"() : () -> ()
    %263 = vector.shape_cast %262 : vector<2x8x32xf32> to vector<16x32xf32>
    %264 = arith.truncf %263 : vector<16x32xf32> to vector<16x32xbf16>
    %c1_89 = arith.constant 1 : index
    %c0_90 = arith.constant 0 : index
    %c0_91 = arith.constant 0 : index
    %265 = vector.load %arg11[%c1_89, %c0_90, %c0_91] : memref<2x32x32xbf16, #tpu.memory_space<vmem>>, vector<1x32x32xbf16>
    %266 = vector.shape_cast %265 : vector<1x32x32xbf16> to vector<32x32xbf16>
    %cst_92 = arith.constant dense<0.000000e+00> : vector<16x32xf32>
    %267 = tpu.matmul %264, %266, %cst_92 {dimension_numbers = #tpu.dot_dimension_numbers<[1], [0], [0], [1], [0, 0, 1, 1], [], []>} : vector<16x32xbf16>, vector<32x32xbf16>, vector<16x32xf32> -> vector<16x32xf32>
    %268 = vector.broadcast %189 : vector<1x32xf32> to vector<16x32xf32>
    %269 = arith.addf %267, %268 : vector<16x32xf32>
    %270 = arith.addf %181, %269 : vector<16x32xf32>
    %cst_93 = arith.constant dense<0.000000e+00> : vector<16xf32>
    %271 = vector.multi_reduction <add>, %270, %cst_93 [1] : vector<16x32xf32> to vector<16xf32>
    %272 = vector.shape_cast %271 : vector<16xf32> to vector<16x1xf32>
    %cst_94 = arith.constant 3.200000e+01 : f32
    %273 = vector.broadcast %cst_94 : f32 to vector<16x1xf32>
    %274 = arith.divf %272, %273 : vector<16x1xf32>
    %275 = vector.broadcast %274 : vector<16x1xf32> to vector<16x32xf32>
    %276 = arith.subf %270, %275 : vector<16x32xf32>
    %277 = arith.mulf %276, %276 : vector<16x32xf32>
    %cst_95 = arith.constant dense<0.000000e+00> : vector<16xf32>
    %278 = vector.multi_reduction <add>, %277, %cst_95 [1] : vector<16x32xf32> to vector<16xf32>
    %279 = vector.shape_cast %278 : vector<16xf32> to vector<16x1xf32>
    %cst_96 = arith.constant 3.100000e+01 : f32
    %280 = vector.broadcast %cst_96 : f32 to vector<16x1xf32>
    %281 = arith.divf %279, %280 : vector<16x1xf32>
    %282 = math.sqrt %281 : vector<16x1xf32>
    %283 = vector.broadcast %190 : vector<1x32xf32> to vector<16x32xf32>
    %284 = arith.mulf %283, %276 : vector<16x32xf32>
    %cst_97 = arith.constant 9.99999997E-7 : f32
    %285 = vector.broadcast %cst_97 : f32 to vector<16x1xf32>
    %286 = arith.addf %282, %285 : vector<16x1xf32>
    %287 = vector.broadcast %286 : vector<16x1xf32> to vector<16x32xf32>
    %288 = arith.divf %284, %287 : vector<16x32xf32>
    %289 = vector.broadcast %191 : vector<1x32xf32> to vector<16x32xf32>
    %290 = arith.addf %288, %289 : vector<16x32xf32>
    %291 = arith.truncf %290 : vector<16x32xf32> to vector<16x32xbf16>
    %c1_98 = arith.constant 1 : index
    %c0_99 = arith.constant 0 : index
    %c0_100 = arith.constant 0 : index
    %292 = vector.load %arg12[%c1_98, %c0_99, %c0_100] : memref<2x32x64xbf16, #tpu.memory_space<vmem>>, vector<1x32x64xbf16>
    %293 = vector.shape_cast %292 : vector<1x32x64xbf16> to vector<32x64xbf16>
    %cst_101 = arith.constant dense<0.000000e+00> : vector<16x64xf32>
    %294 = tpu.matmul %291, %293, %cst_101 {dimension_numbers = #tpu.dot_dimension_numbers<[1], [0], [0], [1], [0, 0, 1, 1], [], []>} : vector<16x32xbf16>, vector<32x64xbf16>, vector<16x64xf32> -> vector<16x64xf32>
    %c1_102 = arith.constant 1 : index
    %c0_103 = arith.constant 0 : index
    %c0_104 = arith.constant 0 : index
    %295 = vector.load %arg13[%c1_102, %c0_103, %c0_104] : memref<2x1x64xf32, #tpu.memory_space<vmem>>, vector<1x1x64xf32>
    %296 = vector.shape_cast %295 : vector<1x1x64xf32> to vector<1x64xf32>
    %297 = vector.broadcast %296 : vector<1x64xf32> to vector<16x64xf32>
    %298 = arith.addf %294, %297 : vector<16x64xf32>
    %cst_105 = arith.constant 0.000000e+00 : f32
    %299 = vector.broadcast %cst_105 : f32 to vector<16x64xf32>
    %300 = arith.maximumf %298, %299 : vector<16x64xf32>
    %301 = arith.truncf %300 : vector<16x64xf32> to vector<16x64xbf16>
    %c1_106 = arith.constant 1 : index
    %c0_107 = arith.constant 0 : index
    %c0_108 = arith.constant 0 : index
    %302 = vector.load %arg14[%c1_106, %c0_107, %c0_108] : memref<2x64x32xbf16, #tpu.memory_space<vmem>>, vector<1x64x32xbf16>
    %303 = vector.shape_cast %302 : vector<1x64x32xbf16> to vector<64x32xbf16>
    %cst_109 = arith.constant dense<0.000000e+00> : vector<16x32xf32>
    %304 = tpu.matmul %301, %303, %cst_109 {dimension_numbers = #tpu.dot_dimension_numbers<[1], [0], [0], [1], [0, 0, 1, 1], [], []>} : vector<16x64xbf16>, vector<64x32xbf16>, vector<16x32xf32> -> vector<16x32xf32>
    %305 = arith.addf %270, %304 : vector<16x32xf32>
    %306 = vector.broadcast %192 : vector<1x32xf32> to vector<16x32xf32>
    %307 = arith.addf %305, %306 : vector<16x32xf32>
    %308 = vector.extract_strided_slice %15 {offsets = [2, 0], sizes = [1, 32], strides = [1, 1]} : vector<4x32xf32> to vector<1x32xf32>
    %309 = vector.extract_strided_slice %15 {offsets = [3, 0], sizes = [1, 32], strides = [1, 1]} : vector<4x32xf32> to vector<1x32xf32>
    %cst_110 = arith.constant dense<0.000000e+00> : vector<16xf32>
    %310 = vector.multi_reduction <add>, %307, %cst_110 [1] : vector<16x32xf32> to vector<16xf32>
    %311 = vector.shape_cast %310 : vector<16xf32> to vector<16x1xf32>
    %cst_111 = arith.constant 3.200000e+01 : f32
    %312 = vector.broadcast %cst_111 : f32 to vector<16x1xf32>
    %313 = arith.divf %311, %312 : vector<16x1xf32>
    %314 = vector.broadcast %313 : vector<16x1xf32> to vector<16x32xf32>
    %315 = arith.subf %307, %314 : vector<16x32xf32>
    %316 = arith.mulf %315, %315 : vector<16x32xf32>
    %cst_112 = arith.constant dense<0.000000e+00> : vector<16xf32>
    %317 = vector.multi_reduction <add>, %316, %cst_112 [1] : vector<16x32xf32> to vector<16xf32>
    %318 = vector.shape_cast %317 : vector<16xf32> to vector<16x1xf32>
    %cst_113 = arith.constant 3.100000e+01 : f32
    %319 = vector.broadcast %cst_113 : f32 to vector<16x1xf32>
    %320 = arith.divf %318, %319 : vector<16x1xf32>
    %321 = math.sqrt %320 : vector<16x1xf32>
    %322 = vector.broadcast %308 : vector<1x32xf32> to vector<16x32xf32>
    %323 = arith.mulf %322, %315 : vector<16x32xf32>
    %cst_114 = arith.constant 9.99999997E-7 : f32
    %324 = vector.broadcast %cst_114 : f32 to vector<16x1xf32>
    %325 = arith.addf %321, %324 : vector<16x1xf32>
    %326 = vector.broadcast %325 : vector<16x1xf32> to vector<16x32xf32>
    %327 = arith.divf %323, %326 : vector<16x32xf32>
    %328 = vector.broadcast %309 : vector<1x32xf32> to vector<16x32xf32>
    %329 = arith.addf %327, %328 : vector<16x32xf32>
    %330 = vector.shape_cast %329 : vector<16x32xf32> to vector<2x8x32xf32>
    %c0_115 = arith.constant 0 : index
    %c0_116 = arith.constant 0 : index
    %c0_117 = arith.constant 0 : index
    %331 = vector.load %arg17[%c0_115, %c0_116, %c0_117] : memref<2x8x32xf32, #tpu.memory_space<vmem>>, vector<2x8x32xf32>
    tpu.vector_store %arg17[%c0_115, %c0_116, %c0_117], %330 {strides = array<i32>} : memref<2x8x32xf32, #tpu.memory_space<vmem>>, vector<2x8x32xf32>,
    %332 = arith.truncf %329 : vector<16x32xf32> to vector<16x32xbf16>
    %c0_118 = arith.constant 0 : index
    %c0_119 = arith.constant 0 : index
    %333 = vector.load %arg15[%c0_118, %c0_119] : memref<32x9xbf16, #tpu.memory_space<vmem>>, vector<32x9xbf16>
    %cst_120 = arith.constant dense<0.000000e+00> : vector<16x9xf32>
    %334 = tpu.matmul %332, %333, %cst_120 {dimension_numbers = #tpu.dot_dimension_numbers<[1], [0], [0], [1], [0, 0, 1, 1], [], []>} : vector<16x32xbf16>, vector<32x9xbf16>, vector<16x9xf32> -> vector<16x9xf32>
    %c0_121 = arith.constant 0 : index
    %c0_122 = arith.constant 0 : index
    %335 = vector.load %arg16[%c0_121, %c0_122] : memref<1x9xf32, #tpu.memory_space<vmem>>, vector<1x9xf32>
    %336 = vector.broadcast %335 : vector<1x9xf32> to vector<16x9xf32>
    %337 = arith.addf %334, %336 : vector<16x9xf32>
    %cst_123 = arith.constant dense<0xFF800000> : vector<16xf32>
    %338 = vector.multi_reduction <maximumf>, %337, %cst_123 [1] : vector<16x9xf32> to vector<16xf32>
    %339 = vector.shape_cast %338 : vector<16xf32> to vector<16x1xf32>
    %340 = vector.broadcast %339 : vector<16x1xf32> to vector<16x9xf32>
    %341 = arith.subf %337, %340 : vector<16x9xf32>
    %342 = math.exp %341 : vector<16x9xf32>
    %cst_124 = arith.constant dense<0.000000e+00> : vector<16xf32>
    %343 = vector.multi_reduction <add>, %342, %cst_124 [1] : vector<16x9xf32> to vector<16xf32>
    %344 = vector.shape_cast %343 : vector<16xf32> to vector<16x1xf32>
    %345 = math.log %344 : vector<16x1xf32>
    %346 = vector.broadcast %345 : vector<16x1xf32> to vector<16x9xf32>
    %347 = arith.subf %341, %346 : vector<16x9xf32>
    %348 = tpu.iota {dimensions = array<i32: 1>} : vector<16x9xi32>
    %c0_125 = arith.constant 0 : index
    %c0_126 = arith.constant 0 : index
    %c0_127 = arith.constant 0 : index
    %349 = vector.load %arg3[%c0_125, %c0_126, %c0_127] : memref<2x8x1xi32, #tpu.memory_space<vmem>>, vector<2x8x1xi32>
    %350 = vector.shape_cast %349 : vector<2x8x1xi32> to vector<16x1xi32>
    %351 = vector.broadcast %350 : vector<16x1xi32> to vector<16x9xi32>
    %352 = arith.cmpi eq, %351, %348 : vector<16x9xi32>
    %353 = arith.extui %352 : vector<16x9xi1> to vector<16x9xi32>
    %354 = arith.sitofp %353 : vector<16x9xi32> to vector<16x9xf32>
    %355 = arith.mulf %347, %354 : vector<16x9xf32>
    %cst_128 = arith.constant dense<0.000000e+00> : vector<16xf32>
    %356 = vector.multi_reduction <add>, %355, %cst_128 [1] : vector<16x9xf32> to vector<16xf32>
    %357 = vector.shape_cast %356 : vector<16xf32> to vector<16x1xf32>
    %cst_129 = arith.constant 0.000000e+00 : f32
    %358 = vector.broadcast %cst_129 : f32 to vector<16x1xf32>
    %359 = arith.subf %358, %357 : vector<16x1xf32>
    %360 = vector.shape_cast %359 : vector<16x1xf32> to vector<2x8xf32>
    %cst_130 = arith.constant dense<0.000000e+00> : vector<2xf32>
    %361 = vector.multi_reduction <add>, %360, %cst_130 [1] : vector<2x8xf32> to vector<2xf32>
    %362 = vector.shape_cast %361 : vector<2xf32> to vector<2x1xf32>
    %363 = vector.shape_cast %362 : vector<2x1xf32> to vector<1x1x2xf32>
    %c0_131 = arith.constant 0 : index
    %c0_132 = arith.constant 0 : index
    %c0_133 = arith.constant 0 : index
    %364 = vector.load %arg18[%c0_131, %c0_132, %c0_133] : memref<1x1x2xf32, #tpu.memory_space<vmem>>, vector<1x1x2xf32>
    tpu.vector_store %arg18[%c0_131, %c0_132, %c0_133], %363 {strides = array<i32>} : memref<1x1x2xf32, #tpu.memory_space<vmem>>, vector<1x1x2xf32>,
    %cst_134 = arith.constant dense<0xFF800000> : vector<16xf32>
    %365 = vector.multi_reduction <maximumf>, %347, %cst_134 [1] : vector<16x9xf32> to vector<16xf32>
    %366 = vector.shape_cast %365 : vector<16xf32> to vector<16x1xf32>
    %367 = vector.broadcast %366 : vector<16x1xf32> to vector<16x9xf32>
    %368 = arith.cmpf oeq, %347, %367 : vector<16x9xf32>
    %c9_i32 = arith.constant 9 : i32
    %369 = vector.broadcast %c9_i32 : i32 to vector<16x9xi32>
    %370 = arith.select %368, %348, %369 : vector<16x9xi1>, vector<16x9xi32>
    %cst_135 = arith.constant dense<2147483647> : vector<16xi32>
    %371 = vector.multi_reduction <minsi>, %370, %cst_135 [1] : vector<16x9xi32> to vector<16xi32>
    %372 = vector.shape_cast %371 : vector<16xi32> to vector<16x1xi32>
    %373 = vector.shape_cast %372 : vector<16x1xi32> to vector<2x1x8xi32>
    %c0_136 = arith.constant 0 : index
    %c0_137 = arith.constant 0 : index
    %c0_138 = arith.constant 0 : index
    %374 = vector.load %arg19[%c0_136, %c0_137, %c0_138] : memref<2x1x8xi32, #tpu.memory_space<vmem>>, vector<2x1x8xi32>
    tpu.vector_store %arg19[%c0_136, %c0_137, %c0_138], %373 {strides = array<i32>} : memref<2x1x8xi32, #tpu.memory_space<vmem>>, vector<2x1x8xi32>,
    return
  }
  func.func @transform_0(%arg0: i32) -> (i32, i32, i32) {
    %c0_i32 = arith.constant 0 : i32
    %c0_i32_0 = arith.constant 0 : i32
    %c0_i32_1 = arith.constant 0 : i32
    return %arg0, %c0_i32, %c0_i32_0 : i32, i32, i32
  }
  func.func @transform_1(%arg0: i32) -> (i32, i32, i32) {
    %c0_i32 = arith.constant 0 : i32
    %c0_i32_0 = arith.constant 0 : i32
    %c0_i32_1 = arith.constant 0 : i32
    return %arg0, %c0_i32, %c0_i32_0 : i32, i32, i32
  }
  func.func @transform_2(%arg0: i32) -> (i32, i32, i32) {
    %c0_i32 = arith.constant 0 : i32
    %c0_i32_0 = arith.constant 0 : i32
    %c0_i32_1 = arith.constant 0 : i32
    return %arg0, %c0_i32, %c0_i32_0 : i32, i32, i32
  }
  func.func @transform_3(%arg0: i32) -> (i32, i32) {
    %c0_i32 = arith.constant 0 : i32
    %c0_i32_0 = arith.constant 0 : i32
    %c0_i32_1 = arith.constant 0 : i32
    return %c0_i32, %c0_i32_0 : i32, i32
  }
  func.func @transform_4(%arg0: i32) -> (i32, i32) {
    %c0_i32 = arith.constant 0 : i32
    %c0_i32_0 = arith.constant 0 : i32
    %c0_i32_1 = arith.constant 0 : i32
    return %c0_i32, %c0_i32_0 : i32, i32
  }
  func.func @transform_5(%arg0: i32) -> (i32, i32) {
    %c0_i32 = arith.constant 0 : i32
    %c0_i32_0 = arith.constant 0 : i32
    %c0_i32_1 = arith.constant 0 : i32
    return %c0_i32, %c0_i32_0 : i32, i32
  }
  func.func @transform_6(%arg0: i32) -> (i32, i32, i32) {
    %c0_i32 = arith.constant 0 : i32
    %c0_i32_0 = arith.constant 0 : i32
    %c0_i32_1 = arith.constant 0 : i32
    %c0_i32_2 = arith.constant 0 : i32
    return %c0_i32, %c0_i32_0, %c0_i32_1 : i32, i32, i32
  }
  func.func @transform_7(%arg0: i32) -> (i32, i32, i32) {
    %c0_i32 = arith.constant 0 : i32
    %c0_i32_0 = arith.constant 0 : i32
    %c0_i32_1 = arith.constant 0 : i32
    %c0_i32_2 = arith.constant 0 : i32
    return %c0_i32, %c0_i32_0, %c0_i32_1 : i32, i32, i32
  }
  func.func @transform_8(%arg0: i32) -> (i32, i32, i32) {
    %c0_i32 = arith.constant 0 : i32
    %c0_i32_0 = arith.constant 0 : i32
    %c0_i32_1 = arith.constant 0 : i32
    %c0_i32_2 = arith.constant 0 : i32
    return %c0_i32, %c0_i32_0, %c0_i32_1 : i32, i32, i32
  }
  func.func @transform_9(%arg0: i32) -> (i32, i32, i32) {
    %c0_i32 = arith.constant 0 : i32
    %c0_i32_0 = arith.constant 0 : i32
    %c0_i32_1 = arith.constant 0 : i32
    %c0_i32_2 = arith.constant 0 : i32
    return %c0_i32, %c0_i32_0, %c0_i32_1 : i32, i32, i32
  }
  func.func @transform_10(%arg0: i32) -> (i32, i32, i32) {
    %c0_i32 = arith.constant 0 : i32
    %c0_i32_0 = arith.constant 0 : i32
    %c0_i32_1 = arith.constant 0 : i32
    %c0_i32_2 = arith.constant 0 : i32
    return %c0_i32, %c0_i32_0, %c0_i32_1 : i32, i32, i32
  }
  func.func @transform_11(%arg0: i32) -> (i32, i32, i32) {
    %c0_i32 = arith.constant 0 : i32
    %c0_i32_0 = arith.constant 0 : i32
    %c0_i32_1 = arith.constant 0 : i32
    %c0_i32_2 = arith.constant 0 : i32
    return %c0_i32, %c0_i32_0, %c0_i32_1 : i32, i32, i32
  }
  func.func @transform_12(%arg0: i32) -> (i32, i32, i32) {
    %c0_i32 = arith.constant 0 : i32
    %c0_i32_0 = arith.constant 0 : i32
    %c0_i32_1 = arith.constant 0 : i32
    %c0_i32_2 = arith.constant 0 : i32
    return %c0_i32, %c0_i32_0, %c0_i32_1 : i32, i32, i32
  }
  func.func @transform_13(%arg0: i32) -> (i32, i32, i32) {
    %c0_i32 = arith.constant 0 : i32
    %c0_i32_0 = arith.constant 0 : i32
    %c0_i32_1 = arith.constant 0 : i32
    %c0_i32_2 = arith.constant 0 : i32
    return %c0_i32, %c0_i32_0, %c0_i32_1 : i32, i32, i32
  }
  func.func @transform_14(%arg0: i32) -> (i32, i32) {
    %c0_i32 = arith.constant 0 : i32
    %c0_i32_0 = arith.constant 0 : i32
    %c0_i32_1 = arith.constant 0 : i32
    return %c0_i32, %c0_i32_0 : i32, i32
  }
  func.func @transform_15(%arg0: i32) -> (i32, i32) {
    %c0_i32 = arith.constant 0 : i32
    %c0_i32_0 = arith.constant 0 : i32
    %c0_i32_1 = arith.constant 0 : i32
    return %c0_i32, %c0_i32_0 : i32, i32
  }
  func.func @transform_16(%arg0: i32) -> (i32, i32, i32) {
    %c0_i32 = arith.constant 0 : i32
    %c0_i32_0 = arith.constant 0 : i32
    %c0_i32_1 = arith.constant 0 : i32
    return %arg0, %c0_i32, %c0_i32_0 : i32, i32, i32
  }
  func.func @transform_17(%arg0: i32) -> (i32, i32, i32) {
    %c0_i32 = arith.constant 0 : i32
    %c0_i32_0 = arith.constant 0 : i32
    %c0_i32_1 = arith.constant 0 : i32
    return %arg0, %c0_i32, %c0_i32_0 : i32, i32, i32
  }
  func.func @transform_18(%arg0: i32) -> (i32, i32, i32) {
    %c0_i32 = arith.constant 0 : i32
    %c0_i32_0 = arith.constant 0 : i32
    %c0_i32_1 = arith.constant 0 : i32
    return %arg0, %c0_i32, %c0_i32_0 : i32, i32, i32
  }
}

</mosaic_0001>

<bundles_post_ra>
// kernel: tpu_custom_call.1
= control target key start
LH: loop header
LB: loop body
LE: loop exit
PB: predicated region body
PF: predicated region fallthrough
CT: control target
= control target key end

     0   :  { %s7438_s0 = inlined_call_operand.vmem [shape: s32[4,8,1], index: 0, kind: input, shape index: {}]   ;;  %s7439_s1 = inlined_call_operand.vmem [shape: s32[4,1,8], index: 1, kind: input, shape index: {}]   ;;  %s7440_s2 = inlined_call_operand.vmem [shape: s32[4,8,1], index: 2, kind: input, shape index: {}]   ;;  %s7441_s3 = inlined_call_operand.vmem [shape: f32[50,32], index: 3, kind: input, shape index: {}]   ;;  %s7442_s4 = inlined_call_operand.vmem [shape: f32[256,32], index: 4, kind: input, shape index: {}]   ;;  %s7443_s5 = inlined_call_operand.vmem [shape: f32[4,32], index: 5, kind: input, shape index: {}]   ;;  %s7444_s6 = inlined_call_operand.vmem [shape: f32[2,9,32], index: 6, kind: input, shape index: {}]   ;;  %s7445_s7 = inlined_call_operand.vmem [shape: bf16[2,32,32], index: 7, kind: input, shape index: {}]   ;;  %s7446_s8 = inlined_call_operand.vmem [shape: bf16[2,32,32], index: 8, kind: input, shape index: {}]   ;;  %s7447_s9 = inlined_call_operand.vmem [shape: bf16[2,32,32], index: 9, kind: input, shape index: {}]   ;;  %s7448_s10 = inlined_call_operand.vmem [shape: bf16[2,32,32], index: 10, kind: input, shape index: {}]   ;;  %s7449_s11 = inlined_call_operand.vmem [shape: bf16[2,32,64], index: 11, kind: input, shape index: {}]   ;;  %s7450_s12 = inlined_call_operand.vmem [shape: f32[2,1,64], index: 12, kind: input, shape index: {}]   ;;  %s7451_s13 = inlined_call_operand.vmem [shape: bf16[2,64,32], index: 13, kind: input, shape index: {}]   ;;  %s7452_s14 = inlined_call_operand.vmem [shape: bf16[32,9], index: 14, kind: input, shape index: {}]   ;;  %s7453_s15 = inlined_call_operand.vmem [shape: f32[1,9], index: 15, kind: input, shape index: {}]   ;;  %s7454_s16 = inlined_call_operand.hbm [shape: f32[4,8,32], index: 16, kind: output, shape index: {0}]   ;;  %s7455_s17 = inlined_call_operand.hbm [shape: f32[2,1,2], index: 17, kind: output, shape index: {1}]   ;;  %s7456_s18 = inlined_call_operand.hbm [shape: s32[4,1,8], index: 18, kind: output, shape index: {2}]  }
   0x1   :  { %7500 = sst [smem:[#allocation17_spill]] %s7438_s0 }
   0x2   :  { %7501 = sst [smem:[#allocation18_spill]] %s7439_s1 }
   0x3   :  { %7502 = sst [smem:[#allocation19_spill]] %s7440_s2 }
   0x4   :  { %7503 = sst [smem:[#allocation20_spill]] %s7441_s3 }
   0x5   :  { %7504 = sst [smem:[#allocation21_spill]] %s7442_s4 }
   0x6   :  { %7505 = sst [smem:[#allocation22_spill]] %s7443_s5 }
   0x7   :  { %7506 = sst [smem:[#allocation23_spill]] %s7444_s6 }
   0x8   :  { %7507 = sst [smem:[#allocation24_spill]] %s7445_s7 }
   0x9   :  { %7508 = sst [smem:[#allocation25_spill]] %s7446_s8 }
   0xa   :  { %7509 = sst [smem:[#allocation26_spill]] %s7456_s18 }
   0xb   :  { %24 = vsyncpa [#allocation3], 0 }
   0xc   :  { %26 = vsyncpa [#allocation3 + $0x1], 0 }
   0xd   :  { %27 = vsyncpa [#allocation5], 0 }
   0xe   :  { %29 = vsyncpa [#allocation5 + $0x1], 0  ;;  %s5280_s27 = smov 0   ;;  %s5282_s28 = smov 0  }
   0xf   :  { %s5284_s29 = smov 0   ;;  %s5286_s30 = smov 0  }
  0x10 LB: > { %7510 = sst [smem:[#allocation9_spill]] %s5148_s27  ;;  %s5301_s0 = sadd.s32 4294967295, %s5160_s30   ;;  %s5160_s30 = sphi %s5286_s30, %s7631_s30   ;;  %s5156_s29 = sphi %s5284_s29, %s7633_s29   ;;  %s5152_s28 = sphi %s5282_s28, %s7635_s28   ;;  %s5148_s27 = sphi %s5280_s27, %s7634_s27  }
  0x11   : > { %7511 = sst [smem:[#allocation10_spill]] %s5156_s29  ;;  %s7457_s19 = sadd.s32 4294967294, %s5160_s30  }
  0x12   : > { %7512 = sst [smem:[#allocation11_spill]] %s5160_s30  ;;  %s5305_s1 = sadd.s32 1, %s5160_s30  }
  0x13   : > { %7513 = sst [smem:[#allocation12_spill]] %s5305_s1  ;;  %s393_s20 = sadd.s32 1, %s5156_s29 }
  0x14   : > { %s390_s21 = ssub.s32 %s5160_s30, %s5305_s1  ;;  %p403_p0 = scmp.ne.s32.totalorder %s5156_s29, %s5152_s28 }
  0x15   : > { %p391_p1 = scmp.eq.s32.totalorder %s390_s21, 0  ;;  %p404_p2 = scmp.eq.s32.totalorder %s5301_s0, 1 }
  0x16   : > { %p409_p3 = scmp.ne.s32.totalorder %s5152_s28, %s5148_s27  ;;  %p410_p4 = scmp.eq.s32.totalorder %s7457_s19, 1 }
  0x17   : > { %s5318_s22 = scalar_select %p391_p1, %s5156_s29, %s393_s20  }
  0x18   : > { %p5320_p5 = por %p404_p2, %p403_p0  ;;  %p5324_p6 = por %p410_p4, %p409_p3 }
  0x19   : > { %7514 = sst [smem:[#allocation13_spill]] %s5318_s22  ;;  %p4492_p7 = scmp.ge.s32.totalorder %s5160_s30, 1 }
  0x1a   : > { %s7516_s23 = scalar_select %p5324_p6, 1, 0 }
  0x1b   : > { %p545_p8 = scmp.lt.s32.totalorder %s5160_s30, 3 }
  0x1c   : > { %7517 = sst [smem:[#allocation14_spill]] %s7516_s23 }
  0x1d   : > { %p546_p9 = pnand %p4492_p7, %p545_p8 }
  0x1f   : > { %549 = sbr.rel (%p546_p9) target bundleno = 5738 (0x166a), region = 84 }
  0x24   : > { %s5331_s24 = sshll.u32 %s5301_s0, 1  ;;  %s7518_s3 = sld [smem:[#allocation20_spill]]  ;;  %v5162_v1 = vmov 0   ;;  %vm667_vm0 = vcmask 1041408   ;;  %v639_v10 = vlaneseq  ;;  %vm660_vm1 = vcmask 408576  }
  0x25   : > { %4790 = vset.pattern.permute.xlu0 %v5162_v1  ;;  %p618_p10 = scmp.lt.s32.totalorder %s5331_s24, 3  ;;  %4841 = vset.pattern.permute.xlu2 %v5162_v1  ;;  %s7519_s21 = sld [smem:[#allocation17_spill]]  ;;  %v7467_v13 = vmov 0.0   ;;  %vm698_vm4 = vcmask 261120   ;;  %v5164_v24 = vmov 32.0   ;;  %v5165_v41 = vmov 31.0  }
  0x26   : > { %v5365_v11 = vand.u32 127, %v639_v10  ;;  %s7521_s4 = sld [smem:[#allocation21_spill]]  ;;  %4847 = vrcp.f32 %v5164_v24  ;;  %s7480_s1 = smov 88  }
  0x27   : > { %s5341_s19 = scalar_select %p618_p10, %s5331_s24, 3  ;;  %4849 = vrcp.f32 %v5165_v41 }
  0x28   : > { %7520 = vst [vmem:[#allocation15_spill] sm:$0xff] %v5365_v11  ;;  %s7522_s5 = sld [smem:[#allocation22_spill]]  ;;  %s7494_s26 = smov 96  }
  0x29   : > { %s7466_s25 = sshll.u32 %s5341_s19, 3  ;;  %s7523_s7 = sld [smem:[#allocation24_spill]] }
  0x2a   : > { %v659_v0 = vld [vmem:[%s7518_s3 + $0x30] sm:$0x3]  ;;  %v658_v2 = vld [vmem:[%s7518_s3 + $0x28] sm:$0xff]  ;;  %v657_v3 = vld [vmem:[%s7518_s3 + $0x20] sm:$0xff]  ;;  %s7524_s8 = sld [smem:[#allocation25_spill]]  ;;  %s7492_s18 = smov 112  }
  0x2b   : > { %4502 = vmatpush.msk.msra.mxu0 %vm667_vm0, %v659_v0  ;;  %v656_v4 = vld [vmem:[%s7518_s3 + $0x18] sm:$0xff]  ;;  %s621_s27 = scalar_lea.vmem %s7519_s21, %s7466_s25  ;;  %v655_v6 = vld [vmem:[%s7518_s3 + $0x10] sm:$0xff]  ;;  %v654_v7 = vld [vmem:[%s7518_s3 + $0x8] sm:$0xff]  ;;  %s7525_s6 = sld [smem:[#allocation23_spill]] }
  0x2c   : > { %v637_v5 = vld [vmem:[%s621_s27] sm:$0xff]  ;;  %v638_v8 = vld [vmem:[%s621_s27 + $0x8] sm:$0xff]  ;;  %v4848_v25 = vpop.eup %4847  ;;  %s7488_s27 = smov 120   ;;  %s5170_s30 = smov 104  }
  0x2d   : > { %681 = vmatpush.msra.mxu0 %v658_v2  ;;  %642 = vperm.xlu0 %4790, %v637_v5   ;;  %v653_v9 = vld [vmem:[%s7518_s3] sm:$0xff]  ;;  %v706_v26 = vmul.f32 32.0, %v4848_v25  ;;  %vm710_vm5 = vweird.f32 %v4848_v25  ;;  %v4850_v42 = vpop.eup %4849  ;;  %s7482_s23 = smov 80   ;;  %s7490_s20 = smov 72  }
  0x2e   : > { %v694_v17 = vld [vmem:[%s7521_s4] sm:$0xff]  ;;  %v725_v43 = vmul.f32 31.0, %v4850_v42  ;;  %vm729_vm6 = vweird.f32 %v4850_v42  ;;  %s7526_s22 = sld [smem:[#allocation18_spill]]  ;;  %s7478_s21 = smov 8  }
  0x2f   : > { %682 = vmatpush.msra.mxu0 %v657_v3  ;;  %v707_v27 = vsub.f32 1.0, %v706_v26  ;;  %s7473_s29 = smov 24  }
  0x30   : > { %v726_v44 = vsub.f32 1.0, %v725_v43 }
  0x31   : > { %683 = vmatpush.msra.mxu0 %v656_v4  ;;  %v708_v28 = vmul.f32 %v4848_v25, %v707_v27 }
  0x32   : > { %v727_v45 = vmul.f32 %v4850_v42, %v726_v44 }
  0x33   : > { %684 = vmatpush.msra.mxu0 %v655_v6  ;;  %v709_v29 = vadd.f32 %v4848_v25, %v708_v28 }
  0x34   : > { %v728_v46 = vadd.f32 %v4850_v42, %v727_v45  ;;  %s5578_s25 = scalar_lea.vmem %s7526_s22, %s5341_s19  ;;  %s7476_s22 = smov 40  }
  0x35   : > { %685 = vmatpush.msra.mxu0 %v654_v7  ;;  %645 = vperm.xlu0 %4790, %v638_v8   ;;  %v5376_v30 = vsel %vm710_vm5, %v4848_v25, %v709_v29 }
  0x36   : > { %v5390_v47 = vsel %vm729_vm6, %v4850_v42, %v728_v46 }
  0x37   : > { %686 = vmatpush.msra.mxu0 %v653_v9 }
  0x9f   : > { %v643_v12 = vpop.permute.xlu0 %642 }
  0xa0   : > { %vm647_vm2 = vcmp.eq.s32.totalorder %v643_v12, %v5365_v11 }
  0xa1   : > { %v4500_v14 = vsel %vm647_vm2, 1.0, %v7467_v13 }
  0xa2   : > { %4503 = vmatmul.msk.f32.vlgmr.msra.gmra.mxu0 %vm660_vm1, %v4500_v14  ;;  %v697_v14 = vld [vmem:[%s7522_s5] sm:$0xf] }
  0xa3   : > { %v792_v26 = vperm.slane %v697_v14, 1 }
  0xa7   : > { %v646_v15 = vpop.permute.xlu0 %645 }
  0xa8   : > { %vm648_vm3 = vcmp.eq.s32.totalorder %v646_v15, %v5365_v11 }
  0xa9   : > { %v4501_v16 = vsel %vm648_vm3, 1.0, %v7467_v13 }
  0xaa   : > { %4504 = vmatmul.msk.f32.gmra.mxu0 %vm660_vm1, %v4501_v16 }
 0x11f   : > { %v688_v18 = vpop.f32.mrf.mxu0 }
 0x120   : > { %v695_v19 = vadd.f32 %v694_v17, %v688_v18 }
 0x122   : > { %v699_v20 = vsel %vm698_vm4, %v695_v19, 0.0 }
 0x123   : > { %700 = vadd.xlane.f32.xlu1 %v699_v20 }
 0x127   : > { %v691_v21 = vpop.f32.mrf.mxu0 }
 0x128   : > { %v696_v22 = vadd.f32 %v694_v17, %v691_v21  ;;  %v757_v17 = vperm.slane %v697_v14, 0 }
 0x12a   : > { %v702_v23 = vsel %vm698_vm4, %v696_v22, 0.0 }
 0x12b   : > { %703 = vadd.xlane.f32.xlu1 %v702_v23 }
 0x196   : > { %v701_v31 = vpop.xlane.xlu1 %700 }
 0x197   : > { %v712_v32 = vmul.f32 %v5376_v30, %v701_v31 }
 0x199   : > { %v5379_v33 = vsub.f32 %v695_v19, %v712_v32 }
 0x19b   : > { %v716_v34 = vmul.f32 %v5379_v33, %v5379_v33  ;;  %v758_v23 = vmul.f32 %v757_v17, %v5379_v33 }
 0x19d   : > { %v718_v35 = vsel %vm698_vm4, %v716_v34, 0.0 }
 0x19e   : > { %719 = vadd.xlane.f32.xlu2 %v718_v35  ;;  %v704_v36 = vpop.xlane.xlu1 %703 }
 0x19f   : > { %v713_v37 = vmul.f32 %v5376_v30, %v704_v36 }
 0x1a1   : > { %v5385_v38 = vsub.f32 %v696_v22, %v713_v37 }
 0x1a3   : > { %v717_v39 = vmul.f32 %v5385_v38, %v5385_v38 }
 0x1a5   : > { %v721_v40 = vsel %vm698_vm4, %v717_v39, 0.0 }
 0x1a6   : > { %722 = vadd.xlane.f32.xlu2 %v721_v40  ;;  %v759_v40 = vmul.f32 %v757_v17, %v5385_v38 }
 0x211   : > { %v720_v48 = vpop.xlane.xlu2 %719 }
 0x212   : > { %v731_v49 = vmul.f32 %v5390_v47, %v720_v48 }
 0x214   : > { %4851 = vrsqrt.f32 %v731_v49  ;;  %vm740_vm7 = vcmp.eq.f32.partialorder %v731_v49, inf  ;;  %v743_v62 = vand.u32 2147483648, %v731_v49  ;;  %vm742_vm8 = vcmp.eq.f32.partialorder %v731_v49, 0.0 }
 0x219   : > { %v723_v50 = vpop.xlane.xlu2 %722 }
 0x21a   : > { %v4852_v51 = vpop.eup %4851  ;;  %v732_v52 = vmul.f32 %v5390_v47, %v723_v50 }
 0x21b   : > { %v734_v53 = vmul.f32 %v4852_v51, %v731_v49 }
 0x21c   : > { %4853 = vrsqrt.f32 %v732_v52  ;;  %vm752_vm9 = vcmp.eq.f32.partialorder %v732_v52, inf  ;;  %v755_v6 = vand.u32 2147483648, %v732_v52  ;;  %vm754_vm10 = vcmp.eq.f32.partialorder %v732_v52, 0.0 }
 0x21d   : > { %v735_v54 = vmul.f32 %v4852_v51, %v734_v53 }
 0x21f   : > { %v736_v55 = vmul.f32 0.5, %v735_v54 }
 0x221   : > { %v737_v56 = vsub.f32 1.5, %v736_v55 }
 0x222   : > { %v4854_v57 = vpop.eup %4853 }
 0x223   : > { %v738_v58 = vmul.f32 %v4852_v51, %v737_v56  ;;  %v746_v59 = vmul.f32 %v4854_v57, %v732_v52  ;;  %v4688_v56 = vld [vmem:[%s7523_s7 + $0x8] sm:$0xff] }
 0x224   : > { %921 = vmatpush.bf16.msra.mxu1 %v4688_v56 }
 0x225   : > { %v739_v60 = vmul.f32 %v738_v58, %v731_v49  ;;  %v747_v61 = vmul.f32 %v4854_v57, %v746_v59  ;;  %v4692_v58 = vld [vmem:[%s7447_s9 + $0x8] sm:$0xff] }
 0x226   : > { %983 = vmatpush.bf16.msra.mxu3 %v4692_v58 }
 0x227   : > { %v748_v63 = vmul.f32 0.5, %v747_v61  ;;  %v741_v0 = vsel %vm740_vm7, %v731_v49, %v739_v60  ;;  %v4687_v60 = vld [vmem:[%s7523_s7] sm:$0xff] }
 0x228   : > { %v744_v1 = vsel %vm742_vm8, %v743_v62, %v741_v0  ;;  %v4689_v61 = vld [vmem:[%s7524_s8] sm:$0xff]  ;;  %922 = vmatpush.bf16.msra.mxu1 %v4687_v60 }
 0x229   : > { %v749_v2 = vsub.f32 1.5, %v748_v63  ;;  %v760_v3 = vadd.f32 1e-06, %v744_v1  ;;  %v4691_v63 = vld [vmem:[%s7447_s9] sm:$0xff] }
 0x22a   : > { %984 = vmatpush.bf16.msra.mxu3 %v4691_v63 }
 0x22b   : > { %v750_v4 = vmul.f32 %v4854_v57, %v749_v2  ;;  %4855 = vrcp.f32 %v760_v3  ;;  %v773_v18 = vand.u32 2147483648, %v760_v3  ;;  %v771_v20 = vand.u32 2147483647, %v760_v3  ;;  %v4690_v57 = vld [vmem:[%s7524_s8 + $0x8] sm:$0xff] }
 0x22c   : > { %vm767_vm12 = vweird.f32 %v760_v3  ;;  %952 = vmatpush.bf16.msra.mxu2 %v4690_v57 }
 0x22d   : > { %v751_v5 = vmul.f32 %v750_v4, %v732_v52  ;;  %v774_v24 = vor.u32 1.1754944e-38, %v773_v18  ;;  %vm772_vm14 = vcmp.eq.f32.partialorder %v771_v20, 8.507059e+37 }
 0x22f   : > { %v753_v7 = vsel %vm752_vm9, %v732_v52, %v751_v5 }
 0x230   : > { %v756_v8 = vsel %vm754_vm10, %v755_v6, %v753_v7  ;;  %953 = vmatpush.bf16.msra.mxu2 %v4689_v61 }
 0x231   : > { %v4856_v9 = vpop.eup %4855  ;;  %v761_v12 = vadd.f32 1e-06, %v756_v8 }
 0x232   : > { %v763_v15 = vmul.f32 %v4856_v9, %v760_v3  ;;  %vm768_vm11 = vweird.f32 %v4856_v9 }
 0x233   : > { %4857 = vrcp.f32 %v761_v12  ;;  %vm769_vm13 = vmor %vm767_vm12, %vm768_vm11  ;;  %v788_v32 = vand.u32 2147483648, %v761_v12  ;;  %v786_v36 = vand.u32 2147483647, %v761_v12  ;;  %vm782_vm0 = vweird.f32 %v761_v12 }
 0x234   : > { %v764_v16 = vsub.f32 1.0, %v763_v15 }
 0x235   : > { %v789_v33 = vor.u32 1.1754944e-38, %v788_v32  ;;  %vm787_vm2 = vcmp.eq.f32.partialorder %v786_v36, 8.507059e+37  ;;  %v5444_v36 = vld [vmem:[%s7525_s6] sm:$0xff] }
 0x236   : > { %v765_v19 = vmul.f32 %v4856_v9, %v764_v16  ;;  %v891_v57 = vperm.slane %v5444_v36, 1 }
 0x238   : > { %v766_v21 = vadd.f32 %v4856_v9, %v765_v19 }
 0x239   : > { %v4858_v22 = vpop.eup %4857 }
 0x23a   : > { %v770_v25 = vsel %vm769_vm13, %v4856_v9, %v766_v21  ;;  %v778_v27 = vmul.f32 %v4858_v22, %v761_v12  ;;  %vm783_vm15 = vweird.f32 %v4858_v22 }
 0x23b   : > { %v775_v28 = vsel %vm772_vm14, %v774_v24, %v770_v25  ;;  %vm784_vm1 = vmor %vm782_vm0, %vm783_vm15 }
 0x23c   : > { %v776_v29 = vmul.f32 %v775_v28, %v758_v23  ;;  %v779_v31 = vsub.f32 1.0, %v778_v27 }
 0x23e   : > { %v5398_v34 = vadd.f32 %v792_v26, %v776_v29  ;;  %v780_v35 = vmul.f32 %v4858_v22, %v779_v31 }
 0x240   : > { %v812_v37 = vsel %vm698_vm4, %v5398_v34, 0.0  ;;  %v781_v39 = vadd.f32 %v4858_v22, %v780_v35 }
 0x241   : > { %813 = vadd.xlane.f32.xlu0 %v812_v37 }
 0x242   : > { %v785_v41 = vsel %vm784_vm1, %v4858_v22, %v781_v39 }
 0x243   : > { %v790_v42 = vsel %vm787_vm2, %v789_v33, %v785_v41 }
 0x244   : > { %v791_v43 = vmul.f32 %v790_v42, %v759_v40  ;;  %v856_v40 = vperm.slane %v5444_v36, 0 }
 0x246   : > { %v5403_v44 = vadd.f32 %v792_v26, %v791_v43 }
 0x248   : > { %v815_v45 = vsel %vm698_vm4, %v5403_v44, 0.0 }
 0x249   : > { %816 = vadd.xlane.f32.xlu1 %v815_v45 }
 0x2b4   : > { %v814_v46 = vpop.xlane.xlu0 %813 }
 0x2b5   : > { %v818_v48 = vmul.f32 %v814_v46, %v5376_v30 }
 0x2b7   : > { %v5409_v49 = vsub.f32 %v5398_v34, %v818_v48 }
 0x2b9   : > { %v822_v50 = vmul.f32 %v5409_v49, %v5409_v49 }
 0x2bb   : > { %v824_v38 = vsel %vm698_vm4, %v822_v50, 0.0 }
 0x2bc   : > { %v817_v51 = vpop.xlane.xlu1 %816  ;;  %825 = vadd.xlane.f32.xlu2 %v824_v38  ;;  %v857_v38 = vmul.f32 %v856_v40, %v5409_v49  ;;  %v802_v49 = vshrl.u32 %v639_v10, 7 }
 0x2bd   : > { %v819_v52 = vmul.f32 %v817_v51, %v5376_v30 }
 0x2bf   : > { %v5416_v53 = vsub.f32 %v5403_v44, %v819_v52 }
 0x2c1   : > { %v823_v54 = vmul.f32 %v5416_v53, %v5416_v53  ;;  %v858_v52 = vmul.f32 %v856_v40, %v5416_v53  ;;  %v803_v53 = vmul.u32 4, %v802_v49 }
 0x2c3   : > { %v827_v55 = vsel %vm698_vm4, %v823_v54, 0.0  ;;  %v805_v63 = vadd.s32 4, %v803_v53  ;;  %vm804_vm0 = vcmp.ge.s32.totalorder %v5365_v11, %v803_v53 }
 0x2c4   : > { %828 = vadd.xlane.f32.xlu1 %v827_v55 }
 0x2c5   : > { %vm806_vm1 = vcmp.lt.s32.totalorder %v5365_v11, %v805_v63 }
 0x2c6   : > { %vm807_vm2 = vmand %vm804_vm0, %vm806_vm1 }
 0x32f   : > { %v826_v59 = vpop.xlane.xlu2 %825 }
 0x330   : > { %v830_v62 = vmul.f32 %v826_v59, %v5390_v47 }
 0x332   : > { %4859 = vrsqrt.f32 %v830_v62  ;;  %vm839_vm3 = vcmp.eq.f32.partialorder %v830_v62, inf  ;;  %v842_v15 = vand.u32 2147483648, %v830_v62  ;;  %vm841_vm5 = vcmp.eq.f32.partialorder %v830_v62, 0.0 }
 0x337   : > { %v829_v0 = vpop.xlane.xlu1 %828 }
 0x338   : > { %v4860_v1 = vpop.eup %4859  ;;  %v831_v2 = vmul.f32 %v829_v0, %v5390_v47  ;;  %v4505_v0 = vsel %vm807_vm2, 1.0, %v7467_v13 }
 0x339   : > { %v833_v3 = vmul.f32 %v4860_v1, %v830_v62 }
 0x33a   : > { %4861 = vrsqrt.f32 %v831_v2  ;;  %vm851_vm6 = vcmp.eq.f32.partialorder %v831_v2, inf  ;;  %v854_v23 = vand.u32 2147483648, %v831_v2  ;;  %vm853_vm7 = vcmp.eq.f32.partialorder %v831_v2, 0.0 }
 0x33b   : > { %v834_v4 = vmul.f32 %v4860_v1, %v833_v3  ;;  %v995_v3 = vrot.slane %v4505_v0, 4 }
 0x33d   : > { %v835_v5 = vmul.f32 0.5, %v834_v4  ;;  %v996_v4 = vrot.slane %v4505_v0, 5 }
 0x33f   : > { %v836_v6 = vsub.f32 1.5, %v835_v5  ;;  %v993_v5 = vrot.slane %v4505_v0, 2 }
 0x340   : > { %v4862_v7 = vpop.eup %4861 }
 0x341   : > { %v837_v8 = vmul.f32 %v4860_v1, %v836_v6  ;;  %v845_v9 = vmul.f32 %v4862_v7, %v831_v2  ;;  %v997_v1 = vrot.slane %v4505_v0, 6  ;;  %v933_v6 = vperm.slane %v5444_v36, 3 }
 0x343   : > { %v838_v12 = vmul.f32 %v837_v8, %v830_v62  ;;  %v846_v14 = vmul.f32 %v4862_v7, %v845_v9  ;;  %v994_v8 = vrot.slane %v4505_v0, 3  ;;  %v5459_v10 = vperm.slane %v997_v1, 0 }
 0x345   : > { %v840_v16 = vsel %vm839_vm3, %v830_v62, %v838_v12  ;;  %v847_v17 = vmul.f32 0.5, %v846_v14  ;;  %v5463_v12 = vperm.slane %v995_v3, 0  ;;  %v5465_v14 = vperm.slane %v996_v4, 0 }
 0x346   : > { %v843_v18 = vsel %vm841_vm5, %v842_v15, %v840_v16  ;;  %v992_v16 = vrot.slane %v4505_v0, 1  ;;  %vm1208_vm3 = vcmask 1047556  }
 0x347   : > { %v848_v19 = vsub.f32 1.5, %v847_v17  ;;  %v859_v20 = vadd.f32 1e-06, %v843_v18  ;;  %v5467_v17 = vperm.slane %v993_v5, 0 }
 0x349   : > { %v849_v21 = vmul.f32 %v4862_v7, %v848_v19  ;;  %4863 = vrcp.f32 %v859_v20  ;;  %v872_v37 = vand.u32 2147483648, %v859_v20  ;;  %vm866_vm9 = vweird.f32 %v859_v20 }
 0x34a   : > { %v870_v39 = vand.u32 2147483647, %v859_v20  ;;  %v964_v7 = vperm.slane %v5444_v36, 4 }
 0x34b   : > { %v850_v22 = vmul.f32 %v849_v21, %v831_v2  ;;  %v873_v43 = vor.u32 1.1754944e-38, %v872_v37  ;;  %v5471_v21 = vperm.slane %v4505_v0, 0 }
 0x34c   : > { %vm871_vm11 = vcmp.eq.f32.partialorder %v870_v39, 8.507059e+37 }
 0x34d   : > { %v852_v24 = vsel %vm851_vm6, %v831_v2, %v850_v22  ;;  %v998_v2 = vrot.slane %v4505_v0, 7  ;;  %v5473_v22 = vperm.slane %v994_v8, 0  ;;  %vm1454_vm6 = vcmask 64512  }
 0x34e   : > { %v855_v25 = vsel %vm853_vm7, %v854_v23, %v852_v24 }
 0x34f   : > { %v4864_v26 = vpop.eup %4863  ;;  %v860_v27 = vadd.f32 1e-06, %v855_v25  ;;  %v5461_v9 = vperm.slane %v998_v2, 0 }
 0x350   : > { %v862_v28 = vmul.f32 %v4864_v26, %v859_v20  ;;  %vm867_vm8 = vweird.f32 %v4864_v26 }
 0x351   : > { %4865 = vrcp.f32 %v860_v27  ;;  %vm868_vm10 = vmor %vm866_vm9, %vm867_vm8  ;;  %v887_v45 = vand.u32 2147483648, %v860_v27  ;;  %v885_v48 = vand.u32 2147483647, %v860_v27  ;;  %vm881_vm13 = vweird.f32 %v860_v27 }
 0x352   : > { %v863_v29 = vsub.f32 1.0, %v862_v28 }
 0x353   : > { %v888_v54 = vor.u32 1.1754944e-38, %v887_v45  ;;  %vm886_vm15 = vcmp.eq.f32.partialorder %v885_v48, 8.507059e+37 }
 0x354   : > { %v864_v31 = vmul.f32 %v4864_v26, %v863_v29  ;;  %v5483_v29 = vperm.slane %v992_v16, 0 }
 0x356   : > { %v865_v32 = vadd.f32 %v4864_v26, %v864_v31 }
 0x357   : > { %v4866_v35 = vpop.eup %4865 }
 0x358   : > { %v877_v33 = vmul.f32 %v4866_v35, %v860_v27  ;;  %v869_v41 = vsel %vm868_vm10, %v4864_v26, %v865_v32  ;;  %vm882_vm12 = vweird.f32 %v4866_v35 }
 0x359   : > { %v874_v50 = vsel %vm871_vm11, %v873_v43, %v869_v41  ;;  %vm883_vm14 = vmor %vm881_vm13, %vm882_vm12 }
 0x35a   : > { %v878_v42 = vsub.f32 1.0, %v877_v33  ;;  %v875_v55 = vmul.f32 %v874_v50, %v857_v38 }
 0x35c   : > { %v879_v46 = vmul.f32 %v4866_v35, %v878_v42  ;;  %v892_v60 = vadd.f32 %v891_v57, %v875_v55 }
 0x35e   : > { %v880_v51 = vadd.f32 %v4866_v35, %v879_v46 }
 0x360   : > { %v884_v56 = vsel %vm883_vm14, %v4866_v35, %v880_v51 }
 0x361   : > { %v889_v58 = vsel %vm886_vm15, %v888_v54, %v884_v56 }
 0x362   : > { %v890_v59 = vmul.f32 %v889_v58, %v858_v52 }
 0x364   : > { %v893_v61 = vadd.f32 %v891_v57, %v890_v59 }
 0x366   : > { %v894_v62 = vpack.c.bf16 %v893_v61, %v892_v60 }
 0x368   : > { %4514 = vmatmul.msk.bf16.vlgmr.msra.gmra.mxu1 %vm698_vm4, %v894_v62  ;;  %4523 = vmatmul.msk.bf16.vlgmr.msra.gmra.mxu2 %vm698_vm4, %v894_v62 }
 0x369   : > { %4532 = vmatmul.msk.bf16.vlgmr.msra.gmra.mxu3 %vm698_vm4, %v894_v62 }
 0x3eb   : > { %v955_v15 = vpop.f32.mrf.mxu2 }
 0x3ec   : > { %v5469_v18 = vadd.f32 %v955_v15, %v933_v6  ;;  %v986_v19 = vpop.f32.mrf.mxu3 }
 0x3ed   : > { %v987_v20 = vadd.f32 %v986_v19, %v964_v7 }
 0x3ee   : > { %v1021_v23 = vmul.f32 %v5459_v10, %v5469_v18  ;;  %v1022_v24 = vmul.f32 %v5461_v9, %v5469_v18  ;;  %v1019_v45 = vmul.f32 %v5463_v12, %v5469_v18  ;;  %v1020_v61 = vmul.f32 %v5465_v14, %v5469_v18 }
 0x3ef   : > { %v1037_v25 = vmul.f32 %v5459_v10, %v987_v20  ;;  %v1038_v26 = vmul.f32 %v5461_v9, %v987_v20  ;;  %v1035_v27 = vmul.f32 %v5463_v12, %v987_v20  ;;  %v1036_v28 = vmul.f32 %v5465_v14, %v987_v20 }
 0x3f0   : > { %v1057_v31 = vpack.c.bf16 %v1021_v23, %v1021_v23  ;;  %v1058_v32 = vpack.c.bf16 %v1022_v24, %v1022_v24  ;;  %v1033_v35 = vmul.f32 %v5467_v17, %v987_v20  ;;  %v1034_v43 = vmul.f32 %v5473_v22, %v987_v20 }
 0x3f1   : > { %v2146_v37 = vpack.c.bf16 %v1037_v25, %v1037_v25  ;;  %v2147_v39 = vpack.c.bf16 %v1038_v26, %v1038_v26  ;;  %v2144_v33 = vpack.c.bf16 %v1035_v27, %v1035_v27  ;;  %v2145_v40 = vpack.c.bf16 %v1036_v28, %v1036_v28 }
 0x3f2   : > { %v1081_v41 = vunpack.c.l.b16 %v1057_v31  ;;  %v1082_v42 = vunpack.c.l.b16 %v1058_v32  ;;  %v2142_v56 = vpack.c.bf16 %v1033_v35, %v1033_v35  ;;  %v2143_v57 = vpack.c.bf16 %v1034_v43, %v1034_v43 }
 0x3f3   : > { %v957_v46 = vpop.f32.mrf.mxu2  ;;  %v2170_v48 = vunpack.c.l.b16 %v2146_v37  ;;  %v2171_v50 = vunpack.c.l.b16 %v2147_v39  ;;  %v2168_v38 = vunpack.c.l.b16 %v2144_v33  ;;  %v2169_v51 = vunpack.c.l.b16 %v2145_v40 }
 0x3f4   : > { %v5489_v52 = vadd.f32 %v957_v46, %v933_v6  ;;  %v988_v54 = vpop.f32.mrf.mxu3  ;;  %v1086_v55 = vpack.c.b16 %v1082_v42, %v1081_v41  ;;  %v2166_v49 = vunpack.c.l.b16 %v2142_v56  ;;  %v2167_v53 = vunpack.c.l.b16 %v2143_v57 }
 0x3f5   : > { %v5491_v58 = vadd.f32 %v988_v54, %v964_v7  ;;  %v2175_v59 = vpack.c.b16 %v2171_v50, %v2170_v48  ;;  %v2174_v60 = vpack.c.b16 %v2169_v51, %v2168_v38  ;;  %v1055_v63 = vpack.c.bf16 %v1019_v45, %v1019_v45 }
 0x3f6   : > { %v1100_v62 = vsel %vm698_vm4, %v1086_v55, 0  ;;  %v1056_v2 = vpack.c.bf16 %v1020_v61, %v1020_v61  ;;  %v2173_v3 = vpack.c.b16 %v2167_v53, %v2166_v49  ;;  %v1029_v5 = vmul.f32 %v5459_v10, %v5489_v52 }
 0x3f7   : > { %2188 = vmatpush.bf16.msrb.mxu3 %v2175_v59  ;;  %1106 = vmatpush.bf16.xpose.msrb.mxu1 %v1100_v62  ;;  %v1045_v0 = vmul.f32 %v5459_v10, %v5491_v58  ;;  %v1046_v1 = vmul.f32 %v5461_v9, %v5491_v58  ;;  %v1079_v4 = vunpack.c.l.b16 %v1055_v63  ;;  %v1030_v6 = vmul.f32 %v5461_v9, %v5489_v52 }
 0x3f8   : > { %v1080_v15 = vunpack.c.l.b16 %v1056_v2  ;;  %v1031_v16 = vmul.f32 %v5471_v21, %v987_v20  ;;  %v1065_v19 = vpack.c.bf16 %v1029_v5, %v1029_v5  ;;  %v1032_v24 = vmul.f32 %v5483_v29, %v987_v20 }
 0x3f9   : > { %v2154_v7 = vpack.c.bf16 %v1045_v0, %v1045_v0  ;;  %v2155_v8 = vpack.c.bf16 %v1046_v1, %v1046_v1  ;;  %v1066_v23 = vpack.c.bf16 %v1030_v6, %v1030_v6  ;;  %v1043_v25 = vmul.f32 %v5463_v12, %v5491_v58 }
 0x3fa   : > { %v1085_v28 = vpack.c.b16 %v1080_v15, %v1079_v4  ;;  %v2140_v31 = vpack.c.bf16 %v1031_v16, %v1031_v16  ;;  %v1129_v32 = vunpack.c.l.b16 %v1065_v19  ;;  %v2141_v37 = vpack.c.bf16 %v1032_v24, %v1032_v24 }
 0x3fb   : > { %2189 = vmatpush.bf16.msrb.mxu3 %v2174_v60  ;;  %v2211_v26 = vunpack.c.l.b16 %v2154_v7  ;;  %v2212_v27 = vunpack.c.l.b16 %v2155_v8  ;;  %v1130_v35 = vunpack.c.l.b16 %v1066_v23  ;;  %v1044_v39 = vmul.f32 %v5465_v14, %v5491_v58 }
 0x3fc   : > { %v1097_v40 = vsel %vm698_vm4, %v1085_v28, 0  ;;  %v2164_v41 = vunpack.c.l.b16 %v2140_v31  ;;  %v2152_v42 = vpack.c.bf16 %v1043_v25, %v1043_v25  ;;  %v2165_v43 = vunpack.c.l.b16 %v2141_v37 }
 0x3fd   : > { %v2216_v33 = vpack.c.b16 %v2212_v27, %v2211_v26  ;;  %v1134_v20 = vpack.c.b16 %v1130_v35, %v1129_v32  ;;  %v2153_v45 = vpack.c.bf16 %v1044_v39, %v1044_v39  ;;  %v1041_v46 = vmul.f32 %v5467_v17, %v5491_v58 }
 0x3fe   : > { %v2209_v48 = vunpack.c.l.b16 %v2152_v42  ;;  %v1042_v50 = vmul.f32 %v5473_v22, %v5491_v58  ;;  %v1017_v38 = vmul.f32 %v5467_v17, %v5469_v18  ;;  %v1018_v51 = vmul.f32 %v5473_v22, %v5469_v18  ;;  %v924_v42 = vpop.f32.mrf.mxu1 }
 0x3ff   : > { %2190 = vmatpush.bf16.msrb.mxu3 %v2173_v3  ;;  %2228 = vmatpush.bf16.msrb.mxu0 %v2216_v33  ;;  %v1148_v54 = vsel %vm698_vm4, %v1134_v20, 0  ;;  %v2172_v55 = vpack.c.b16 %v2165_v43, %v2164_v41  ;;  %v2210_v56 = vunpack.c.l.b16 %v2153_v45  ;;  %v2150_v57 = vpack.c.bf16 %v1041_v46, %v1041_v46 }
 0x400   : > { %1107 = vmatpush.bf16.xpose.msrb.mxu1 %v1097_v40  ;;  %1154 = vmatpush.bf16.xpose.msrb.mxu2 %v1148_v54  ;;  %v2151_v59 = vpack.c.bf16 %v1042_v50, %v1042_v50  ;;  %v1053_v60 = vpack.c.bf16 %v1017_v38, %v1017_v38  ;;  %v1054_v61 = vpack.c.bf16 %v1018_v51, %v1018_v51 }
 0x401   : > { %v1027_v62 = vmul.f32 %v5463_v12, %v5489_v52  ;;  %v2215_v49 = vpack.c.b16 %v2210_v56, %v2209_v48  ;;  %v2207_v53 = vunpack.c.l.b16 %v2150_v57  ;;  %v1028_v63 = vmul.f32 %v5465_v14, %v5489_v52 }
 0x402   : > { %v1039_v0 = vmul.f32 %v5471_v21, %v5491_v58  ;;  %v2208_v1 = vunpack.c.l.b16 %v2151_v59  ;;  %v1077_v2 = vunpack.c.l.b16 %v1053_v60  ;;  %v1078_v3 = vunpack.c.l.b16 %v1054_v61 }
 0x403   : > { %2191 = vmatpush.bf16.msrb.mxu3 %v2172_v55  ;;  %v1063_v4 = vpack.c.bf16 %v1027_v62, %v1027_v62  ;;  %2229 = vmatpush.bf16.msrb.mxu0 %v2215_v49  ;;  %v1064_v5 = vpack.c.bf16 %v1028_v63, %v1028_v63  ;;  %v1040_v6 = vmul.f32 %v5483_v29, %v5491_v58 }
 0x404   : > { %v2148_v7 = vpack.c.bf16 %v1039_v0, %v1039_v0  ;;  %v1015_v8 = vmul.f32 %v5471_v21, %v5469_v18  ;;  %v2214_v15 = vpack.c.b16 %v2208_v1, %v2207_v53  ;;  %v1084_v16 = vpack.c.b16 %v1078_v3, %v1077_v2 }
 0x405   : > { %v1127_v19 = vunpack.c.l.b16 %v1063_v4  ;;  %v1016_v23 = vmul.f32 %v5483_v29, %v5469_v18  ;;  %v1128_v24 = vunpack.c.l.b16 %v1064_v5  ;;  %v2149_v25 = vpack.c.bf16 %v1040_v6, %v1040_v6 }
 0x406   : > { %v2205_v26 = vunpack.c.l.b16 %v2148_v7  ;;  %v1051_v27 = vpack.c.bf16 %v1015_v8, %v1015_v8  ;;  %v1094_v28 = vsel %vm698_vm4, %v1084_v16, 0  ;;  %v1025_v58 = vmul.f32 %v5467_v17, %v5489_v52 }
 0x407   : > { %v1052_v31 = vpack.c.bf16 %v1016_v23, %v1016_v23  ;;  %v1026_v32 = vmul.f32 %v5473_v22, %v5489_v52  ;;  %2230 = vmatpush.bf16.msrb.mxu0 %v2214_v15  ;;  %v1133_v35 = vpack.c.b16 %v1128_v24, %v1127_v19  ;;  %v2206_v37 = vunpack.c.l.b16 %v2149_v25 }
 0x408   : > { %1108 = vmatpush.bf16.xpose.msrb.mxu1 %v1094_v28  ;;  %v1075_v39 = vunpack.c.l.b16 %v1051_v27  ;;  %v899_v18 = vperm.slane %v5444_v36, 2  ;;  %v1061_v40 = vpack.c.bf16 %v1025_v58, %v1025_v58  ;;  %v1023_v45 = vmul.f32 %v5471_v21, %v5489_v52 }
 0x409   : > { %v1076_v33 = vunpack.c.l.b16 %v1052_v31  ;;  %v1062_v41 = vpack.c.bf16 %v1026_v32, %v1026_v32  ;;  %v1145_v20 = vsel %vm698_vm4, %v1133_v35, 0  ;;  %v2213_v43 = vpack.c.b16 %v2206_v37, %v2205_v26 }
 0x40a   : > { %v1024_v46 = vmul.f32 %v5483_v29, %v5489_v52  ;;  %1155 = vmatpush.bf16.xpose.msrb.mxu2 %v1145_v20  ;;  %v1125_v50 = vunpack.c.l.b16 %v1061_v40  ;;  %v925_v51 = vadd.f32 %v924_v42, %v899_v18  ;;  %v1059_v54 = vpack.c.bf16 %v1023_v45, %v1023_v45  ;;  %v926_v52 = vpop.f32.mrf.mxu1  ;;  %v795_v42 = vld [vmem:[%s5578_s25] sm:$0x1] }
 0x40b   : > { %v1083_v48 = vpack.c.b16 %v1076_v33, %v1075_v39  ;;  %v1126_v38 = vunpack.c.l.b16 %v1062_v41  ;;  %2231 = vmatpush.bf16.msrb.mxu0 %v2213_v43  ;;  %v927_v53 = vadd.f32 %v926_v52, %v899_v18  ;;  %v5173_v15 = vmov 1983009808  }
 0x40c   : > { %v1060_v55 = vpack.c.bf16 %v1024_v46, %v1024_v46  ;;  %v1047_v57 = vmul.f32 0.5, %v925_v51  ;;  %v1123_v60 = vunpack.c.l.b16 %v1059_v54  ;;  %v1213_v16 = vunpack.c.l.s4 %v5173_v15 }
 0x40d   : > { %v1132_v36 = vpack.c.b16 %v1126_v38, %v1125_v50  ;;  %v1091_v56 = vsel %vm698_vm4, %v1083_v48, 0  ;;  %v1048_v0 = vmul.f32 0.5, %v927_v53  ;;  %v5174_v45 = vmov 1934713408  }
 0x40e   : > { %v1124_v61 = vunpack.c.l.b16 %v1060_v55  ;;  %v1049_v62 = vpack.c.bf16 %v1047_v57, %v1047_v57  ;;  %v5571_v26 = vunpack.c.0.s8 %v1213_v16  ;;  %v1261_v46 = vunpack.c.l.s4 %v5174_v45 }
 0x40f   : > { %v1142_v59 = vsel %vm698_vm4, %v1132_v36, 0  ;;  %v1050_v1 = vpack.c.bf16 %v1048_v0, %v1048_v0  ;;  %vm797_vm5 = vcmp.eq.s32.totalorder %v795_v42, 1 }
 0x410   : > { %1109 = vmatpush.bf16.xpose.msrb.mxu1 %v1091_v56  ;;  %v1131_v49 = vpack.c.b16 %v1124_v61, %v1123_v60  ;;  %v5593_v60 = vunpack.c.0.s8 %v1261_v46 }
 0x412   : > { %1156 = vmatpush.bf16.xpose.msrb.mxu2 %v1142_v59  ;;  %v1139_v63 = vsel %vm698_vm4, %v1131_v49, 0 }
 0x417   : > { %4533 = vmatmul.msk.bf16.vlgmr.msrb.gmra.mxu1 %vm698_vm4, %v1049_v62 }
 0x41a   : > { %1157 = vmatpush.bf16.xpose.msrb.mxu2 %v1139_v63 }
 0x421   : > { %4534 = vmatmul.msk.bf16.vlgmr.msrb.gmra.mxu2 %vm698_vm4, %v1050_v1 }
 0x494   : > { %v1111_v2 = vpop.f32.mrf.mxu1 }
 0x495   : > { %1189 = vrot.lane.b32.xlu0 %v1111_v2, %s7480_s1  ;;  %1183 = vrot.lane.b32.xlu1 %v1111_v2, %s7494_s26  ;;  %v1210_v58 = vrot.slane %v1111_v2, 4 }
 0x496   : > { %1171 = vrot.lane.b32.xlu2 %v1111_v2, %s7492_s18 }
 0x49c   : > { %v1113_v3 = vpop.f32.mrf.mxu1 }
 0x49d   : > { %1165 = vrot.lane.b32.xlu1 %v1111_v2, %s7488_s27 }
 0x49e   : > { %1177 = vrot.lane.b32.xlu2 %v1111_v2, %s5170_s30 }
 0x4a4   : > { %v5553_v4 = vpop.f32.mrf.mxu2 }
 0x4a5   : > { %1197 = vrot.lane.b32.xlu0 %v5553_v4, %s7482_s23  ;;  %1173 = vrot.lane.b32.xlu1 %v5553_v4, %s7492_s18  ;;  %s7610_s18 = smov 40  }
 0x4a6   : > { %1195 = vrot.lane.b32.xlu2 %v1111_v2, %s7482_s23  ;;  %s7570_s23 = smov 88  }
 0x4ac   : > { %v1161_v5 = vpop.f32.mrf.mxu2 }
 0x4ad   : > { %1203 = vrot.lane.b32.xlu0 %v5553_v4, %s7490_s20  ;;  %1179 = vrot.lane.b32.xlu1 %v5553_v4, %s5170_s30  ;;  %v5175_v5 = vmov -1e+09  }
 0x4ae   : > { %1201 = vrot.lane.b32.xlu2 %v1111_v2, %s7490_s20  ;;  %s7608_s20 = smov 24  }
 0x4b5   : > { %1191 = vrot.lane.b32.xlu1 %v5553_v4, %s7480_s1  ;;  %s7569_s1 = smov 80  }
 0x4b6   : > { %1185 = vrot.lane.b32.xlu2 %v5553_v4, %s7494_s26  ;;  %s7609_s26 = smov 48  }
 0x4be   : > { %1167 = vrot.lane.b32.xlu2 %v5553_v4, %s7488_s27  ;;  %s7607_s27 = smov 16  }
 0x4f0   : > { %v1172_v6 = vpop.permute.xlu2 %1171 }
 0x4f1   : > { %v1207_v19 = vrot.slane %v1172_v6, 4  ;;  %v1211_v33 = vsel %vm1208_vm3, %v1172_v6, %v1210_v58  ;;  %v799_v6 = vsel %vm797_vm5, 0.0, %v5175_v5 }
 0x4f2   : > { %v1219_v48 = vperm.slane %v1211_v33, %v5571_v26 }
 0x4f3   : > { %v1209_v35 = vsel %vm1208_vm3, %v1207_v19, %v1111_v2 }
 0x4f4   : > { %v1215_v20 = vperm.slane %v1209_v35, %v5571_v26  ;;  %v1270_v62 = vrot.slane %v1219_v48, 4 }
 0x4f6   : > { %v1258_v57 = vrot.slane %v1215_v20, 4 }
 0x4f8   : > { %v1178_v7 = vpop.permute.xlu2 %1177 }
 0x4f9   : > { %v1220_v50 = vrot.slane %v1178_v7, 4 }
 0x500   : > { %v1196_v8 = vpop.permute.xlu2 %1195 }
 0x501   : > { %v1232_v23 = vrot.slane %v1196_v8, 4 }
 0x507   : > { %v1190_v24 = vpop.permute.xlu0 %1189  ;;  %v1184_v25 = vpop.permute.xlu1 %1183 }
 0x508   : > { %v1246_v27 = vrot.slane %v1190_v24, 4  ;;  %v1233_v28 = vsel %vm1208_vm3, %v1232_v23, %v1184_v25  ;;  %v1234_v31 = vrot.slane %v1184_v25, 4  ;;  %v1202_v32 = vpop.permute.xlu2 %1201 }
 0x509   : > { %v1239_v39 = vperm.slane %v1233_v28, %v5571_v26  ;;  %v1244_v18 = vrot.slane %v1202_v32, 4  ;;  %v5612_v28 = vperm.slane %v799_v6, 0 }
 0x50a   : > { %v1235_v37 = vsel %vm1208_vm3, %v1196_v8, %v1234_v31  ;;  %v1247_v41 = vsel %vm1208_vm3, %v1202_v32, %v1246_v27 }
 0x50b   : > { %v1245_v40 = vsel %vm1208_vm3, %v1244_v18, %v1190_v24  ;;  %v1243_v43 = vperm.slane %v1235_v37, %v5571_v26  ;;  %v1282_v38 = vrot.slane %v1239_v39, 4  ;;  %v1255_v36 = vperm.slane %v1247_v41, %v5571_v26 }
 0x50c   : > { %v1251_v51 = vperm.slane %v1245_v40, %v5571_v26 }
 0x50d   : > { %v1294_v59 = vrot.slane %v1243_v43, 4  ;;  %v1292_v0 = vrot.slane %v1255_v36, 4 }
 0x50e   : > { %v1280_v52 = vrot.slane %v1251_v51, 4  ;;  %v1283_v63 = vsel %vm1208_vm3, %v1251_v51, %v1282_v38 }
 0x50f   : > { %v1166_v54 = vpop.permute.xlu1 %1165  ;;  %v1295_v15 = vsel %vm1208_vm3, %v1255_v36, %v1294_v59  ;;  %v1291_v16 = vperm.slane %v1283_v63, %v5593_v60  ;;  %v1293_v31 = vsel %vm1208_vm3, %v1292_v0, %v1243_v43 }
 0x510   : > { %v1221_v55 = vsel %vm1208_vm3, %v1220_v50, %v1166_v54  ;;  %v1222_v56 = vrot.slane %v1166_v54, 4  ;;  %v5597_v53 = vpop.permute.xlu2 %1185  ;;  %v1281_v25 = vsel %vm1208_vm3, %v1280_v52, %v1239_v39  ;;  %v1303_v18 = vperm.slane %v1295_v15, %v5593_v60 }
 0x511   : > { %v1227_v61 = vperm.slane %v1221_v55, %v5571_v26  ;;  %v1287_v41 = vperm.slane %v1281_v25, %v5593_v60  ;;  %v1322_v39 = vrot.slane %v5553_v4, 4  ;;  %v1299_v45 = vperm.slane %v1293_v31, %v5593_v60 }
 0x512   : > { %v1223_v49 = vsel %vm1208_vm3, %v1178_v7, %v1222_v56  ;;  %v1308_v36 = vrot.slane %v1291_v16, 4  ;;  %v1316_v54 = vrot.slane %v1303_v18, 4 }
 0x513   : > { %v1231_v1 = vperm.slane %v1223_v49, %v5571_v26  ;;  %v1256_v2 = vrot.slane %v1227_v61, 4  ;;  %v1259_v3 = vsel %vm1208_vm3, %v1227_v61, %v1258_v57  ;;  %v1312_v52 = vrot.slane %v1299_v45, 4 }
 0x514   : > { %v1267_v8 = vperm.slane %v1259_v3, %v5593_v60  ;;  %v1304_v31 = vrot.slane %v1287_v41, 4 }
 0x515   : > { %v1257_v7 = vsel %vm1208_vm3, %v1256_v2, %v1215_v20  ;;  %v1271_v19 = vsel %vm1208_vm3, %v1231_v1, %v1270_v62  ;;  %v1268_v58 = vrot.slane %v1231_v1, 4  ;;  %v1346_v1 = vrot.slane %v5597_v53, 4 }
 0x516   : > { %v1310_v23 = vrot.slane %v1267_v8, 4  ;;  %v1263_v24 = vperm.slane %v1257_v7, %v5593_v60  ;;  %v1279_v27 = vperm.slane %v1271_v19, %v5593_v60 }
 0x517   : > { %v1174_v32 = vpop.permute.xlu1 %1173  ;;  %v1198_v42 = vpop.permute.xlu0 %1197  ;;  %v1269_v50 = vsel %vm1208_vm3, %v1268_v58, %v1219_v48  ;;  %v1309_v48 = vsel %vm1208_vm3, %v1308_v36, %v1267_v8 }
 0x518   : > { %v1311_v35 = vsel %vm1208_vm3, %v1291_v16, %v1310_v23  ;;  %v1306_v37 = vrot.slane %v1263_v24, 4  ;;  %v1318_v33 = vrot.slane %v1279_v27, 4  ;;  %v1320_v40 = vrot.slane %v1174_v32, 4  ;;  %v1168_v51 = vpop.permute.xlu2 %1167  ;;  %v796_v23 = vld [vmem:[%s5578_s25 + $0x1] sm:$0x1]  ;;  %s7474_s25 = smov 16  }
 0x519   : > { %v5620_v20 = vadd.f32 %v5612_v28, %v1311_v35  ;;  %v1323_v38 = vsel %vm1208_vm3, %v1174_v32, %v1322_v39  ;;  %v1317_v61 = vsel %vm1208_vm3, %v1316_v54, %v1279_v27  ;;  %v1275_v62 = vperm.slane %v1269_v50, %v5593_v60 }
 0x51a   : > { %v1307_v43 = vsel %vm1208_vm3, %v1287_v41, %v1306_v37  ;;  %v1319_v46 = vsel %vm1208_vm3, %v1303_v18, %v1318_v33  ;;  %v1321_v55 = vsel %vm1208_vm3, %v1320_v40, %v5553_v4  ;;  %v1344_v49 = vrot.slane %v1198_v42, 4 }
 0x51b   : > { %v1464_v56 = vsel %vm1454_vm6, %v5620_v20, -inf  ;;  %v5632_v57 = vadd.f32 %v5612_v28, %v1307_v43  ;;  %v5635_v59 = vadd.f32 %v5612_v28, %v1319_v46  ;;  %v1334_v4 = vrot.slane %v1168_v51, 4 }
 0x51c   : > { %1465 = vmax.xlane.f32.xlu2 %v1464_v56  ;;  %v1327_v2 = vperm.slane %v1321_v55, %v5571_v26  ;;  %v5647_v3 = vperm.slane %v1323_v38, %v5571_v26  ;;  %v1313_v8 = vsel %vm1208_vm3, %v1312_v52, %v1275_v62  ;;  %v5652_v16 = vadd.f32 %v5612_v28, %v1309_v48 }
 0x51d   : > { %v1458_v63 = vsel %vm1454_vm6, %v5632_v57, -inf  ;;  %v1476_v0 = vsel %vm1454_vm6, %v5635_v59, -inf  ;;  %v1314_v19 = vrot.slane %v1275_v62, 4  ;;  %v1347_v25 = vsel %vm1208_vm3, %v1198_v42, %v1346_v1 }
 0x51e   : > { %1459 = vmax.xlane.f32.xlu0 %v1458_v63  ;;  %1477 = vmax.xlane.f32.xlu1 %v1476_v0  ;;  %v1345_v58 = vsel %vm1208_vm3, %v1344_v49, %v5597_v53  ;;  %v5663_v35 = vadd.f32 %v5612_v28, %v1317_v61  ;;  %v5666_v37 = vadd.f32 %v5612_v28, %v1313_v8  ;;  %v1370_v18 = vrot.slane %v1327_v2, 4 }
 0x51f   : > { %v1180_v6 = vpop.permute.xlu1 %1179  ;;  %v1382_v33 = vrot.slane %v5647_v3, 4  ;;  %v1204_v40 = vpop.permute.xlu0 %1203  ;;  %v1305_v39 = vsel %vm1208_vm3, %v1304_v31, %v1263_v24  ;;  %vm798_vm7 = vcmp.eq.s32.totalorder %v796_v23, 1  ;;  %v1355_v41 = vperm.slane %v1347_v25, %v5571_v26 }
 0x520   : > { %v1332_v15 = vrot.slane %v1180_v6, 4  ;;  %v1335_v7 = vsel %vm1208_vm3, %v1180_v6, %v1334_v4  ;;  %v1461_v53 = vsel %vm1454_vm6, %v5652_v16, -inf  ;;  %v1315_v43 = vsel %vm1208_vm3, %v1299_v45, %v1314_v19 }
 0x521   : > { %v5657_v27 = vperm.slane %v1335_v7, %v5571_v26  ;;  %v1351_v46 = vperm.slane %v1345_v58, %v5571_v26  ;;  %v1356_v36 = vrot.slane %v1204_v40, 4  ;;  %v1473_v24 = vsel %vm1454_vm6, %v5663_v35, -inf }
 0x522   : > { %v1333_v32 = vsel %vm1208_vm3, %v1332_v15, %v1168_v51  ;;  %v1467_v54 = vsel %vm1454_vm6, %v5666_v37, -inf  ;;  %v5684_v55 = vadd.f32 %v5612_v28, %v1305_v39  ;;  %v800_v45 = vsel %vm798_vm7, 0.0, %v5175_v5 }
 0x523   : > { %v1339_v42 = vperm.slane %v1333_v32, %v5571_v26  ;;  %v1383_v38 = vsel %vm1208_vm3, %v5657_v27, %v1382_v33  ;;  %v5688_v48 = vadd.f32 %v5612_v28, %v1315_v43  ;;  %v1394_v63 = vrot.slane %v1351_v46, 4 }
 0x524   : > { %1462 = vmax.xlane.f32.xlu2 %v1461_v53  ;;  %v1391_v62 = vperm.slane %v1383_v38, %v5593_v60  ;;  %v5696_v1 = vperm.slane %v800_v45, 0  ;;  %v1406_v6 = vrot.slane %v1355_v41, 4  ;;  %v1380_v15 = vrot.slane %v5657_v27, 4 }
 0x525   : > { %v1368_v50 = vrot.slane %v1339_v42, 4  ;;  %v1371_v51 = vsel %vm1208_vm3, %v1339_v42, %v1370_v18  ;;  %v1470_v25 = vsel %vm1454_vm6, %v5688_v48, -inf }
 0x526   : > { %1474 = vmax.xlane.f32.xlu1 %v1473_v24  ;;  %1468 = vmax.xlane.f32.xlu0 %v1467_v54  ;;  %v1379_v4 = vperm.slane %v1371_v51, %v5593_v60  ;;  %7527 = vst [vmem:[#allocation16_spill] sm:$0xff] %v5696_v1  ;;  %v1430_v32 = vrot.slane %v1391_v62, 4  ;;  %v1381_v45 = vsel %vm1208_vm3, %v1380_v15, %v5647_v3 }
 0x527   : > { %v1192_v56 = vpop.permute.xlu1 %1191  ;;  %v1369_v61 = vsel %vm1208_vm3, %v1368_v50, %v1327_v2  ;;  %v1455_v2 = vsel %vm1454_vm6, %v5684_v55, -inf }
 0x528   : > { %v1357_v52 = vsel %vm1208_vm3, %v1356_v36, %v1192_v56  ;;  %v1358_v49 = vrot.slane %v1192_v56, 4  ;;  %v1375_v5 = vperm.slane %v1369_v61, %v5593_v60  ;;  %v1422_v58 = vrot.slane %v1379_v4, 4 }
 0x529   : > { %v1363_v0 = vperm.slane %v1357_v52, %v5571_v26 }
 0x52a   : > { %v1359_v8 = vsel %vm1208_vm3, %v1204_v40, %v1358_v49  ;;  %v1418_v42 = vrot.slane %v1375_v5, 4  ;;  %v1387_v49 = vperm.slane %v1381_v45, %v5593_v60 }
 0x52b   : > { %v1367_v7 = vperm.slane %v1359_v8, %v5571_v26  ;;  %v1392_v19 = vrot.slane %v1363_v0, 4  ;;  %v1395_v23 = vsel %vm1208_vm3, %v1363_v0, %v1394_v63 }
 0x52c   : > { %v1403_v31 = vperm.slane %v1395_v23, %v5593_v60  ;;  %1471 = vmax.xlane.f32.xlu2 %v1470_v25 }
 0x52d   : > { %v1404_v18 = vrot.slane %v1367_v7, 4  ;;  %v1407_v33 = vsel %vm1208_vm3, %v1367_v7, %v1406_v6  ;;  %v1393_v40 = vsel %vm1208_vm3, %v1392_v19, %v1351_v46 }
 0x52e   : > { %v1423_v27 = vsel %vm1208_vm3, %v1403_v31, %v1422_v58  ;;  %v1415_v39 = vperm.slane %v1407_v33, %v5593_v60  ;;  %v1399_v53 = vperm.slane %v1393_v40, %v5593_v60  ;;  %v1420_v43 = vrot.slane %v1403_v31, 4  ;;  %1456 = vmax.xlane.f32.xlu1 %v1455_v2 }
 0x52f   : > { %v5713_v50 = vadd.f32 %v5696_v1, %v1423_v27  ;;  %v1405_v38 = vsel %vm1208_vm3, %v1404_v18, %v1355_v41  ;;  %v1426_v2 = vrot.slane %v1387_v49, 4 }
 0x530   : > { %v1431_v51 = vsel %vm1208_vm3, %v1415_v39, %v1430_v32  ;;  %v1419_v36 = vsel %vm1208_vm3, %v1399_v53, %v1418_v42  ;;  %v1428_v54 = vrot.slane %v1415_v39, 4  ;;  %v1421_v41 = vsel %vm1208_vm3, %v1420_v43, %v1379_v4 }
 0x531   : > { %v1488_v46 = vsel %vm1454_vm6, %v5713_v50, -inf  ;;  %v5721_v24 = vadd.f32 %v5696_v1, %v1431_v51  ;;  %v5726_v56 = vadd.f32 %v5696_v1, %v1419_v36  ;;  %v1411_v61 = vperm.slane %v1405_v38, %v5593_v60 }
 0x532   : > { %1489 = vmax.xlane.f32.xlu0 %v1488_v46  ;;  %v5734_v0 = vadd.f32 %v5696_v1, %v1421_v41  ;;  %v1429_v3 = vsel %vm1208_vm3, %v1428_v54, %v1391_v62  ;;  %v1416_v7 = vrot.slane %v1399_v53, 4 }
 0x533   : > { %v1500_v52 = vsel %vm1454_vm6, %v5721_v24, -inf  ;;  %v1424_v63 = vrot.slane %v1411_v61, 4  ;;  %v1482_v6 = vsel %vm1454_vm6, %v5726_v56, -inf  ;;  %v5741_v8 = vadd.f32 %v5696_v1, %v1429_v3 }
 0x534   : > { %1501 = vmax.xlane.f32.xlu2 %v1500_v52  ;;  %v1485_v15 = vsel %vm1454_vm6, %v5734_v0, -inf  ;;  %v1427_v62 = vsel %vm1208_vm3, %v1411_v61, %v1426_v2  ;;  %v1417_v31 = vsel %vm1208_vm3, %v1416_v7, %v1375_v5 }
 0x535   : > { %v1425_v4 = vsel %vm1208_vm3, %v1424_v63, %v1387_v49  ;;  %v1497_v23 = vsel %vm1454_vm6, %v5741_v8, -inf  ;;  %v5752_v25 = vadd.f32 %v5696_v1, %v1427_v62  ;;  %v5758_v32 = vadd.f32 %v5696_v1, %v1417_v31 }
 0x536   : > { %1483 = vmax.xlane.f32.xlu1 %v1482_v6  ;;  %v5746_v19 = vadd.f32 %v5696_v1, %v1425_v4 }
 0x537   : > { %v1494_v18 = vsel %vm1454_vm6, %v5752_v25, -inf  ;;  %v1479_v33 = vsel %vm1454_vm6, %v5758_v32, -inf }
 0x538   : > { %v1491_v58 = vsel %vm1454_vm6, %v5746_v19, -inf }
 0x53a   : > { %1486 = vmax.xlane.f32.xlu0 %v1485_v15 }
 0x53c   : > { %1498 = vmax.xlane.f32.xlu2 %v1497_v23 }
 0x53e   : > { %1492 = vmax.xlane.f32.xlu1 %v1491_v58 }
 0x542   : > { %1495 = vmax.xlane.f32.xlu0 %v1494_v18 }
 0x544   : > { %1480 = vmax.xlane.f32.xlu2 %v1479_v33 }
 0x58f   : > { %v1466_v40 = vpop.xlane.xlu2 %1465 }
 0x590   : > { %v1506_v42 = vsub.f32 %v5620_v20, %v1466_v40 }
 0x591   : > { %v1460_v27 = vpop.xlane.xlu0 %1459  ;;  %v1478_v5 = vpop.xlane.xlu1 %1477 }
 0x592   : > { %v1525_v39 = vmul.f32 1.442695, %v1506_v42  ;;  %v1504_v53 = vsub.f32 %v5632_v57, %v1460_v27  ;;  %v1510_v43 = vsub.f32 %v5635_v59, %v1478_v5 }
 0x594   : > { %4867 = vpow2.f32 %v1525_v39  ;;  %v1521_v38 = vmul.f32 1.442695, %v1504_v53  ;;  %v1533_v51 = vmul.f32 1.442695, %v1510_v43 }
 0x596   : > { %4869 = vpow2.f32 %v1521_v38 }
 0x597   : > { %4871 = vpow2.f32 %v1533_v51  ;;  %v1463_v36 = vpop.xlane.xlu2 %1462 }
 0x598   : > { %v1505_v46 = vsub.f32 %v5652_v16, %v1463_v36 }
 0x599   : > { %v1475_v54 = vpop.xlane.xlu1 %1474  ;;  %v1469_v45 = vpop.xlane.xlu0 %1468 }
 0x59a   : > { %v5768_v41 = vpop.eup %4867  ;;  %v1523_v20 = vmul.f32 1.442695, %v1505_v46  ;;  %v1509_v61 = vsub.f32 %v5663_v35, %v1475_v54  ;;  %v1507_v52 = vsub.f32 %v5666_v37, %v1469_v45 }
 0x59b   : > { %v1560_v57 = vsel %vm1454_vm6, %v5768_v41, 0.0 }
 0x59c   : > { %v5774_v59 = vpop.eup %4869  ;;  %4873 = vpow2.f32 %v1523_v20  ;;  %v1531_v49 = vmul.f32 1.442695, %v1509_v61  ;;  %v1527_v63 = vmul.f32 1.442695, %v1507_v52  ;;  %1561 = vadd.xlane.f32.xlu1 %v1560_v57 }
 0x59d   : > { %v5776_v3 = vpop.eup %4871  ;;  %v1554_v16 = vsel %vm1454_vm6, %v5774_v59, 0.0 }
 0x59e   : > { %4875 = vpow2.f32 %v1531_v49  ;;  %1555 = vadd.xlane.f32.xlu2 %v1554_v16  ;;  %v1572_v35 = vsel %vm1454_vm6, %v5776_v3, 0.0 }
 0x59f   : > { %4877 = vpow2.f32 %v1527_v63  ;;  %1573 = vadd.xlane.f32.xlu0 %v1572_v35  ;;  %v1472_v37 = vpop.xlane.xlu2 %1471 }
 0x5a0   : > { %v1508_v6 = vsub.f32 %v5688_v48, %v1472_v37 }
 0x5a1   : > { %v1457_v4 = vpop.xlane.xlu1 %1456 }
 0x5a2   : > { %v5783_v2 = vpop.eup %4873  ;;  %v1529_v15 = vmul.f32 1.442695, %v1508_v6  ;;  %v1503_v7 = vsub.f32 %v5684_v55, %v1457_v4 }
 0x5a3   : > { %v1557_v62 = vsel %vm1454_vm6, %v5783_v2, 0.0 }
 0x5a4   : > { %v5788_v23 = vpop.eup %4875  ;;  %4879 = vpow2.f32 %v1529_v15  ;;  %v1519_v31 = vmul.f32 1.442695, %v1503_v7  ;;  %1558 = vadd.xlane.f32.xlu1 %v1557_v62 }
 0x5a5   : > { %v1490_v58 = vpop.xlane.xlu0 %1489  ;;  %v5790_v18 = vpop.eup %4877  ;;  %v1569_v48 = vsel %vm1454_vm6, %v5788_v23, 0.0 }
 0x5a6   : > { %v1514_v33 = vsub.f32 %v5713_v50, %v1490_v58  ;;  %4881 = vpow2.f32 %v1519_v31  ;;  %v1563_v55 = vsel %vm1454_vm6, %v5790_v18, 0.0 }
 0x5a7   : > { %1570 = vadd.xlane.f32.xlu0 %v1569_v48  ;;  %1564 = vadd.xlane.f32.xlu2 %v1563_v55  ;;  %v1502_v42 = vpop.xlane.xlu2 %1501 }
 0x5a8   : > { %v1541_v40 = vmul.f32 1.442695, %v1514_v33  ;;  %v1518_v27 = vsub.f32 %v5721_v24, %v1502_v42 }
 0x5a9   : > { %v1484_v5 = vpop.xlane.xlu1 %1483 }
 0x5aa   : > { %4883 = vpow2.f32 %v1541_v40  ;;  %v5798_v39 = vpop.eup %4879  ;;  %v1549_v53 = vmul.f32 1.442695, %v1518_v27  ;;  %v1512_v50 = vsub.f32 %v5726_v56, %v1484_v5 }
 0x5ab   : > { %v1566_v43 = vsel %vm1454_vm6, %v5798_v39, 0.0 }
 0x5ac   : > { %v5803_v38 = vpop.eup %4881  ;;  %4885 = vpow2.f32 %v1549_v53  ;;  %v1537_v51 = vmul.f32 1.442695, %v1512_v50  ;;  %1567 = vadd.xlane.f32.xlu1 %v1566_v43 }
 0x5ad   : > { %v1487_v36 = vpop.xlane.xlu0 %1486  ;;  %v1551_v24 = vsel %vm1454_vm6, %v5803_v38, 0.0 }
 0x5ae   : > { %v1513_v46 = vsub.f32 %v5734_v0, %v1487_v36  ;;  %4887 = vpow2.f32 %v1537_v51 }
 0x5af   : > { %1552 = vadd.xlane.f32.xlu0 %v1551_v24  ;;  %v1499_v56 = vpop.xlane.xlu2 %1498 }
 0x5b0   : > { %v5808_v54 = vpop.eup %4883  ;;  %v1539_v45 = vmul.f32 1.442695, %v1513_v46  ;;  %v1517_v20 = vsub.f32 %v5741_v8, %v1499_v56 }
 0x5b1   : > { %v1584_v61 = vsel %vm1454_vm6, %v5808_v54, 0.0  ;;  %v1493_v52 = vpop.xlane.xlu1 %1492 }
 0x5b2   : > { %4889 = vpow2.f32 %v1539_v45  ;;  %1585 = vadd.xlane.f32.xlu2 %v1584_v61  ;;  %v5813_v57 = vpop.eup %4885  ;;  %v1547_v0 = vmul.f32 1.442695, %v1517_v20  ;;  %v1515_v49 = vsub.f32 %v5746_v19, %v1493_v52 }
 0x5b3   : > { %v1596_v63 = vsel %vm1454_vm6, %v5813_v57, 0.0 }
 0x5b4   : > { %v5818_v16 = vpop.eup %4887  ;;  %4891 = vpow2.f32 %v1547_v0  ;;  %v1543_v35 = vmul.f32 1.442695, %v1515_v49  ;;  %1597 = vadd.xlane.f32.xlu1 %v1596_v63 }
 0x5b5   : > { %v1496_v8 = vpop.xlane.xlu0 %1495  ;;  %v1578_v6 = vsel %vm1454_vm6, %v5818_v16, 0.0 }
 0x5b6   : > { %v1516_v37 = vsub.f32 %v5752_v25, %v1496_v8  ;;  %4893 = vpow2.f32 %v1543_v35 }
 0x5b7   : > { %1579 = vadd.xlane.f32.xlu0 %v1578_v6  ;;  %v1481_v19 = vpop.xlane.xlu2 %1480 }
 0x5b8   : > { %v5823_v4 = vpop.eup %4889  ;;  %v1545_v15 = vmul.f32 1.442695, %v1516_v37  ;;  %v1511_v7 = vsub.f32 %v5758_v32, %v1481_v19 }
 0x5b9   : > { %v1581_v62 = vsel %vm1454_vm6, %v5823_v4, 0.0 }
 0x5ba   : > { %4895 = vpow2.f32 %v1545_v15  ;;  %1582 = vadd.xlane.f32.xlu2 %v1581_v62  ;;  %v5828_v31 = vpop.eup %4891  ;;  %v1535_v58 = vmul.f32 1.442695, %v1511_v7 }
 0x5bb   : > { %v1593_v25 = vsel %vm1454_vm6, %v5828_v31, 0.0 }
 0x5bc   : > { %v5832_v33 = vpop.eup %4893  ;;  %4897 = vpow2.f32 %v1535_v58  ;;  %1594 = vadd.xlane.f32.xlu1 %v1593_v25 }
 0x5bd   : > { %v1587_v48 = vsel %vm1454_vm6, %v5832_v33, 0.0 }
 0x5bf   : > { %1588 = vadd.xlane.f32.xlu0 %v1587_v48 }
 0x5c0   : > { %v5836_v55 = vpop.eup %4895 }
 0x5c1   : > { %v1590_v32 = vsel %vm1454_vm6, %v5836_v55, 0.0 }
 0x5c2   : > { %1591 = vadd.xlane.f32.xlu2 %v1590_v32  ;;  %v5840_v40 = vpop.eup %4897 }
 0x5c3   : > { %v1575_v42 = vsel %vm1454_vm6, %v5840_v40, 0.0 }
 0x5c4   : > { %1576 = vadd.xlane.f32.xlu1 %v1575_v42 }
 0x60f   : > { %v1562_v27 = vpop.xlane.xlu1 %1561 }
 0x610   : > { %4899 = vrcp.f32 %v1562_v27  ;;  %v1655_v50 = vand.u32 2147483648, %v1562_v27  ;;  %v1653_v43 = vand.u32 2147483647, %v1562_v27  ;;  %vm1649_vm8 = vweird.f32 %v1562_v27 }
 0x611   : > { %v1556_v5 = vpop.xlane.xlu2 %1555 }
 0x612   : > { %4901 = vrcp.f32 %v1556_v5  ;;  %v1574_v53 = vpop.xlane.xlu0 %1573  ;;  %v1623_v36 = vand.u32 2147483647, %v1556_v5  ;;  %v1656_v24 = vor.u32 1.1754944e-38, %v1655_v50  ;;  %vm1619_vm9 = vweird.f32 %v1556_v5 }
 0x613   : > { %4903 = vrcp.f32 %v1574_v53  ;;  %v1625_v20 = vand.u32 2147483648, %v1556_v5  ;;  %v1713_v61 = vand.u32 2147483647, %v1574_v53  ;;  %vm5847_vm10 = vcmp.eq.f32.partialorder %v1653_v43, 8.507059e+37 }
 0x614   : > { %vm1709_vm11 = vweird.f32 %v1574_v53  ;;  %v1715_v35 = vand.u32 2147483648, %v1574_v53  ;;  %vm5851_vm13 = vcmp.eq.f32.partialorder %v1623_v36, 8.507059e+37 }
 0x615   : > { %v1626_v25 = vor.u32 1.1754944e-38, %v1625_v20  ;;  %vm5862_vm14 = vcmp.eq.f32.partialorder %v1713_v61, 8.507059e+37 }
 0x616   : > { %v4900_v51 = vpop.eup %4899  ;;  %v1716_v43 = vor.u32 1.1754944e-38, %v1715_v35 }
 0x617   : > { %v1645_v46 = vmul.f32 %v4900_v51, %v1562_v27  ;;  %v5844_v45 = vpop.xlane.xlu1 %1558  ;;  %vm1650_vm12 = vweird.f32 %v4900_v51 }
 0x618   : > { %v4902_v56 = vpop.eup %4901  ;;  %4905 = vrcp.f32 %v5844_v45  ;;  %v1640_v6 = vand.u32 2147483648, %v5844_v45  ;;  %v1638_v58 = vand.u32 2147483647, %v5844_v45  ;;  %vm5869_vm0 = vmor %vm1649_vm8, %vm1650_vm12  ;;  %vm1634_vm2 = vweird.f32 %v5844_v45 }
 0x619   : > { %v4904_v52 = vpop.eup %4903  ;;  %v1646_v0 = vsub.f32 1.0, %v1645_v46  ;;  %v1615_v63 = vmul.f32 %v4902_v56, %v1556_v5  ;;  %vm1620_vm15 = vweird.f32 %v4902_v56 }
 0x61a   : > { %v1705_v37 = vmul.f32 %v4904_v52, %v1574_v53  ;;  %v5856_v15 = vpop.xlane.xlu2 %1564  ;;  %v5858_v19 = vpop.xlane.xlu0 %1570  ;;  %vm1710_vm1 = vweird.f32 %v4904_v52  ;;  %v1641_v20 = vor.u32 1.1754944e-38, %v1640_v6  ;;  %vm5877_vm5 = vcmp.eq.f32.partialorder %v1638_v58, 8.507059e+37  ;;  %vm1621_vm7 = vmor %vm1619_vm9, %vm1620_vm15 }
 0x61b   : > { %v1647_v7 = vmul.f32 %v4900_v51, %v1646_v0  ;;  %v1616_v62 = vsub.f32 1.0, %v1615_v63  ;;  %4907 = vrcp.f32 %v5856_v15  ;;  %v1668_v27 = vand.u32 2147483647, %v5856_v15  ;;  %vm1711_vm12 = vmor %vm1709_vm11, %vm1710_vm1 }
 0x61c   : > { %v1706_v48 = vsub.f32 1.0, %v1705_v37  ;;  %4909 = vrcp.f32 %v5858_v19  ;;  %vm1664_vm8 = vweird.f32 %v5856_v15  ;;  %v1670_v6 = vand.u32 2147483648, %v5856_v15 }
 0x61d   : > { %v1648_v42 = vadd.f32 %v4900_v51, %v1647_v7  ;;  %v1617_v50 = vmul.f32 %v4902_v56, %v1616_v62  ;;  %vm5897_vm15 = vcmp.eq.f32.partialorder %v1668_v27, 8.507059e+37  ;;  %vm1694_vm11 = vweird.f32 %v5858_v19 }
 0x61e   : > { %v4906_v36 = vpop.eup %4905  ;;  %v1707_v0 = vmul.f32 %v4904_v52, %v1706_v48  ;;  %v1671_v49 = vor.u32 1.1754944e-38, %v1670_v6 }
 0x61f   : > { %v1652_v61 = vsel %vm5869_vm0, %v4900_v51, %v1648_v42  ;;  %v1618_v63 = vadd.f32 %v4902_v56, %v1617_v50  ;;  %v1630_v37 = vmul.f32 %v4906_v36, %v5844_v45  ;;  %v5882_v7 = vpop.xlane.xlu1 %1567  ;;  %v1698_v51 = vand.u32 2147483647, %v5858_v19 }
 0x620   : > { %v1708_v62 = vadd.f32 %v4904_v52, %v1707_v0  ;;  %v1700_v50 = vand.u32 2147483648, %v5858_v19  ;;  %4911 = vrcp.f32 %v5882_v7  ;;  %v1657_v5 = vsel %vm5847_vm10, %v1656_v24, %v1652_v61 }
 0x621   : > { %v4908_v48 = vpop.eup %4907  ;;  %v1622_v42 = vsel %vm1621_vm7, %v4902_v56, %v1618_v63  ;;  %v1631_v58 = vsub.f32 1.0, %v1630_v37  ;;  %vm1635_vm9 = vweird.f32 %v4906_v36  ;;  %vm5913_vm10 = vcmp.eq.f32.partialorder %v1698_v51, 8.507059e+37 }
 0x622   : > { %v4910_v46 = vpop.eup %4909  ;;  %v1627_v0 = vsel %vm5851_vm13, %v1626_v25, %v1622_v42  ;;  %v1712_v13 = vsel %vm1711_vm12, %v4904_v52, %v1708_v62  ;;  %v1660_v11 = vmul.f32 %v4908_v48, %v5856_v15  ;;  %v5905_v8 = vpop.xlane.xlu0 %1552  ;;  %v5908_v52 = vmul.f32 %v5768_v41, %v1657_v5  ;;  %vm1636_vm13 = vmor %vm1634_vm2, %vm1635_vm9 }
 0x623   : > { %v1632_v1 = vmul.f32 %v4906_v36, %v1631_v58  ;;  %v1717_v56 = vsel %vm5862_vm14, %v1716_v43, %v1712_v13  ;;  %v1690_v24 = vmul.f32 %v4910_v46, %v5858_v19  ;;  %v5911_v25 = vmul.f32 %v5774_v59, %v1627_v0 }
 0x624   : > { %v1661_v63 = vsub.f32 1.0, %v1660_v11  ;;  %vm1665_vm14 = vweird.f32 %v4908_v48  ;;  %v1701_v32 = vor.u32 1.1754944e-38, %v1700_v50  ;;  %v5920_v27 = vmul.f32 %v5776_v3, %v1717_v56 }
 0x625   : > { %v1633_v61 = vadd.f32 %v4906_v36, %v1632_v1  ;;  %v1691_v13 = vsub.f32 1.0, %v1690_v24  ;;  %vm1695_vm0 = vweird.f32 %v4910_v46  ;;  %4913 = vrcp.f32 %v5905_v8  ;;  %v5926_v6 = vpop.xlane.xlu2 %1585  ;;  %vm1666_vm1 = vmor %vm1664_vm8, %vm1665_vm14 }
 0x626   : > { %v1662_v11 = vmul.f32 %v4908_v48, %v1661_v63  ;;  %v4912_v43 = vpop.eup %4911  ;;  %v1851_v51 = vrot.slane %v5908_v52, 4  ;;  %v1853_v42 = vrot.slane %v5911_v25, 4  ;;  %vm1679_vm2 = vweird.f32 %v5882_v7 }
 0x627   : > { %v1637_v41 = vsel %vm1636_vm13, %v4906_v36, %v1633_v61  ;;  %v1692_v62 = vmul.f32 %v4910_v46, %v1691_v13  ;;  %v1675_v45 = vmul.f32 %v4912_v43, %v5882_v7  ;;  %v1683_v3 = vand.u32 2147483647, %v5882_v7  ;;  %v5947_v63 = vpop.xlane.xlu1 %1597 }
 0x628   : > { %v1642_v1 = vsel %vm5877_vm5, %v1641_v20, %v1637_v41  ;;  %v1663_v59 = vadd.f32 %v4908_v48, %v1662_v11  ;;  %v1685_v58 = vand.u32 2147483648, %v5882_v7  ;;  %v1875_v50 = vrot.slane %v5920_v27, 4  ;;  %vm1696_vm5 = vmor %vm1694_vm11, %vm1695_vm0 }
 0x629   : > { %v1693_v20 = vadd.f32 %v4910_v46, %v1692_v62  ;;  %v1676_v35 = vsub.f32 1.0, %v1675_v45  ;;  %v5938_v5 = vmul.f32 %v5783_v2, %v1642_v1  ;;  %4915 = vrcp.f32 %v5926_v6 }
 0x62a   : > { %v1667_v36 = vsel %vm1666_vm1, %v4908_v48, %v1663_v59  ;;  %vm1680_vm7 = vweird.f32 %v4912_v43  ;;  %v1608_v56 = vand.u32 2147483647, %v5905_v8  ;;  %v5951_v2 = vsel %vm1208_vm3, %v5908_v52, %v1853_v42  ;;  %v5977_v62 = vpop.xlane.xlu0 %1579 }
 0x62b   : > { %v1672_v0 = vsel %vm5897_vm15, %v1671_v49, %v1667_v36  ;;  %v1697_v15 = vsel %vm1696_vm5, %v4910_v46, %v1693_v20  ;;  %v1677_v48 = vmul.f32 %v4912_v43, %v1676_v35  ;;  %v4914_v24 = vpop.eup %4913  ;;  %vm5955_vm8 = vcmp.eq.f32.partialorder %v1683_v3, 8.507059e+37  ;;  %vm1681_vm12 = vmor %vm1679_vm2, %vm1680_vm7 }
 0x62c   : > { %v1702_v53 = vsel %vm5913_vm10, %v1701_v32, %v1697_v15  ;;  %v1610_v46 = vand.u32 2147483648, %v5905_v8  ;;  %v5961_v49 = vmul.f32 %v5790_v18, %v1672_v0  ;;  %v1686_v11 = vor.u32 1.1754944e-38, %v1685_v58 }
 0x62d   : > { %v1678_v61 = vadd.f32 %v4912_v43, %v1677_v48  ;;  %v1600_v13 = vmul.f32 %v4914_v24, %v5905_v8  ;;  %v5965_v41 = vmul.f32 %v5788_v23, %v1702_v53  ;;  %vm1604_vm9 = vweird.f32 %v5905_v8  ;;  %v5985_v20 = vpop.xlane.xlu2 %1582 }
 0x62e   : > { %v1773_v37 = vand.u32 2147483647, %v5926_v6  ;;  %4917 = vrcp.f32 %v5947_v63  ;;  %v1839_v32 = vrot.slane %v5938_v5, 4  ;;  %vm5973_vm15 = vcmp.eq.f32.partialorder %v1608_v56, 8.507059e+37 }
 0x62f   : > { %v1682_v18 = vsel %vm1681_vm12, %v4912_v43, %v1678_v61  ;;  %v1601_v1 = vsub.f32 1.0, %v1600_v13  ;;  %v4916_v23 = vpop.eup %4915  ;;  %v1611_v45 = vor.u32 1.1754944e-38, %v1610_v46  ;;  %vm1769_vm11 = vweird.f32 %v5926_v6 }
 0x630   : > { %v1687_v7 = vsel %vm5955_vm8, %v1686_v11, %v1682_v18  ;;  %v1775_v42 = vand.u32 2147483648, %v5926_v6  ;;  %vm1605_vm10 = vweird.f32 %v4914_v24  ;;  %v1765_v43 = vmul.f32 %v4916_v23, %v5926_v6 }
 0x631   : > { %v1602_v36 = vmul.f32 %v4914_v24, %v1601_v1  ;;  %v1863_v35 = vrot.slane %v5965_v41, 4  ;;  %vm5988_vm13 = vcmp.eq.f32.partialorder %v1773_v37, 8.507059e+37  ;;  %v1833_v0 = vand.u32 2147483647, %v5947_v63  ;;  %vm1606_vm14 = vmor %vm1604_vm9, %vm1605_vm10  ;;  %v6004_v37 = vpop.xlane.xlu1 %1594 }
 0x632   : > { %4919 = vrcp.f32 %v5977_v62  ;;  %v5995_v15 = vmul.f32 %v5798_v39, %v1687_v7  ;;  %v1766_v56 = vsub.f32 1.0, %v1765_v43  ;;  %v1835_v53 = vand.u32 2147483648, %v5947_v63 }
 0x633   : > { %v1603_v48 = vadd.f32 %v4914_v24, %v1602_v36  ;;  %vm1770_vm0 = vweird.f32 %v4916_v23  ;;  %v1776_v46 = vor.u32 1.1754944e-38, %v1775_v42  ;;  %vm1829_vm1 = vweird.f32 %v5947_v63 }
 0x634   : > { %v4918_v19 = vpop.eup %4917  ;;  %4921 = vrcp.f32 %v5985_v20  ;;  %v1767_v11 = vmul.f32 %v4916_v23, %v1766_v56  ;;  %v1745_v39 = vand.u32 2147483648, %v5977_v62  ;;  %v6008_v18 = vsel %vm1208_vm3, %v1863_v35, %v5961_v49  ;;  %vm1771_vm5 = vmor %vm1769_vm11, %vm1770_vm0 }
 0x635   : > { %v1607_v61 = vsel %vm1606_vm14, %v4914_v24, %v1603_v48  ;;  %v1825_v13 = vmul.f32 %v4918_v19, %v5947_v63  ;;  %vm6012_vm2 = vcmp.eq.f32.partialorder %v1833_v0, 8.507059e+37  ;;  %v1743_v24 = vand.u32 2147483647, %v5977_v62 }
 0x636   : > { %v1612_v8 = vsel %vm5973_vm15, %v1611_v45, %v1607_v61  ;;  %v6021_v7 = vsel %vm1208_vm3, %v1875_v50, %v5995_v15  ;;  %v1768_v42 = vadd.f32 %v4916_v23, %v1767_v11  ;;  %v1836_v43 = vor.u32 1.1754944e-38, %v1835_v53  ;;  %v6041_v11 = vpop.xlane.xlu0 %1588 }
 0x637   : > { %v1826_v36 = vsub.f32 1.0, %v1825_v13  ;;  %v6025_v59 = vmul.f32 %v5803_v38, %v1612_v8  ;;  %vm1739_vm7 = vweird.f32 %v5977_v62  ;;  %4923 = vrcp.f32 %v6004_v37 }
 0x638   : > { %v4920_v35 = vpop.eup %4919  ;;  %v1772_v45 = vsel %vm1771_vm5, %v4916_v23, %v1768_v42  ;;  %vm1830_vm8 = vweird.f32 %v4918_v19  ;;  %v1746_v0 = vor.u32 1.1754944e-38, %v1745_v39  ;;  %vm6035_vm12 = vcmp.eq.f32.partialorder %v1743_v24, 8.507059e+37 }
 0x639   : > { %v1827_v50 = vmul.f32 %v4918_v19, %v1826_v36  ;;  %v1777_v53 = vsel %vm5988_vm13, %v1776_v46, %v1772_v45  ;;  %v1735_v61 = vmul.f32 %v4920_v35, %v5977_v62  ;;  %vm1754_vm9 = vweird.f32 %v5985_v20  ;;  %vm1831_vm15 = vmor %vm1829_vm1, %vm1830_vm8 }
 0x63a   : > { %v4922_v56 = vpop.eup %4921  ;;  %v1758_v6 = vand.u32 2147483647, %v5985_v20  ;;  %v1760_v39 = vand.u32 2147483648, %v5985_v20  ;;  %v1818_v58 = vand.u32 2147483647, %v6004_v37  ;;  %v6050_v46 = vsel %vm1208_vm3, %v1839_v32, %v6025_v59  ;;  %v6062_v32 = vpop.xlane.xlu2 %1591 }
 0x63b   : > { %v1828_v23 = vadd.f32 %v4918_v19, %v1827_v50  ;;  %v1750_v13 = vmul.f32 %v4922_v56, %v5985_v20  ;;  %v6054_v24 = vmul.f32 %v5808_v54, %v1777_v53  ;;  %v1736_v42 = vsub.f32 1.0, %v1735_v61 }
 0x63c   : > { %vm1814_vm11 = vweird.f32 %v6004_v37  ;;  %v1820_v50 = vand.u32 2147483648, %v6004_v37  ;;  %4925 = vrcp.f32 %v6041_v11  ;;  %vm1740_vm10 = vweird.f32 %v4920_v35 }
 0x63d   : > { %v1832_v36 = vsel %vm1831_vm15, %v4918_v19, %v1828_v23  ;;  %v1751_v45 = vsub.f32 1.0, %v1750_v13  ;;  %v4924_v48 = vpop.eup %4923  ;;  %v1737_v53 = vmul.f32 %v4920_v35, %v1736_v42  ;;  %vm6066_vm13 = vcmp.eq.f32.partialorder %v1758_v6, 8.507059e+37  ;;  %vm1741_vm1 = vmor %vm1739_vm7, %vm1740_vm10 }
 0x63e   : > { %v1837_v54 = vsel %vm6012_vm2, %v1836_v43, %v1832_v36  ;;  %vm1755_vm14 = vweird.f32 %v4922_v56  ;;  %v1761_v61 = vor.u32 1.1754944e-38, %v1760_v39  ;;  %v1810_v23 = vmul.f32 %v4924_v48, %v6004_v37 }
 0x63f   : > { %v1752_v19 = vmul.f32 %v4922_v56, %v1751_v45  ;;  %v1963_v13 = vrot.slane %v6054_v24, 4  ;;  %v1738_v3 = vadd.f32 %v4920_v35, %v1737_v53  ;;  %vm6072_vm0 = vcmp.eq.f32.partialorder %v1818_v58, 8.507059e+37  ;;  %vm1756_vm2 = vmor %vm1754_vm9, %vm1755_vm14 }
 0x640   : > { %4927 = vrcp.f32 %v6062_v32  ;;  %v6078_v1 = vmul.f32 %v5813_v57, %v1837_v54  ;;  %v1811_v6 = vsub.f32 1.0, %v1810_v23  ;;  %v1821_v39 = vor.u32 1.1754944e-38, %v1820_v50  ;;  %v6090_v50 = vpop.xlane.xlu1 %1576 }
 0x641   : > { %v1753_v43 = vadd.f32 %v4922_v56, %v1752_v19  ;;  %v1742_v42 = vsel %vm1741_vm1, %v4920_v35, %v1738_v3  ;;  %vm1815_vm5 = vweird.f32 %v4924_v48  ;;  %vm1784_vm8 = vweird.f32 %v6041_v11 }
 0x642   : > { %v1788_v58 = vand.u32 2147483647, %v6041_v11  ;;  %v1790_v36 = vand.u32 2147483648, %v6041_v11  ;;  %v4926_v45 = vpop.eup %4925  ;;  %v1747_v57 = vsel %vm6035_vm12, %v1746_v0, %v1742_v42  ;;  %v1812_v54 = vmul.f32 %v4924_v48, %v1811_v6  ;;  %vm1816_vm12 = vmor %vm1814_vm11, %vm1815_vm5 }
 0x643   : > { %v1757_v62 = vsel %vm1756_vm2, %v4922_v56, %v1753_v43  ;;  %v1803_v53 = vand.u32 2147483647, %v6062_v32  ;;  %v1748_v3 = vmul.f32 %v5818_v16, %v1747_v57  ;;  %v1780_v35 = vmul.f32 %v4926_v45, %v6041_v11 }
 0x644   : > { %v1762_v20 = vsel %vm6066_vm13, %v1761_v61, %v1757_v62  ;;  %v1805_v19 = vand.u32 2147483648, %v6062_v32  ;;  %v1987_v23 = vrot.slane %v6078_v1, 4  ;;  %v1813_v0 = vadd.f32 %v4924_v48, %v1812_v54 }
 0x645   : > { %v6099_v38 = vmul.f32 %v5823_v4, %v1762_v20  ;;  %vm1799_vm7 = vweird.f32 %v6062_v32  ;;  %v1781_v16 = vsub.f32 1.0, %v1780_v35  ;;  %vm6105_vm9 = vcmp.eq.f32.partialorder %v1788_v58, 8.507059e+37 }
 0x646   : > { %v4928_v56 = vpop.eup %4927  ;;  %v1791_v61 = vor.u32 1.1754944e-38, %v1790_v36  ;;  %4929 = vrcp.f32 %v6090_v50  ;;  %v1817_v43 = vsel %vm1816_vm12, %v4924_v48, %v1813_v0  ;;  %vm1785_vm15 = vweird.f32 %v4926_v45 }
 0x647   : > { %v1795_v4 = vmul.f32 %v4928_v56, %v6062_v32  ;;  %vm6111_vm10 = vcmp.eq.f32.partialorder %v1803_v53, 8.507059e+37  ;;  %v1965_v42 = vrot.slane %v1748_v3, 4  ;;  %v1822_v37 = vsel %vm6072_vm0, %v1821_v39, %v1817_v43  ;;  %vm1786_vm13 = vmor %vm1784_vm8, %vm1785_vm15 }
 0x648   : > { %v1782_v57 = vmul.f32 %v4926_v45, %v1781_v16  ;;  %v1806_v58 = vor.u32 1.1754944e-38, %v1805_v19  ;;  %v1951_v62 = vrot.slane %v6099_v38, 4  ;;  %v6119_v36 = vmul.f32 %v5828_v31, %v1822_v37 }
 0x649   : > { %v1796_v54 = vsub.f32 1.0, %v1795_v4  ;;  %v1846_v48 = vperm.slane %v6050_v46, %v5571_v26  ;;  %vm1800_vm11 = vweird.f32 %v4928_v56  ;;  %v1852_v53 = vsel %vm1208_vm3, %v1851_v51, %v5911_v25 }
 0x64a   : > { %v1783_v20 = vadd.f32 %v4926_v45, %v1782_v57  ;;  %v1870_v8 = vperm.slane %v6008_v18, %v5571_v26  ;;  %v1975_v39 = vrot.slane %v6119_v36, 4  ;;  %vm1724_vm14 = vweird.f32 %v6090_v50  ;;  %vm1801_vm0 = vmor %vm1799_vm7, %vm1800_vm11 }
 0x64b   : > { %v1797_v31 = vmul.f32 %v4928_v56, %v1796_v54  ;;  %v1728_v46 = vand.u32 2147483647, %v6090_v50  ;;  %v1858_v35 = vperm.slane %v1852_v53, %v5571_v26  ;;  %v1882_v25 = vperm.slane %v6021_v7, %v5571_v26 }
 0x64c   : > { %v4930_v19 = vpop.eup %4929  ;;  %v1787_v52 = vsel %vm1786_vm13, %v4926_v45, %v1783_v20  ;;  %v1889_v51 = vrot.slane %v1846_v48, 4  ;;  %v1913_v18 = vrot.slane %v1870_v8, 4  ;;  %v1730_v43 = vand.u32 2147483648, %v6090_v50 }
 0x64d   : > { %v1792_v0 = vsel %vm6105_vm9, %v1791_v61, %v1787_v52  ;;  %v1798_v16 = vadd.f32 %v4928_v56, %v1797_v31  ;;  %v1720_v11 = vmul.f32 %v4930_v19, %v6090_v50  ;;  %v1964_v63 = vsel %vm1208_vm3, %v1963_v13, %v1748_v3 }
 0x64e   : > { %v6143_v4 = vmul.f32 %v5832_v33, %v1792_v0  ;;  %v1890_v45 = vsel %vm1208_vm3, %v1858_v35, %v1889_v51  ;;  %v1914_v7 = vsel %vm1208_vm3, %v1882_v25, %v1913_v18  ;;  %v1966_v61 = vsel %vm1208_vm3, %v6054_v24, %v1965_v42 }
 0x64f   : > { %v1802_v37 = vsel %vm1801_vm0, %v4928_v56, %v1798_v16  ;;  %v1721_v57 = vsub.f32 1.0, %v1720_v11  ;;  %v6156_v33 = vperm.slane %v1914_v7, %v5593_v60  ;;  %vm1725_vm1 = vweird.f32 %v4930_v19 }
 0x650   : > { %v1976_v32 = vsel %vm1208_vm3, %v1975_v39, %v6143_v4  ;;  %v1807_v54 = vsel %vm6111_vm10, %v1806_v58, %v1802_v37  ;;  %v1970_v20 = vperm.slane %v1964_v63, %v5571_v26  ;;  %v6166_v24 = vperm.slane %v1890_v45, %v5593_v60  ;;  %vm1726_vm5 = vmor %vm1724_vm14, %vm1725_vm1 }
 0x651   : > { %v1982_v53 = vperm.slane %v1976_v32, %v5571_v26  ;;  %v1808_v13 = vmul.f32 %v5836_v55, %v1807_v54  ;;  %v1722_v3 = vmul.f32 %v4930_v19, %v1721_v57  ;;  %vm6168_vm2 = vcmp.eq.f32.partialorder %v1728_v46, 8.507059e+37 }
 0x652   : > { %v1731_v42 = vor.u32 1.1754944e-38, %v1730_v43  ;;  %v1887_v39 = vrot.slane %v1858_v35, 4  ;;  %v1911_v31 = vrot.slane %v1882_v25, 4  ;;  %v1977_v6 = vrot.slane %v6143_v4, 4 }
 0x653   : > { %v1988_v58 = vsel %vm1208_vm3, %v1987_v23, %v1808_v13  ;;  %v1723_v52 = vadd.f32 %v4930_v19, %v1722_v3  ;;  %v1939_v55 = vrot.slane %v6156_v33, 4  ;;  %v2025_v51 = vrot.slane %v1982_v53, 4 }
 0x654   : > { %v1994_v46 = vperm.slane %v1988_v58, %v5571_v26  ;;  %v1888_v18 = vsel %vm1208_vm3, %v1887_v39, %v1846_v48  ;;  %v1999_v0 = vrot.slane %v1970_v20, 4  ;;  %v1912_v16 = vsel %vm1208_vm3, %v1911_v31, %v1870_v8 }
 0x655   : > { %v1727_v35 = vsel %vm1726_vm5, %v4930_v19, %v1723_v52  ;;  %v6182_v25 = vperm.slane %v1888_v18, %v5593_v60  ;;  %v1941_v23 = vrot.slane %v6166_v24, 4  ;;  %v7562_v4 = vrot.slane %v6025_v59, 4 }
 0x656   : > { %v1732_v11 = vsel %vm6168_vm2, %v1731_v42, %v1727_v35  ;;  %v2026_v50 = vsel %vm1208_vm3, %v1994_v46, %v2025_v51  ;;  %v2023_v43 = vrot.slane %v1994_v46, 4  ;;  %v1989_v45 = vrot.slane %v1808_v13, 4 }
 0x657   : > { %v1842_v48 = vsel %vm1208_vm3, %v5938_v5, %v7562_v4  ;;  %v1733_v19 = vmul.f32 %v5840_v40, %v1732_v11  ;;  %v2034_v7 = vperm.slane %v2026_v50, %v5593_v60  ;;  %v1937_v8 = vrot.slane %v6182_v25, 4 }
 0x658   : > { %v1940_v63 = vsel %vm1208_vm3, %v1939_v55, %v6166_v24  ;;  %v6199_v37 = vperm.slane %v1912_v16, %v5593_v60  ;;  %v2024_v57 = vsel %vm1208_vm3, %v2023_v43, %v1982_v53  ;;  %v1862_v59 = vperm.slane %v5951_v2, %v5571_v26 }
 0x659   : > { %v1952_v5 = vsel %vm1208_vm3, %v1951_v62, %v1733_v19  ;;  %v1953_v40 = vrot.slane %v1733_v19, 4  ;;  %v1850_v32 = vperm.slane %v1842_v48, %v5571_v26  ;;  %v7563_v54 = vrot.slane %v5961_v49, 4 }
 0x65a   : > { %v1958_v3 = vperm.slane %v1952_v5, %v5571_v26  ;;  %v2051_v24 = vrot.slane %v2034_v7, 4  ;;  %v1938_v53 = vsel %vm1208_vm3, %v6199_v37, %v1937_v8  ;;  %v7564_v2 = vrot.slane %v5995_v15, 4 }
 0x65b   : > { %v1866_v13 = vsel %vm1208_vm3, %v5965_v41, %v7563_v54  ;;  %v6220_v62 = vperm.slane %v2024_v57, %v5593_v60  ;;  %v1899_v49 = vrot.slane %v1862_v59, 4  ;;  %v1954_v41 = vsel %vm1208_vm3, %v6099_v38, %v1953_v40 }
 0x65c   : > { %v1878_v56 = vsel %vm1208_vm3, %v5920_v27, %v7564_v2  ;;  %v2001_v39 = vrot.slane %v1958_v3, 4  ;;  %v2000_v31 = vsel %vm1208_vm3, %v1999_v0, %v1958_v3  ;;  %v1874_v58 = vperm.slane %v1866_v13, %v5571_v26 }
 0x65d   : > { %v1886_v42 = vperm.slane %v1878_v56, %v5571_v26  ;;  %v6228_v52 = vperm.slane %v1966_v61, %v5571_v26  ;;  %v2006_v15 = vperm.slane %v2000_v31, %v5593_v60  ;;  %v1900_v27 = vsel %vm1208_vm3, %v1899_v49, %v1850_v32 }
 0x65e   : > { %v1978_v46 = vsel %vm1208_vm3, %v6119_v36, %v1977_v6  ;;  %v2002_v51 = vsel %vm1208_vm3, %v1970_v20, %v2001_v39  ;;  %v1906_v38 = vperm.slane %v1900_v27, %v5593_v60  ;;  %v1962_v18 = vperm.slane %v1954_v41, %v5571_v26 }
 0x65f   : > { %v1923_v55 = vrot.slane %v1886_v42, 4  ;;  %v1990_v0 = vsel %vm1208_vm3, %v6078_v1, %v1989_v45  ;;  %v2010_v61 = vperm.slane %v2002_v51, %v5593_v60  ;;  %v2049_v35 = vrot.slane %v2006_v15, 4 }
 0x660   : > { %v1998_v11 = vperm.slane %v1990_v0, %v5571_v26  ;;  %v1986_v36 = vperm.slane %v1978_v46, %v5571_v26  ;;  %v2011_v20 = vrot.slane %v6228_v52, 4  ;;  %v1901_v6 = vrot.slane %v1850_v32, 4 }
 0x661   : > { %v1924_v16 = vsel %vm1208_vm3, %v1923_v55, %v1874_v58  ;;  %v2052_v43 = vsel %vm1208_vm3, %v2051_v24, %v2010_v61  ;;  %v2050_v4 = vsel %vm1208_vm3, %v6220_v62, %v2049_v35  ;;  %v2053_v1 = vrot.slane %v2010_v61, 4 }
 0x662   : > { %v1930_v50 = vperm.slane %v1924_v16, %v5593_v60  ;;  %v2035_v48 = vrot.slane %v1998_v11, 4  ;;  %v4796_v45 = vpack.i.bf16 %v2052_v43, %v1940_v63  ;;  %v1935_v19 = vrot.slane %v6199_v37, 4 }
 0x663   : > { %v4791_v8 = vpack.i.bf16 %v2050_v4, %v1938_v53  ;;  %v2012_v57 = vsel %vm1208_vm3, %v2011_v20, %v1962_v18  ;;  %v1942_v5 = vsel %vm1208_vm3, %v6156_v33, %v1941_v23  ;;  %v2054_v40 = vsel %vm1208_vm3, %v2034_v7, %v2053_v1  ;;  %v4693_v20 = vld [vmem:[%s7448_s10] sm:$0xff] }
 0x664   : > { %v2018_v32 = vperm.slane %v2012_v57, %v5593_v60  ;;  %v2036_v54 = vsel %vm1208_vm3, %v2035_v48, %v1986_v36  ;;  %4797 = vrot.lane.b32.xlu2 %v4796_v45, %s7474_s25  ;;  %v4801_v63 = vpack.i.bf16 %v2054_v40, %v1942_v5  ;;  %v1902_v13 = vsel %vm1208_vm3, %v1862_v59, %v1901_v6  ;;  %s7484_s25 = smov 56  }
 0x665   : > { %4792 = vrot.lane.b32.xlu0 %v4791_v8, %s7478_s21  ;;  %v2042_v37 = vperm.slane %v2036_v54, %v5593_v60  ;;  %v1945_v3 = vrot.slane %v1906_v38, 4  ;;  %v1943_v33 = vrot.slane %v1930_v50, 4  ;;  %v1910_v23 = vperm.slane %v1902_v13, %v5593_v60  ;;  %s7567_s21 = smov 72  }
 0x666   : > { %v2057_v24 = vrot.slane %v2018_v32, 4  ;;  %v2047_v7 = vrot.slane %v6220_v62, 4  ;;  %4802 = vrot.lane.b32.xlu1 %v4801_v63, %s7473_s29  ;;  %v1925_v2 = vrot.slane %v1874_v58, 4  ;;  %v1936_v56 = vsel %vm1208_vm3, %v1935_v19, %v6182_v25  ;;  %s7477_s29 = smov 32  }
 0x667   : > { %v2055_v53 = vrot.slane %v2042_v37, 4  ;;  %v2013_v39 = vrot.slane %v1962_v18, 4  ;;  %v2037_v31 = vrot.slane %v1986_v36, 4  ;;  %v1946_v27 = vsel %vm1208_vm3, %v1930_v50, %v1945_v3  ;;  %v4694_v36 = vld [vmem:[%s7448_s10 + $0x8] sm:$0xff] }
 0x668   : > { %v2058_v49 = vsel %vm1208_vm3, %v2042_v37, %v2057_v24  ;;  %v1926_v59 = vsel %vm1208_vm3, %v1886_v42, %v1925_v2  ;;  %v1944_v62 = vsel %vm1208_vm3, %v1943_v33, %v1906_v38  ;;  %v1949_v55 = vrot.slane %v1910_v23, 4  ;;  %2264 = vmatpush.bf16.msra.mxu3 %v4694_v36 }
 0x669   : > { %v2056_v41 = vsel %vm1208_vm3, %v2055_v53, %v2018_v32  ;;  %v4811_v46 = vpack.i.bf16 %v2058_v49, %v1946_v27  ;;  %v2038_v58 = vsel %vm1208_vm3, %v1998_v11, %v2037_v31  ;;  %v2048_v0 = vsel %vm1208_vm3, %v2047_v7, %v2006_v15 }
 0x66a   : > { %v4806_v51 = vpack.i.bf16 %v2056_v41, %v1944_v62  ;;  %v1934_v25 = vperm.slane %v1926_v59, %v5593_v60  ;;  %v2014_v42 = vsel %vm1208_vm3, %v6228_v52, %v2013_v39  ;;  %v2046_v18 = vperm.slane %v2038_v58, %v5593_v60 }
 0x66b   : > { %v2022_v15 = vperm.slane %v2014_v42, %v5593_v60  ;;  %vm2121_vm8 = vcmask 130048   ;;  %vm2124_vm7 = vcmask 195584   ;;  %vm7499_vm12 = vcmask 326656  }
 0x66c   : > { %4812 = vrot.lane.b32.xlu2 %v4811_v46, %s7476_s22  ;;  %v1950_v38 = vsel %vm1208_vm3, %v1934_v25, %v1949_v55  ;;  %v2059_v61 = vrot.slane %v2046_v18, 4  ;;  %v1947_v35 = vrot.slane %v1934_v25, 4  ;;  %s7486_s22 = smov 48   ;;  %2265 = vmatpush.bf16.msra.mxu3 %v4693_v20  ;;  %vm7497_vm9 = vcmask 457728  }
 0x66d   : > { %4807 = vrot.lane.b32.xlu0 %v4806_v51, %s7477_s29  ;;  %v2061_v52 = vrot.slane %v2022_v15, 4  ;;  %vm7498_vm15 = vcmask 392192   ;;  %vm7496_vm10 = vcmask 523264   ;;  %s7568_s29 = smov 120  }
 0x66e   : > { %2113 = vrot.lane.b32.xlu1 %v1950_v38, %s7484_s25  ;;  %v2060_v16 = vsel %vm1208_vm3, %v2059_v61, %v2022_v15  ;;  %v1948_v11 = vsel %vm1208_vm3, %v1947_v35, %v1910_v23  ;;  %v6312_v15 = vld [vmem:[%s7525_s6] sm:$0xff] }
 0x66f   : > { %v2062_v50 = vsel %vm1208_vm3, %v2046_v18, %v2061_v52  ;;  %v2242_v61 = vperm.slane %v6312_v15, 5 }
 0x674   : > { %2107 = vrot.lane.b32.xlu2 %v2060_v16, %s7486_s22 }
 0x675   : > { %2105 = vrot.lane.b32.xlu0 %v1948_v11, %s7486_s22  ;;  %s7566_s22 = smov 112  }
 0x67d   : > { %2115 = vrot.lane.b32.xlu0 %v2062_v50, %s7484_s25  ;;  %s7565_s25 = smov 96  }
 0x6be   : > { %v4798_v43 = vpop.permute.xlu2 %4797 }
 0x6bf   : > { %v4799_v45 = vunpack.i.l.bf16 %v4798_v43  ;;  %v4800_v63 = vunpack.i.h.bf16 %v4798_v43 }
 0x6c6   : > { %v4813_v32 = vpop.permute.xlu2 %4812 }
 0x6c7   : > { %v4814_v24 = vunpack.i.l.bf16 %v4813_v32  ;;  %v4815_v39 = vunpack.i.h.bf16 %v4813_v32  ;;  %v4696_v32 = vld [vmem:[%s7449_s11 + $0x8] sm:$0xff] }
 0x6c8   : > { %2386 = vmatpush.bf16.msra.mxu0 %v4696_v32 }
 0x6ce   : > { %v2108_v62 = vpop.permute.xlu2 %2107 }
 0x6d7   : > { %v4793_v6 = vpop.permute.xlu0 %4792 }
 0x6d8   : > { %v4794_v4 = vunpack.i.l.bf16 %v4793_v6  ;;  %v4803_v1 = vpop.permute.xlu1 %4802  ;;  %v4795_v19 = vunpack.i.h.bf16 %v4793_v6 }
 0x6d9   : > { %v4804_v8 = vunpack.i.l.bf16 %v4803_v1  ;;  %v4805_v13 = vunpack.i.h.bf16 %v4803_v1 }
 0x6da   : > { %v2119_v48 = vsel %vm1454_vm6, %v1936_v56, %v4794_v4  ;;  %v2120_v54 = vsel %vm1454_vm6, %v2048_v0, %v4795_v19 }
 0x6db   : > { %v2122_v5 = vsel %vm2121_vm8, %v2119_v48, %v4799_v45  ;;  %v2123_v33 = vsel %vm2121_vm8, %v2120_v54, %v4800_v63  ;;  %v4695_v54 = vld [vmem:[%s7449_s11] sm:$0xff] }
 0x6dc   : > { %v2125_v37 = vsel %vm2124_vm7, %v2122_v5, %v4804_v8  ;;  %v2126_v2 = vsel %vm2124_vm7, %v2123_v33, %v4805_v13  ;;  %2387 = vmatpush.bf16.msra.mxu0 %v4695_v54 }
 0x6df   : > { %v4808_v57 = vpop.permute.xlu0 %4807 }
 0x6e0   : > { %v4809_v40 = vunpack.i.l.bf16 %v4808_v57  ;;  %v4810_v23 = vunpack.i.h.bf16 %v4808_v57  ;;  %v2114_v56 = vpop.permute.xlu1 %2113 }
 0x6e2   : > { %v2127_v3 = vsel %vm698_vm4, %v2125_v37, %v4809_v40  ;;  %v2128_v41 = vsel %vm698_vm4, %v2126_v2, %v4810_v23 }
 0x6e3   : > { %v2130_v53 = vsel %vm7499_vm12, %v2127_v3, %v4814_v24  ;;  %v2131_v27 = vsel %vm7499_vm12, %v2128_v41, %v4815_v39 }
 0x6e4   : > { %v2134_v46 = vsel %vm7498_vm15, %v2131_v27, %v2108_v62 }
 0x6e7   : > { %v2106_v7 = vpop.permute.xlu0 %2105 }
 0x6e8   : > { %v2133_v49 = vsel %vm7498_vm15, %v2130_v53, %v2106_v7 }
 0x6e9   : > { %v2136_v59 = vsel %vm7497_vm9, %v2133_v49, %v2114_v56 }
 0x6ea   : > { %v2138_v31 = vpack.c.bf16 %v2136_v59, %v2136_v59 }
 0x6ec   : > { %4535 = vmatmul.msk.bf16.vlgmr.msrb.gmra.mxu3 %vm7496_vm10, %v2138_v31 }
 0x6ef   : > { %v2116_v55 = vpop.permute.xlu0 %2115 }
 0x6f0   : > { %v2137_v51 = vsel %vm7497_vm9, %v2134_v46, %v2116_v55  ;;  %v4700_v55 = vld [vmem:[%s7451_s13 + $0x18] sm:$0xff] }
 0x6f1   : > { %v2139_v58 = vpack.c.bf16 %v2137_v51, %v2137_v51  ;;  %2436 = vmatpush.bf16.msra.mxu1 %v4700_v55 }
 0x6f3   : > { %4536 = vmatmul.msk.bf16.vlgmr.msrb.gmra.mxu0 %vm7496_vm10, %v2139_v58 }
 0x76f   : > { %v2193_v0 = vpop.f32.mrf.mxu3 }
 0x770   : > { %v2233_v25 = vpop.f32.mrf.mxu0 }
 0x771   : > { %v2237_v42 = vpack.c.bf16 %v2233_v25, %v2193_v0 }
 0x773   : > { %4545 = vmatmul.msk.bf16.vlgmr.msra.gmra.mxu3 %vm698_vm4, %v2237_v42 }
 0x777   : > { %v2195_v38 = vpop.f32.mrf.mxu3 }
 0x778   : > { %v2235_v18 = vpop.f32.mrf.mxu0 }
 0x7f6   : > { %v2267_v35 = vpop.f32.mrf.mxu3 }
 0x7f7   : > { %v2268_v16 = vadd.f32 %v2267_v35, %v2242_v61 }
 0x7f9   : > { %v6316_v11 = vadd.f32 %v2268_v16, %v5398_v34 }
 0x7fb   : > { %v2274_v52 = vsel %vm698_vm4, %v6316_v11, 0.0 }
 0x7fc   : > { %2275 = vadd.xlane.f32.xlu1 %v2274_v52 }
 0x7fe   : > { %v2269_v50 = vpop.f32.mrf.mxu3 }
 0x7ff   : > { %v2270_v36 = vadd.f32 %v2269_v50, %v2242_v61 }
 0x801   : > { %v6321_v20 = vadd.f32 %v2270_v36, %v5403_v44 }
 0x803   : > { %v2277_v6 = vsel %vm698_vm4, %v6321_v20, 0.0 }
 0x804   : > { %2278 = vadd.xlane.f32.xlu2 %v2277_v6 }
 0x86f   : > { %v2276_v43 = vpop.xlane.xlu1 %2275 }
 0x870   : > { %v2280_v4 = vmul.f32 %v2276_v43, %v5376_v30  ;;  %v2318_v43 = vperm.slane %v6312_v15, 6 }
 0x872   : > { %v6327_v1 = vsub.f32 %v6316_v11, %v2280_v4 }
 0x874   : > { %v2284_v34 = vmul.f32 %v6327_v1, %v6327_v1 }
 0x876   : > { %v2286_v48 = vsel %vm698_vm4, %v2284_v34, 0.0 }
 0x877   : > { %v2279_v45 = vpop.xlane.xlu2 %2278  ;;  %2287 = vadd.xlane.f32.xlu0 %v2286_v48 }
 0x878   : > { %v2281_v44 = vmul.f32 %v2279_v45, %v5376_v30 }
 0x87a   : > { %v6334_v19 = vsub.f32 %v6321_v20, %v2281_v44 }
 0x87c   : > { %v2285_v8 = vmul.f32 %v6334_v19, %v6334_v19  ;;  %v2320_v32 = vmul.f32 %v2318_v43, %v6334_v19  ;;  %v4698_v19 = vld [vmem:[%s7451_s13 + $0x8] sm:$0xff] }
 0x87e   : > { %v2289_v57 = vsel %vm698_vm4, %v2285_v8, 0.0 }
 0x87f   : > { %2290 = vadd.xlane.f32.xlu1 %v2289_v57 }
 0x8ea   : > { %v2288_v5 = vpop.xlane.xlu0 %2287 }
 0x8eb   : > { %v2292_v40 = vmul.f32 %v2288_v5, %v5390_v47  ;;  %v2319_v5 = vmul.f32 %v2318_v43, %v6327_v1  ;;  %v4699_v1 = vld [vmem:[%s7451_s13 + $0x10] sm:$0xff] }
 0x8ec   : > { %2437 = vmatpush.bf16.msra.mxu1 %v4699_v1 }
 0x8ed   : > { %4931 = vrsqrt.f32 %v2292_v40  ;;  %vm2301_vm11 = vcmp.eq.f32.partialorder %v2292_v40, inf  ;;  %v2304_v41 = vand.u32 2147483648, %v2292_v40  ;;  %vm2303_vm13 = vcmp.eq.f32.partialorder %v2292_v40, 0.0 }
 0x8f0   : > { %2438 = vmatpush.bf16.msra.mxu1 %v4698_v19 }
 0x8f2   : > { %v2291_v63 = vpop.xlane.xlu1 %2290 }
 0x8f3   : > { %v4932_v37 = vpop.eup %4931  ;;  %v2293_v13 = vmul.f32 %v2291_v63, %v5390_v47 }
 0x8f4   : > { %v2295_v3 = vmul.f32 %v4932_v37, %v2292_v40 }
 0x8f5   : > { %4933 = vrsqrt.f32 %v2293_v13  ;;  %vm2313_vm14 = vcmp.eq.f32.partialorder %v2293_v13, inf  ;;  %v2316_v58 = vand.u32 2147483648, %v2293_v13  ;;  %vm2315_vm0 = vcmp.eq.f32.partialorder %v2293_v13, 0.0 }
 0x8f6   : > { %v2296_v24 = vmul.f32 %v4932_v37, %v2295_v3 }
 0x8f8   : > { %v2297_v33 = vmul.f32 0.5, %v2296_v24 }
 0x8fa   : > { %v2298_v23 = vsub.f32 1.5, %v2297_v33 }
 0x8fb   : > { %v4934_v7 = vpop.eup %4933 }
 0x8fc   : > { %v2299_v53 = vmul.f32 %v4932_v37, %v2298_v23  ;;  %v2307_v2 = vmul.f32 %v4934_v7, %v2293_v13 }
 0x8fe   : > { %v2300_v56 = vmul.f32 %v2299_v53, %v2292_v40  ;;  %v2308_v49 = vmul.f32 %v4934_v7, %v2307_v2  ;;  %v4842_v2 = vld [vmem:[%s7450_s12] ss:$0 sm:$0xff] }
 0x900   : > { %v2302_v59 = vsel %vm2301_vm11, %v2292_v40, %v2300_v56  ;;  %v2309_v39 = vmul.f32 0.5, %v2308_v49 }
 0x901   : > { %v2305_v31 = vsel %vm2303_vm13, %v2304_v41, %v2302_v59 }
 0x902   : > { %v2321_v27 = vadd.f32 1e-06, %v2305_v31  ;;  %v2310_v62 = vsub.f32 1.5, %v2309_v39 }
 0x904   : > { %4935 = vrcp.f32 %v2321_v27  ;;  %v2311_v46 = vmul.f32 %v4934_v7, %v2310_v62  ;;  %v2334_v50 = vand.u32 2147483648, %v2321_v27  ;;  %vm2328_vm2 = vweird.f32 %v2321_v27 }
 0x905   : > { %v2332_v36 = vand.u32 2147483647, %v2321_v27 }
 0x906   : > { %v2312_v51 = vmul.f32 %v2311_v46, %v2293_v13  ;;  %v2335_v48 = vor.u32 1.1754944e-38, %v2334_v50 }
 0x907   : > { %vm2333_vm11 = vcmp.eq.f32.partialorder %v2332_v36, 8.507059e+37 }
 0x908   : > { %v2314_v0 = vsel %vm2313_vm14, %v2293_v13, %v2312_v51  ;;  %v2353_v13 = vperm.slane %v6312_v15, 7  ;;  %v4697_v15 = vld [vmem:[%s7451_s13] sm:$0xff] }
 0x909   : > { %v2317_v25 = vsel %vm2315_vm0, %v2316_v58, %v2314_v0  ;;  %2439 = vmatpush.bf16.msra.mxu1 %v4697_v15 }
 0x90a   : > { %v4936_v42 = vpop.eup %4935  ;;  %v2322_v38 = vadd.f32 1e-06, %v2317_v25 }
 0x90b   : > { %v2324_v18 = vmul.f32 %v4936_v42, %v2321_v27  ;;  %vm2329_vm1 = vweird.f32 %v4936_v42  ;;  %v4843_v27 = vld [vmem:[%s7525_s6 + $0x8] ss:$0 sm:$0xff] }
 0x90c   : > { %4937 = vrcp.f32 %v2322_v38  ;;  %vm2330_vm5 = vmor %vm2328_vm2, %vm2329_vm1  ;;  %v2349_v45 = vand.u32 2147483648, %v2322_v38  ;;  %v2347_v8 = vand.u32 2147483647, %v2322_v38  ;;  %vm2343_vm14 = vweird.f32 %v2322_v38 }
 0x90d   : > { %v2325_v61 = vsub.f32 1.0, %v2324_v18 }
 0x90e   : > { %v2350_v54 = vor.u32 1.1754944e-38, %v2349_v45  ;;  %vm2348_vm1 = vcmp.eq.f32.partialorder %v2347_v8, 8.507059e+37  ;;  %v4703_v45 = vld [vmem:[%s7524_s8 + $0x10] sm:$0xff] }
 0x90f   : > { %v2326_v35 = vmul.f32 %v4936_v42, %v2325_v61  ;;  %v4705_v8 = vld [vmem:[%s7447_s9 + $0x10] sm:$0xff] }
 0x911   : > { %v2327_v16 = vadd.f32 %v4936_v42, %v2326_v35 }
 0x912   : > { %v4938_v52 = vpop.eup %4937 }
 0x913   : > { %v2339_v6 = vmul.f32 %v4938_v52, %v2322_v38  ;;  %v2331_v4 = vsel %vm2330_vm5, %v4936_v42, %v2327_v16  ;;  %vm2344_vm13 = vweird.f32 %v4938_v52 }
 0x914   : > { %v2336_v57 = vsel %vm2333_vm11, %v2335_v48, %v2331_v4  ;;  %vm2345_vm0 = vmor %vm2343_vm14, %vm2344_vm13  ;;  %v4704_v4 = vld [vmem:[%s7524_s8 + $0x18] sm:$0xff] }
 0x915   : > { %v2340_v34 = vsub.f32 1.0, %v2339_v6  ;;  %v2337_v63 = vmul.f32 %v2336_v57, %v2319_v5  ;;  %v4706_v48 = vld [vmem:[%s7447_s9 + $0x18] sm:$0xff]  ;;  %2596 = vmatpush.bf16.msrb.mxu3 %v4704_v4 }
 0x916   : > { %2628 = vmatpush.bf16.msrb.mxu0 %v4706_v48 }
 0x917   : > { %v2341_v44 = vmul.f32 %v4938_v52, %v2340_v34  ;;  %v2354_v33 = vadd.f32 %v2353_v13, %v2337_v63  ;;  %v4702_v34 = vld [vmem:[%s7523_s7 + $0x18] sm:$0xff] }
 0x918   : > { %2564 = vmatpush.bf16.msra.mxu2 %v4702_v34 }
 0x919   : > { %v2342_v40 = vadd.f32 %v4938_v52, %v2341_v44  ;;  %v4701_v44 = vld [vmem:[%s7523_s7 + $0x10] sm:$0xff]  ;;  %2597 = vmatpush.bf16.msrb.mxu3 %v4703_v45 }
 0x91a   : > { %2629 = vmatpush.bf16.msrb.mxu0 %v4705_v8 }
 0x91b   : > { %v2346_v37 = vsel %vm2345_vm0, %v4938_v52, %v2342_v40 }
 0x91c   : > { %v2351_v3 = vsel %vm2348_vm1, %v2350_v54, %v2346_v37  ;;  %2565 = vmatpush.bf16.msra.mxu2 %v4701_v44 }
 0x91d   : > { %v2352_v24 = vmul.f32 %v2351_v3, %v2320_v32 }
 0x91f   : > { %v2355_v23 = vadd.f32 %v2353_v13, %v2352_v24 }
 0x921   : > { %v2356_v7 = vpack.c.bf16 %v2355_v23, %v2354_v33 }
 0x923   : > { %4554 = vmatmul.msk.bf16.vlgmr.msra.gmra.mxu0 %vm698_vm4, %v2356_v7 }
 0x9a0   : > { %v2389_v53 = vpop.f32.mrf.mxu0 }
 0x9a1   : > { %v2390_v56 = vadd.f32 %v4842_v2, %v2389_v53 }
 0x9a3   : > { %v2394_v59 = vmax.f32 %v2390_v56, 0.0 }
 0x9a8   : > { %v2391_v49 = vpop.f32.mrf.mxu0 }
 0x9a9   : > { %v2392_v41 = vadd.f32 %v4842_v2, %v2391_v49 }
 0x9ab   : > { %v2395_v39 = vmax.f32 %v2392_v41, 0.0 }
 0x9ad   : > { %v2396_v31 = vpack.c.bf16 %v2395_v39, %v2394_v59 }
 0x9af   : > { %4571 = vmatmul.msk.bf16.vlgmr.msra.gmra.mxu1 %vm7496_vm10, %v2396_v31 }
 0xa2c   : > { %v2441_v62 = vpop.f32.mrf.mxu1 }
 0xa2d   : > { %v2446_v55 = vadd.f32 %v2441_v62, %v6316_v11 }
 0xa2f   : > { %v6372_v46 = vadd.f32 %v4843_v27, %v2446_v55 }
 0xa31   : > { %v2454_v51 = vsel %vm698_vm4, %v6372_v46, 0.0 }
 0xa32   : > { %2455 = vadd.xlane.f32.xlu2 %v2454_v51 }
 0xa34   : > { %v2443_v58 = vpop.f32.mrf.mxu1 }
 0xa35   : > { %v2447_v0 = vadd.f32 %v2443_v58, %v6321_v20 }
 0xa37   : > { %v6377_v25 = vadd.f32 %v4843_v27, %v2447_v0 }
 0xa39   : > { %v2457_v42 = vsel %vm698_vm4, %v6377_v25, 0.0 }
 0xa3a   : > { %2458 = vadd.xlane.f32.xlu0 %v2457_v42  ;;  %v6418_v42 = vld [vmem:[%s7525_s6 + $0x10] sm:$0xff] }
 0xaa5   : > { %v2456_v38 = vpop.xlane.xlu2 %2455 }
 0xaa6   : > { %v2460_v18 = vmul.f32 %v2456_v38, %v5376_v30 }
 0xaa8   : > { %v6383_v11 = vsub.f32 %v6372_v46, %v2460_v18 }
 0xaaa   : > { %v2464_v61 = vmul.f32 %v6383_v11, %v6383_v11 }
 0xaac   : > { %v2466_v35 = vsel %vm698_vm4, %v2464_v61, 0.0 }
 0xaad   : > { %2467 = vadd.xlane.f32.xlu1 %v2466_v35  ;;  %v2459_v16 = vpop.xlane.xlu0 %2458  ;;  %v2498_v35 = vperm.slane %v6418_v42, 0 }
 0xaae   : > { %v2461_v20 = vmul.f32 %v2459_v16, %v5376_v30 }
 0xaaf   : > { %v2499_v34 = vmul.f32 %v2498_v35, %v6383_v11  ;;  %v2609_v11 = vperm.slane %v6418_v42, 4 }
 0xab0   : > { %v6390_v52 = vsub.f32 %v6377_v25, %v2461_v20 }
 0xab2   : > { %v2465_v50 = vmul.f32 %v6390_v52, %v6390_v52  ;;  %v2500_v45 = vmul.f32 %v2498_v35, %v6390_v52 }
 0xab4   : > { %v2469_v36 = vsel %vm698_vm4, %v2465_v50, 0.0 }
 0xab5   : > { %2470 = vadd.xlane.f32.xlu2 %v2469_v36 }
 0xb20   : > { %v2468_v6 = vpop.xlane.xlu1 %2467 }
 0xb21   : > { %v2472_v43 = vmul.f32 %v2468_v6, %v5390_v47 }
 0xb23   : > { %4939 = vrsqrt.f32 %v2472_v43  ;;  %vm2481_vm2 = vcmp.eq.f32.partialorder %v2472_v43, inf  ;;  %v2484_v7 = vand.u32 2147483648, %v2472_v43  ;;  %vm2483_vm5 = vcmp.eq.f32.partialorder %v2472_v43, 0.0 }
 0xb28   : > { %v2471_v57 = vpop.xlane.xlu2 %2470 }
 0xb29   : > { %v4940_v5 = vpop.eup %4939  ;;  %v2473_v40 = vmul.f32 %v2471_v57, %v5390_v47 }
 0xb2a   : > { %v2475_v32 = vmul.f32 %v4940_v5, %v2472_v43 }
 0xb2b   : > { %4941 = vrsqrt.f32 %v2473_v40  ;;  %vm2493_vm11 = vcmp.eq.f32.partialorder %v2473_v40, inf  ;;  %v2496_v41 = vand.u32 2147483648, %v2473_v40  ;;  %vm2495_vm13 = vcmp.eq.f32.partialorder %v2473_v40, 0.0 }
 0xb2c   : > { %v2476_v54 = vmul.f32 %v4940_v5, %v2475_v32 }
 0xb2e   : > { %v2477_v63 = vmul.f32 0.5, %v2476_v54 }
 0xb30   : > { %v2478_v37 = vsub.f32 1.5, %v2477_v63 }
 0xb31   : > { %v4942_v13 = vpop.eup %4941 }
 0xb32   : > { %v2479_v3 = vmul.f32 %v4940_v5, %v2478_v37  ;;  %v2487_v24 = vmul.f32 %v4942_v13, %v2473_v40  ;;  %v2533_v5 = vperm.slane %v6418_v42, 1 }
 0xb34   : > { %v2480_v33 = vmul.f32 %v2479_v3, %v2472_v43  ;;  %v2488_v23 = vmul.f32 %v4942_v13, %v2487_v24  ;;  %v2577_v3 = vperm.slane %v6418_v42, 3 }
 0xb36   : > { %v2482_v1 = vsel %vm2481_vm2, %v2472_v43, %v2480_v33  ;;  %v2489_v19 = vmul.f32 0.5, %v2488_v23 }
 0xb37   : > { %v2485_v15 = vsel %vm2483_vm5, %v2484_v7, %v2482_v1 }
 0xb38   : > { %v2501_v53 = vadd.f32 1e-06, %v2485_v15  ;;  %v2490_v2 = vsub.f32 1.5, %v2489_v19 }
 0xb3a   : > { %4943 = vrcp.f32 %v2501_v53  ;;  %v2491_v56 = vmul.f32 %v4942_v13, %v2490_v2  ;;  %v2514_v38 = vand.u32 2147483648, %v2501_v53  ;;  %vm2508_vm0 = vweird.f32 %v2501_v53 }
 0xb3b   : > { %v2512_v18 = vand.u32 2147483647, %v2501_v53 }
 0xb3c   : > { %v2492_v49 = vmul.f32 %v2491_v56, %v2473_v40  ;;  %v2515_v50 = vor.u32 1.1754944e-38, %v2514_v38 }
 0xb3d   : > { %vm2513_vm2 = vcmp.eq.f32.partialorder %v2512_v18, 8.507059e+37 }
 0xb3e   : > { %v2494_v59 = vsel %vm2493_vm11, %v2473_v40, %v2492_v49 }
 0xb3f   : > { %v2497_v39 = vsel %vm2495_vm13, %v2496_v41, %v2494_v59 }
 0xb40   : > { %v4944_v31 = vpop.eup %4943  ;;  %v2502_v27 = vadd.f32 1e-06, %v2497_v39 }
 0xb41   : > { %v2504_v62 = vmul.f32 %v4944_v31, %v2501_v53  ;;  %vm2509_vm14 = vweird.f32 %v4944_v31 }
 0xb42   : > { %4945 = vrcp.f32 %v2502_v27  ;;  %vm2510_vm1 = vmor %vm2508_vm0, %vm2509_vm14  ;;  %v2529_v36 = vand.u32 2147483648, %v2502_v27  ;;  %v2527_v43 = vand.u32 2147483647, %v2502_v27  ;;  %vm2523_vm11 = vweird.f32 %v2502_v27 }
 0xb43   : > { %v2505_v55 = vsub.f32 1.0, %v2504_v62 }
 0xb44   : > { %v2530_v44 = vor.u32 1.1754944e-38, %v2529_v36  ;;  %vm2528_vm14 = vcmp.eq.f32.partialorder %v2527_v43, 8.507059e+37 }
 0xb45   : > { %v2506_v51 = vmul.f32 %v4944_v31, %v2505_v55 }
 0xb47   : > { %v2507_v58 = vadd.f32 %v4944_v31, %v2506_v51 }
 0xb48   : > { %v4946_v0 = vpop.eup %4945 }
 0xb49   : > { %v2519_v61 = vmul.f32 %v4946_v0, %v2502_v27  ;;  %v2511_v16 = vsel %vm2510_vm1, %v4944_v31, %v2507_v58  ;;  %vm2524_vm5 = vweird.f32 %v4946_v0 }
 0xb4a   : > { %v2516_v4 = vsel %vm2513_vm2, %v2515_v50, %v2511_v16  ;;  %vm2525_vm13 = vmor %vm2523_vm11, %vm2524_vm5 }
 0xb4b   : > { %v2520_v20 = vsub.f32 1.0, %v2519_v61  ;;  %v2517_v8 = vmul.f32 %v2516_v4, %v2499_v34 }
 0xb4d   : > { %v2521_v6 = vmul.f32 %v4946_v0, %v2520_v20  ;;  %v2534_v54 = vadd.f32 %v2533_v5, %v2517_v8 }
 0xb4f   : > { %v2522_v48 = vadd.f32 %v4946_v0, %v2521_v6 }
 0xb51   : > { %v2526_v57 = vsel %vm2525_vm13, %v4946_v0, %v2522_v48 }
 0xb52   : > { %v2531_v40 = vsel %vm2528_vm14, %v2530_v44, %v2526_v57 }
 0xb53   : > { %v2532_v32 = vmul.f32 %v2531_v40, %v2500_v45 }
 0xb55   : > { %v2535_v63 = vadd.f32 %v2533_v5, %v2532_v32 }
 0xb57   : > { %v2536_v37 = vpack.c.bf16 %v2535_v63, %v2534_v54 }
 0xb59   : > { %4586 = vmatmul.msk.bf16.vlgmr.msra.gmra.mxu2 %vm698_vm4, %v2536_v37  ;;  %4599 = vmatmul.msk.bf16.vlgmr.msrb.gmra.mxu3 %vm698_vm4, %v2536_v37 }
 0xb5a   : > { %4612 = vmatmul.msk.bf16.vlgmr.msrb.gmra.mxu0 %vm698_vm4, %v2536_v37 }
 0xbd7   : > { %v2631_v52 = vpop.f32.mrf.mxu0 }
 0xbd8   : > { %v2632_v13 = vadd.f32 %v2631_v52, %v2609_v11 }
 0xbda   : > { %v2658_v24 = vmul.f32 %v2632_v13, %v5459_v10  ;;  %v2659_v33 = vmul.f32 %v2632_v13, %v5461_v9  ;;  %v2656_v23 = vmul.f32 %v2632_v13, %v5463_v12  ;;  %v2657_v7 = vmul.f32 %v2632_v13, %v5465_v14 }
 0xbdb   : > { %v2654_v1 = vmul.f32 %v2632_v13, %v5467_v17  ;;  %v2655_v19 = vmul.f32 %v2632_v13, %v5473_v22  ;;  %v2652_v39 = vmul.f32 %v2632_v13, %v5471_v21  ;;  %v2653_v31 = vmul.f32 %v2632_v13, %v5483_v29 }
 0xbdc   : > { %v2599_v15 = vpop.f32.mrf.mxu3  ;;  %v3754_v53 = vpack.c.bf16 %v2658_v24, %v2658_v24  ;;  %v3755_v2 = vpack.c.bf16 %v2659_v33, %v2659_v33  ;;  %v3752_v56 = vpack.c.bf16 %v2656_v23, %v2656_v23  ;;  %v3753_v49 = vpack.c.bf16 %v2657_v7, %v2657_v7 }
 0xbdd   : > { %v6435_v41 = vadd.f32 %v2599_v15, %v2577_v3  ;;  %v3750_v59 = vpack.c.bf16 %v2654_v1, %v2654_v1  ;;  %v3751_v18 = vpack.c.bf16 %v2655_v19, %v2655_v19  ;;  %v3748_v36 = vpack.c.bf16 %v2652_v39, %v2652_v39 }
 0xbde   : > { %v3778_v27 = vunpack.c.l.b16 %v3754_v53  ;;  %v3779_v62 = vunpack.c.l.b16 %v3755_v2  ;;  %v3776_v55 = vunpack.c.l.b16 %v3752_v56  ;;  %v3777_v51 = vunpack.c.l.b16 %v3753_v49 }
 0xbdf   : > { %v2633_v58 = vpop.f32.mrf.mxu0  ;;  %v2642_v0 = vmul.f32 %v6435_v41, %v5459_v10  ;;  %v2643_v38 = vmul.f32 %v6435_v41, %v5461_v9  ;;  %v3774_v50 = vunpack.c.l.b16 %v3750_v59  ;;  %v3749_v34 = vpack.c.bf16 %v2653_v31, %v2653_v31 }
 0xbe0   : > { %v2634_v61 = vadd.f32 %v2633_v58, %v2609_v11  ;;  %v3783_v35 = vpack.c.b16 %v3779_v62, %v3778_v27  ;;  %v3782_v6 = vpack.c.b16 %v3777_v51, %v3776_v55  ;;  %v3775_v44 = vunpack.c.l.b16 %v3751_v18 }
 0xbe1   : > { %v2678_v16 = vpack.c.bf16 %v2642_v0, %v2642_v0  ;;  %v2679_v20 = vpack.c.bf16 %v2643_v38, %v2643_v38  ;;  %v3772_v32 = vunpack.c.l.b16 %v3748_v36  ;;  %v3773_v11 = vunpack.c.l.b16 %v3749_v34 }
 0xbe2   : > { %3795 = vmatpush.bf16.msra.mxu3 %v3783_v35  ;;  %v2666_v43 = vmul.f32 %v2634_v61, %v5459_v10  ;;  %v2667_v4 = vmul.f32 %v2634_v61, %v5461_v9  ;;  %v2664_v8 = vmul.f32 %v2634_v61, %v5463_v12  ;;  %v2665_v54 = vmul.f32 %v2634_v61, %v5465_v14 }
 0xbe3   : > { %v2702_v48 = vunpack.c.l.b16 %v2678_v16  ;;  %v2703_v45 = vunpack.c.l.b16 %v2679_v20  ;;  %v3781_v7 = vpack.c.b16 %v3775_v44, %v3774_v50  ;;  %v2640_v19 = vmul.f32 %v6435_v41, %v5463_v12 }
 0xbe4   : > { %v2601_v57 = vpop.f32.mrf.mxu3  ;;  %v3762_v5 = vpack.c.bf16 %v2666_v43, %v2666_v43  ;;  %v3763_v40 = vpack.c.bf16 %v2667_v4, %v2667_v4  ;;  %v3760_v52 = vpack.c.bf16 %v2664_v8, %v2664_v8  ;;  %v3761_v33 = vpack.c.bf16 %v2665_v54, %v2665_v54 }
 0xbe5   : > { %v6447_v63 = vadd.f32 %v2601_v57, %v2577_v3  ;;  %v2707_v37 = vpack.c.b16 %v2703_v45, %v2702_v48  ;;  %v2641_v3 = vmul.f32 %v6435_v41, %v5465_v14  ;;  %v3780_v56 = vpack.c.b16 %v3773_v11, %v3772_v32 }
 0xbe6   : > { %3796 = vmatpush.bf16.msra.mxu3 %v3782_v6  ;;  %v3818_v13 = vunpack.c.l.b16 %v3762_v5  ;;  %v3819_v24 = vunpack.c.l.b16 %v3763_v40  ;;  %v3816_v1 = vunpack.c.l.b16 %v3760_v52  ;;  %v3817_v53 = vunpack.c.l.b16 %v3761_v33 }
 0xbe7   : > { %v2721_v23 = vsel %vm698_vm4, %v2707_v37, 0  ;;  %v2650_v2 = vmul.f32 %v6447_v63, %v5459_v10  ;;  %v2676_v49 = vpack.c.bf16 %v2640_v19, %v2640_v19  ;;  %v2651_v59 = vmul.f32 %v6447_v63, %v5461_v9 }
 0xbe8   : > { %2727 = vmatpush.bf16.xpose.msrb.mxu1 %v2721_v23  ;;  %v3823_v15 = vpack.c.b16 %v3819_v24, %v3818_v13  ;;  %v2662_v39 = vmul.f32 %v2634_v61, %v5467_v17  ;;  %v3822_v31 = vpack.c.b16 %v3817_v53, %v3816_v1  ;;  %v2677_v27 = vpack.c.bf16 %v2641_v3, %v2641_v3 }
 0xbe9   : > { %v2686_v62 = vpack.c.bf16 %v2650_v2, %v2650_v2  ;;  %v2700_v55 = vunpack.c.l.b16 %v2676_v49  ;;  %v2687_v51 = vpack.c.bf16 %v2651_v59, %v2651_v59  ;;  %v2663_v58 = vmul.f32 %v2634_v61, %v5473_v22 }
 0xbea   : > { %3797 = vmatpush.bf16.msra.mxu3 %v3781_v7  ;;  %3835 = vmatpush.bf16.msra.mxu0 %v3823_v15  ;;  %v3758_v0 = vpack.c.bf16 %v2662_v39, %v2662_v39  ;;  %v2701_v38 = vunpack.c.l.b16 %v2677_v27  ;;  %v2660_v10 = vmul.f32 %v2634_v61, %v5471_v21  ;;  %v2661_v35 = vmul.f32 %v2634_v61, %v5483_v29 }
 0xbeb   : > { %v2750_v18 = vunpack.c.l.b16 %v2686_v62  ;;  %v2751_v16 = vunpack.c.l.b16 %v2687_v51  ;;  %v3759_v9 = vpack.c.bf16 %v2663_v58, %v2663_v58  ;;  %v2638_v50 = vmul.f32 %v6435_v41, %v5467_v17 }
 0xbec   : > { %v3814_v20 = vunpack.c.l.b16 %v3758_v0  ;;  %v2706_v36 = vpack.c.b16 %v2701_v38, %v2700_v55  ;;  %v3756_v6 = vpack.c.bf16 %v2660_v10, %v2660_v10  ;;  %v3757_v43 = vpack.c.bf16 %v2661_v35, %v2661_v35  ;;  %v2567_v55 = vpop.f32.mrf.mxu2 }
 0xbed   : > { %v2755_v4 = vpack.c.b16 %v2751_v16, %v2750_v18  ;;  %v3815_v34 = vunpack.c.l.b16 %v3759_v9  ;;  %v2639_v48 = vmul.f32 %v6435_v41, %v5473_v22  ;;  %v2674_v45 = vpack.c.bf16 %v2638_v50, %v2638_v50 }
 0xbee   : > { %3798 = vmatpush.bf16.msra.mxu3 %v3780_v56  ;;  %3836 = vmatpush.bf16.msra.mxu0 %v3822_v31  ;;  %v2718_v44 = vsel %vm698_vm4, %v2706_v36, 0  ;;  %v3812_v61 = vunpack.c.l.b16 %v3756_v6  ;;  %v3813_v8 = vunpack.c.l.b16 %v3757_v43  ;;  %v2648_v57 = vmul.f32 %v6447_v63, %v5463_v12 }
 0xbef   : > { %v2769_v5 = vsel %vm698_vm4, %v2755_v4, 0  ;;  %v3821_v40 = vpack.c.b16 %v3815_v34, %v3814_v20  ;;  %v2675_v32 = vpack.c.bf16 %v2639_v48, %v2639_v48  ;;  %v2698_v54 = vunpack.c.l.b16 %v2674_v45 }
 0xbf0   : > { %2728 = vmatpush.bf16.xpose.msrb.mxu1 %v2718_v44  ;;  %2775 = vmatpush.bf16.xpose.msrb.mxu2 %v2769_v5  ;;  %v2649_v37 = vmul.f32 %v6447_v63, %v5465_v14  ;;  %v2684_v11 = vpack.c.bf16 %v2648_v57, %v2648_v57  ;;  %v2636_v52 = vmul.f32 %v6435_v41, %v5471_v21 }
 0xbf1   : > { %v2699_v13 = vunpack.c.l.b16 %v2675_v32  ;;  %v2637_v24 = vmul.f32 %v6435_v41, %v5483_v29  ;;  %v2646_v12 = vmul.f32 %v6447_v63, %v5467_v17  ;;  %v2647_v33 = vmul.f32 %v6447_v63, %v5473_v22 }
 0xbf2   : > { %3837 = vmatpush.bf16.msra.mxu0 %v3821_v40  ;;  %v2685_v23 = vpack.c.bf16 %v2649_v37, %v2649_v37  ;;  %v2748_v7 = vunpack.c.l.b16 %v2684_v11  ;;  %v2672_v1 = vpack.c.bf16 %v2636_v52, %v2636_v52  ;;  %v3820_v19 = vpack.c.b16 %v3813_v8, %v3812_v61 }
 0xbf3   : > { %v2705_v14 = vpack.c.b16 %v2699_v13, %v2698_v54  ;;  %v2673_v15 = vpack.c.bf16 %v2637_v24, %v2637_v24  ;;  %v2682_v3 = vpack.c.bf16 %v2646_v12, %v2646_v12  ;;  %v2683_v2 = vpack.c.bf16 %v2647_v33, %v2647_v33 }
 0xbf4   : > { %v2749_v53 = vunpack.c.l.b16 %v2685_v23  ;;  %v2696_v41 = vunpack.c.l.b16 %v2672_v1  ;;  %v2542_v17 = vperm.slane %v6418_v42, 2  ;;  %v2644_v22 = vmul.f32 %v6447_v63, %v5471_v21  ;;  %v2569_v9 = vpop.f32.mrf.mxu2 }
 0xbf5   : > { %v2715_v56 = vsel %vm698_vm4, %v2705_v14, 0  ;;  %v2697_v59 = vunpack.c.l.b16 %v2673_v15  ;;  %v2746_v31 = vunpack.c.l.b16 %v2682_v3  ;;  %v2747_v27 = vunpack.c.l.b16 %v2683_v2 }
 0xbf6   : > { %3838 = vmatpush.bf16.msra.mxu0 %v3820_v19  ;;  %v2754_v49 = vpack.c.b16 %v2749_v53, %v2748_v7  ;;  %v2645_v62 = vmul.f32 %v6447_v63, %v5483_v29  ;;  %v2568_v58 = vadd.f32 %v2567_v55, %v2542_v17  ;;  %v2680_v38 = vpack.c.bf16 %v2644_v22, %v2644_v22 }
 0xbf7   : > { %v2704_v51 = vpack.c.b16 %v2697_v59, %v2696_v41  ;;  %v2753_v0 = vpack.c.b16 %v2747_v27, %v2746_v31  ;;  %v2570_v29 = vadd.f32 %v2569_v9, %v2542_v17 }
 0xbf8   : > { %2729 = vmatpush.bf16.xpose.msrb.mxu1 %v2715_v56  ;;  %v2766_v39 = vsel %vm698_vm4, %v2754_v49, 0  ;;  %v2681_v18 = vpack.c.bf16 %v2645_v62, %v2645_v62  ;;  %v2668_v10 = vmul.f32 0.5, %v2568_v58  ;;  %v2744_v35 = vunpack.c.l.b16 %v2680_v38 }
 0xbf9   : > { %2776 = vmatpush.bf16.xpose.msrb.mxu2 %v2766_v39  ;;  %v2712_v42 = vsel %vm698_vm4, %v2704_v51, 0  ;;  %v2763_v21 = vsel %vm698_vm4, %v2753_v0, 0  ;;  %v2669_v36 = vmul.f32 0.5, %v2570_v29 }
 0xbfa   : > { %v2745_v16 = vunpack.c.l.b16 %v2681_v18  ;;  %v2670_v20 = vpack.c.bf16 %v2668_v10, %v2668_v10 }
 0xbfb   : > { %v2671_v6 = vpack.c.bf16 %v2669_v36, %v2669_v36 }
 0xbfc   : > { %v2752_v50 = vpack.c.b16 %v2745_v16, %v2744_v35 }
 0xbfe   : > { %v2760_v63 = vsel %vm698_vm4, %v2752_v50, 0 }
 0xc00   : > { %2730 = vmatpush.bf16.xpose.msrb.mxu1 %v2712_v42 }
 0xc01   : > { %2777 = vmatpush.bf16.xpose.msrb.mxu2 %v2763_v21 }
 0xc07   : > { %4613 = vmatmul.msk.bf16.vlgmr.msrb.gmra.mxu1 %vm698_vm4, %v2670_v20 }
 0xc09   : > { %2778 = vmatpush.bf16.xpose.msrb.mxu2 %v2760_v63 }
 0xc10   : > { %4614 = vmatmul.msk.bf16.vlgmr.msrb.gmra.mxu2 %vm698_vm4, %v2671_v6 }
 0xc84   : > { %v2732_v43 = vpop.f32.mrf.mxu1 }
 0xc85   : > { %2798 = vrot.lane.b32.xlu2 %v2732_v43, %s5170_s30  ;;  %2804 = vrot.lane.b32.xlu1 %v2732_v43, %s7565_s25  ;;  %v2830_v5 = vrot.slane %v2732_v43, 4 }
 0xc86   : > { %2792 = vrot.lane.b32.xlu0 %v2732_v43, %s7566_s22 }
 0xc8c   : > { %v2734_v4 = vpop.f32.mrf.mxu1 }
 0xc8d   : > { %2822 = vrot.lane.b32.xlu2 %v2732_v43, %s7567_s21  ;;  %2786 = vrot.lane.b32.xlu1 %v2732_v43, %s7568_s29 }
 0xc8e   : > { %2816 = vrot.lane.b32.xlu0 %v2732_v43, %s7569_s1 }
 0xc93   : > { %v6498_v34 = vpop.f32.mrf.mxu2 }
 0xc94   : > { %v2942_v18 = vrot.slane %v6498_v34, 4 }
 0xc95   : > { %2800 = vrot.lane.b32.xlu2 %v6498_v34, %s5170_s30  ;;  %2794 = vrot.lane.b32.xlu1 %v6498_v34, %s7566_s22  ;;  %s7606_s30 = smov 8   ;;  %s7612_s22 = smov 56  }
 0xc96   : > { %2810 = vrot.lane.b32.xlu0 %v2732_v43, %s7570_s23 }
 0xc9b   : > { %v2782_v48 = vpop.f32.mrf.mxu2 }
 0xc9d   : > { %2812 = vrot.lane.b32.xlu2 %v6498_v34, %s7570_s23  ;;  %2818 = vrot.lane.b32.xlu1 %v6498_v34, %s7569_s1 }
 0xc9e   : > { %2806 = vrot.lane.b32.xlu0 %v6498_v34, %s7565_s25  ;;  %s7611_s25 = smov 32  }
 0xca5   : > { %2824 = vrot.lane.b32.xlu1 %v6498_v34, %s7567_s21  ;;  %s7623_s21 = sld [smem:[#allocation19_spill]] }
 0xca6   : > { %2788 = vrot.lane.b32.xlu0 %v6498_v34, %s7568_s29  ;;  %s7313_s29 = sand.u32 1, %s5152_s28  }
 0xca7   : > { %s4493_s1 = sshll.u32 %s7313_s29, 4 }
 0xca8   : > { %s7317_s23 = scalar_lea.vmem [#allocation2], %s4493_s1 }
 0xcdf   : > { %v2799_v45 = vpop.permute.xlu2 %2798 }
 0xce0   : > { %v2840_v40 = vrot.slane %v2799_v45, 4 }
 0xce7   : > { %v2823_v32 = vpop.permute.xlu2 %2822 }
 0xce8   : > { %v2864_v59 = vrot.slane %v2823_v32, 4 }
 0xcef   : > { %v6530_v31 = vpop.permute.xlu2 %2800 }
 0xcf0   : > { %v2952_v21 = vrot.slane %v6530_v31, 4 }
 0xcf7   : > { %v2805_v44 = vpop.permute.xlu1 %2804 }
 0xcf8   : > { %v2793_v61 = vpop.permute.xlu0 %2792  ;;  %v2854_v7 = vrot.slane %v2805_v44, 4 }
 0xcf9   : > { %v2828_v8 = vrot.slane %v2793_v61, 4  ;;  %v2831_v54 = vsel %vm1208_vm3, %v2793_v61, %v2830_v5 }
 0xcfa   : > { %v2839_v12 = vperm.slane %v2831_v54, %v5571_v26 }
 0xcfb   : > { %v2829_v57 = vsel %vm1208_vm3, %v2828_v8, %v2732_v43 }
 0xcfc   : > { %v2835_v37 = vperm.slane %v2829_v57, %v5571_v26  ;;  %v2890_v2 = vrot.slane %v2839_v12, 4 }
 0xcfe   : > { %v2878_v19 = vrot.slane %v2835_v37, 4 }
 0xcff   : > { %v2787_v11 = vpop.permute.xlu1 %2786 }
 0xd00   : > { %v2841_v52 = vsel %vm1208_vm3, %v2840_v40, %v2787_v11  ;;  %v2842_v13 = vrot.slane %v2787_v11, 4  ;;  %v2817_v24 = vpop.permute.xlu0 %2816 }
 0xd01   : > { %v2847_v33 = vperm.slane %v2841_v52, %v5571_v26  ;;  %v2852_v23 = vrot.slane %v2817_v24, 4  ;;  %v2855_v3 = vsel %vm1208_vm3, %v2817_v24, %v2854_v7 }
 0xd02   : > { %v2843_v1 = vsel %vm1208_vm3, %v2799_v45, %v2842_v13  ;;  %v2863_v17 = vperm.slane %v2855_v3, %v5571_v26 }
 0xd03   : > { %v2851_v14 = vperm.slane %v2843_v1, %v5571_v26  ;;  %v2876_v15 = vrot.slane %v2847_v33, 4  ;;  %v2853_v53 = vsel %vm1208_vm3, %v2852_v23, %v2805_v44  ;;  %v2879_v56 = vsel %vm1208_vm3, %v2847_v33, %v2878_v19  ;;  %v2813_v23 = vpop.permute.xlu2 %2812 }
 0xd04   : > { %v2859_v41 = vperm.slane %v2853_v53, %v5571_v26  ;;  %v2887_v27 = vperm.slane %v2879_v56, %v5593_v60  ;;  %v2914_v35 = vrot.slane %v2863_v17, 4 }
 0xd05   : > { %v2877_v49 = vsel %vm1208_vm3, %v2876_v15, %v2835_v37  ;;  %v2891_v39 = vsel %vm1208_vm3, %v2851_v14, %v2890_v2  ;;  %v2888_v55 = vrot.slane %v2851_v14, 4 }
 0xd06   : > { %v6535_v0 = vperm.slane %v2877_v49, %v5593_v60  ;;  %v2902_v38 = vrot.slane %v2859_v41, 4  ;;  %v2899_v10 = vperm.slane %v2891_v39, %v5593_v60  ;;  %v2930_v43 = vrot.slane %v2887_v27, 4 }
 0xd07   : > { %v2795_v22 = vpop.permute.xlu1 %2794  ;;  %v2889_v4 = vsel %vm1208_vm3, %v2888_v55, %v2839_v12 }
 0xd08   : > { %v2811_v62 = vpop.permute.xlu0 %2810  ;;  %v2940_v16 = vrot.slane %v2795_v22, 4  ;;  %v2943_v20 = vsel %vm1208_vm3, %v2795_v22, %v2942_v18  ;;  %v2926_v36 = vrot.slane %v6535_v0, 4  ;;  %v2938_v61 = vrot.slane %v2899_v10, 4 }
 0xd09   : > { %v2865_v51 = vsel %vm1208_vm3, %v2864_v59, %v2811_v62  ;;  %v2866_v58 = vrot.slane %v2811_v62, 4  ;;  %v6553_v57 = vperm.slane %v2943_v20, %v5571_v26  ;;  %v2895_v14 = vperm.slane %v2889_v4, %v5593_v60 }
 0xd0a   : > { %v2871_v42 = vperm.slane %v2865_v51, %v5571_v26  ;;  %v2941_v8 = vsel %vm1208_vm3, %v2940_v16, %v6498_v34 }
 0xd0b   : > { %v2867_v9 = vsel %vm1208_vm3, %v2823_v32, %v2866_v58  ;;  %v2947_v15 = vperm.slane %v2941_v8, %v5571_v26  ;;  %v3002_v55 = vrot.slane %v6553_v57, 4 }
 0xd0c   : > { %v2875_v50 = vperm.slane %v2867_v9, %v5571_v26  ;;  %v2900_v29 = vrot.slane %v2871_v42, 4  ;;  %v2903_v63 = vsel %vm1208_vm3, %v2871_v42, %v2902_v38  ;;  %v2934_v38 = vrot.slane %v2895_v14, 4 }
 0xd0d   : > { %v2911_v6 = vperm.slane %v2903_v63, %v5593_v60  ;;  %v2990_v18 = vrot.slane %v2947_v15, 4 }
 0xd0e   : > { %v2912_v48 = vrot.slane %v2875_v50, 4  ;;  %v2901_v45 = vsel %vm1208_vm3, %v2900_v29, %v2859_v41  ;;  %v2915_v44 = vsel %vm1208_vm3, %v2875_v50, %v2914_v35 }
 0xd0f   : > { %v2819_v5 = vpop.permute.xlu1 %2818  ;;  %v2907_v40 = vperm.slane %v2901_v45, %v5593_v60  ;;  %v2923_v32 = vperm.slane %v2915_v44, %v5593_v60  ;;  %v2931_v11 = vsel %vm1208_vm3, %v2911_v6, %v2930_v43  ;;  %v2928_v13 = vrot.slane %v2911_v6, 4 }
 0xd10   : > { %v2964_v54 = vrot.slane %v2819_v5, 4  ;;  %v2807_v37 = vpop.permute.xlu0 %2806  ;;  %v2913_v52 = vsel %vm1208_vm3, %v2912_v48, %v2863_v17  ;;  %v6581_v59 = vadd.f32 %v2931_v11, %v5612_v28  ;;  %v2978_v17 = vrot.slane %v2813_v23, 4 }
 0xd11   : > { %v2966_v24 = vrot.slane %v2807_v37, 4  ;;  %v2927_v12 = vsel %vm1208_vm3, %v2907_v40, %v2926_v36  ;;  %v2939_v34 = vsel %vm1208_vm3, %v2923_v32, %v2938_v61  ;;  %v2936_v33 = vrot.slane %v2923_v32, 4 }
 0xd12   : > { %v2965_v7 = vsel %vm1208_vm3, %v2964_v54, %v2807_v37  ;;  %v6563_v1 = vadd.f32 %v2927_v12, %v5612_v28  ;;  %v6566_v19 = vadd.f32 %v2939_v34, %v5612_v28  ;;  %v2919_v2 = vperm.slane %v2913_v52, %v5593_v60 }
 0xd13   : > { %v2967_v53 = vsel %vm1208_vm3, %v2819_v5, %v2966_v24  ;;  %v2937_v3 = vsel %vm1208_vm3, %v2936_v33, %v2899_v10  ;;  %v2971_v22 = vperm.slane %v2965_v7, %v5571_v26  ;;  %v2929_v62 = vsel %vm1208_vm3, %v2928_v13, %v2887_v27 }
 0xd14   : > { %v3071_v56 = vsel %vm1454_vm6, %v6563_v1, -inf  ;;  %v3089_v49 = vsel %vm1454_vm6, %v6566_v19, -inf  ;;  %v6578_v41 = vadd.f32 %v2937_v3, %v5612_v28  ;;  %v2932_v39 = vrot.slane %v2919_v2, 4 }
 0xd15   : > { %3072 = vmax.xlane.f32.xlu1 %v3071_v56  ;;  %3090 = vmax.xlane.f32.xlu0 %v3089_v49  ;;  %v2975_v51 = vperm.slane %v2967_v53, %v5571_v26  ;;  %v6591_v35 = vadd.f32 %v2929_v62, %v5612_v28  ;;  %v2924_v16 = vrot.slane %v2907_v40, 4  ;;  %v3077_v50 = vsel %vm1454_vm6, %v6581_v59, -inf  ;;  %v7571_v62 = vld [vmem:[#allocation16_spill] sm:$0xff] }
 0xd16   : > { %v3086_v58 = vsel %vm1454_vm6, %v6578_v41, -inf  ;;  %v2933_v10 = vsel %vm1208_vm3, %v2932_v39, %v2895_v14  ;;  %v3014_v63 = vrot.slane %v2971_v22, 4  ;;  %v2935_v44 = vsel %vm1208_vm3, %v2919_v2, %v2934_v38 }
 0xd17   : > { %3087 = vmax.xlane.f32.xlu2 %v3086_v58  ;;  %v2825_v42 = vpop.permute.xlu1 %2824  ;;  %v6597_v29 = vadd.f32 %v2933_v10, %v5612_v28  ;;  %v3026_v4 = vrot.slane %v2975_v51, 4  ;;  %v3074_v5 = vsel %vm1454_vm6, %v6591_v35, -inf  ;;  %v2925_v40 = vsel %vm1208_vm3, %v2924_v16, %v6535_v0 }
 0xd18   : > { %v2976_v9 = vrot.slane %v2825_v42, 4  ;;  %v2979_v27 = vsel %vm1208_vm3, %v2825_v42, %v2978_v17  ;;  %v2789_v20 = vpop.permute.xlu0 %2788  ;;  %v6627_v3 = vadd.f32 %v2925_v40, %v5612_v28 }
 0xd19   : > { %v2987_v36 = vperm.slane %v2979_v27, %v5571_v26  ;;  %v2953_v6 = vsel %vm1208_vm3, %v2952_v21, %v2789_v20  ;;  %v2954_v43 = vrot.slane %v2789_v20, 4  ;;  %v3080_v37 = vsel %vm1454_vm6, %v6597_v29, -inf }
 0xd1a   : > { %v2977_v48 = vsel %vm1208_vm3, %v2976_v9, %v2813_v23  ;;  %v2959_v45 = vperm.slane %v2953_v6, %v5571_v26  ;;  %v3068_v38 = vsel %vm1454_vm6, %v6627_v3, -inf }
 0xd1b   : > { %v2983_v61 = vperm.slane %v2977_v48, %v5571_v26  ;;  %v2955_v8 = vsel %vm1208_vm3, %v6530_v31, %v2954_v43  ;;  %v3024_v52 = vrot.slane %v2987_v36, 4  ;;  %v3027_v53 = vsel %vm1208_vm3, %v2987_v36, %v3026_v4 }
 0xd1c   : > { %v2963_v21 = vperm.slane %v2955_v8, %v5571_v26  ;;  %v2988_v32 = vrot.slane %v2959_v45, 4  ;;  %v2991_v54 = vsel %vm1208_vm3, %v2959_v45, %v2990_v18  ;;  %v3035_v42 = vperm.slane %v3027_v53, %v5593_v60 }
 0xd1d   : > { %v3012_v11 = vrot.slane %v2983_v61, 4  ;;  %v2999_v13 = vperm.slane %v2991_v54, %v5593_v60  ;;  %3078 = vmax.xlane.f32.xlu0 %v3077_v50  ;;  %3081 = vmax.xlane.f32.xlu1 %v3080_v37  ;;  %v3015_v31 = vsel %vm1208_vm3, %v2983_v61, %v3014_v63  ;;  %v3025_v39 = vsel %vm1208_vm3, %v3024_v52, %v2975_v51 }
 0xd1e   : > { %v2989_v24 = vsel %vm1208_vm3, %v2988_v32, %v2947_v15  ;;  %v3000_v12 = vrot.slane %v2963_v21, 4  ;;  %v3023_v0 = vperm.slane %v3015_v31, %v5593_v60  ;;  %v3003_v34 = vsel %vm1208_vm3, %v2963_v21, %v3002_v55 }
 0xd1f   : > { %3075 = vmax.xlane.f32.xlu2 %v3074_v5  ;;  %v3042_v33 = vrot.slane %v2999_v13, 4  ;;  %v2995_v23 = vperm.slane %v2989_v24, %v5593_v60  ;;  %v3013_v7 = vsel %vm1208_vm3, %v3012_v11, %v2971_v22  ;;  %v3011_v14 = vperm.slane %v3003_v34, %v5593_v60 }
 0xd20   : > { %v3019_v15 = vperm.slane %v3013_v7, %v5593_v60  ;;  %v3040_v49 = vrot.slane %v3023_v0, 4  ;;  %v3001_v17 = vsel %vm1208_vm3, %v3000_v12, %v6553_v57  ;;  %v6638_v55 = vadd.f32 %v2935_v44, %v5612_v28 }
 0xd21   : > { %v3043_v2 = vsel %vm1208_vm3, %v3023_v0, %v3042_v33  ;;  %v3038_v56 = vrot.slane %v2995_v23, 4  ;;  %v3050_v58 = vrot.slane %v3011_v14, 4  ;;  %v3007_v10 = vperm.slane %v3001_v17, %v5593_v60 }
 0xd22   : > { %v6635_v22 = vadd.f32 %v3043_v2, %v7571_v62  ;;  %v3041_v51 = vsel %vm1208_vm3, %v3040_v49, %v2999_v13  ;;  %v3031_v28 = vperm.slane %v3025_v39, %v5593_v60  ;;  %v3083_v16 = vsel %vm1454_vm6, %v6638_v55, -inf }
 0xd23   : > { %v3039_v57 = vsel %vm1208_vm3, %v3019_v15, %v3038_v56  ;;  %v3051_v9 = vsel %vm1208_vm3, %v3035_v42, %v3050_v58  ;;  %v6656_v20 = vadd.f32 %v3041_v51, %v7571_v62  ;;  %v3046_v63 = vrot.slane %v3007_v10, 4 }
 0xd24   : > { %v3101_v18 = vsel %vm1454_vm6, %v6635_v22, -inf  ;;  %v6653_v27 = vadd.f32 %v3039_v57, %v7571_v62  ;;  %v3044_v50 = vrot.slane %v3031_v28, 4  ;;  %v6659_v36 = vadd.f32 %v3051_v9, %v7571_v62 }
 0xd25   : > { %3069 = vmax.xlane.f32.xlu0 %v3068_v38  ;;  %3102 = vmax.xlane.f32.xlu1 %v3101_v18  ;;  %v3048_v6 = vrot.slane %v3035_v42, 4  ;;  %v3098_v4 = vsel %vm1454_vm6, %v6656_v20, -inf  ;;  %v3047_v45 = vsel %vm1208_vm3, %v3031_v28, %v3046_v63  ;;  %v3036_v21 = vrot.slane %v3019_v15, 4 }
 0xd26   : > { %v3095_v43 = vsel %vm1454_vm6, %v6653_v27, -inf  ;;  %v3045_v48 = vsel %vm1208_vm3, %v3044_v50, %v3007_v10  ;;  %v3113_v44 = vsel %vm1454_vm6, %v6659_v36, -inf  ;;  %v6674_v5 = vadd.f32 %v3047_v45, %v7571_v62 }
 0xd27   : > { %3084 = vmax.xlane.f32.xlu2 %v3083_v16  ;;  %v3049_v61 = vsel %vm1208_vm3, %v3048_v6, %v3011_v14  ;;  %v6671_v8 = vadd.f32 %v3045_v48, %v7571_v62  ;;  %v3037_v11 = vsel %vm1208_vm3, %v3036_v21, %v2995_v23 }
 0xd28   : > { %v6677_v40 = vadd.f32 %v3049_v61, %v7571_v62  ;;  %v3107_v54 = vsel %vm1454_vm6, %v6674_v5, -inf  ;;  %v6687_v52 = vadd.f32 %v3037_v11, %v7571_v62 }
 0xd29   : > { %v3104_v32 = vsel %vm1454_vm6, %v6671_v8, -inf }
 0xd2a   : > { %v3110_v37 = vsel %vm1454_vm6, %v6677_v40, -inf  ;;  %v3092_v13 = vsel %vm1454_vm6, %v6687_v52, -inf }
 0xd2d   : > { %3096 = vmax.xlane.f32.xlu0 %v3095_v43  ;;  %3099 = vmax.xlane.f32.xlu1 %v3098_v4 }
 0xd2f   : > { %3114 = vmax.xlane.f32.xlu2 %v3113_v44 }
 0xd35   : > { %3105 = vmax.xlane.f32.xlu0 %v3104_v32  ;;  %3108 = vmax.xlane.f32.xlu1 %v3107_v54 }
 0xd37   : > { %3111 = vmax.xlane.f32.xlu2 %v3110_v37 }
 0xd3f   : > { %3093 = vmax.xlane.f32.xlu2 %v3092_v13 }
 0xd88   : > { %v3073_v31 = vpop.xlane.xlu1 %3072  ;;  %v3091_v24 = vpop.xlane.xlu0 %3090 }
 0xd89   : > { %v3117_v12 = vsub.f32 %v6563_v1, %v3073_v31  ;;  %v3123_v0 = vsub.f32 %v6566_v19, %v3091_v24 }
 0xd8a   : > { %v3088_v34 = vpop.xlane.xlu2 %3087 }
 0xd8b   : > { %v3134_v33 = vmul.f32 1.442695, %v3117_v12  ;;  %v3146_v7 = vmul.f32 1.442695, %v3123_v0  ;;  %v3122_v14 = vsub.f32 %v6578_v41, %v3088_v34 }
 0xd8d   : > { %4947 = vpow2.f32 %v3134_v33  ;;  %v3144_v23 = vmul.f32 1.442695, %v3122_v14 }
 0xd8e   : > { %4949 = vpow2.f32 %v3146_v7 }
 0xd8f   : > { %4951 = vpow2.f32 %v3144_v23 }
 0xd90   : > { %v3079_v53 = vpop.xlane.xlu0 %3078  ;;  %v3082_v15 = vpop.xlane.xlu1 %3081 }
 0xd91   : > { %v3119_v2 = vsub.f32 %v6581_v59, %v3079_v53  ;;  %v3120_v56 = vsub.f32 %v6597_v29, %v3082_v15 }
 0xd92   : > { %v3076_v49 = vpop.xlane.xlu2 %3075 }
 0xd93   : > { %v6696_v17 = vpop.eup %4947  ;;  %v3138_v1 = vmul.f32 1.442695, %v3119_v2  ;;  %v3140_v39 = vmul.f32 1.442695, %v3120_v56  ;;  %v3118_v19 = vsub.f32 %v6591_v35, %v3076_v49 }
 0xd94   : > { %v6699_v62 = vpop.eup %4949  ;;  %v3167_v41 = vsel %vm1454_vm6, %v6696_v17, 0.0 }
 0xd95   : > { %4953 = vpow2.f32 %v3138_v1  ;;  %3168 = vadd.xlane.f32.xlu2 %v3167_v41  ;;  %v3185_v59 = vsel %vm1454_vm6, %v6699_v62, 0.0  ;;  %v3136_v29 = vmul.f32 1.442695, %v3118_v19  ;;  %v6707_v42 = vpop.eup %4951 }
 0xd96   : > { %4955 = vpow2.f32 %v3140_v39  ;;  %3186 = vadd.xlane.f32.xlu1 %v3185_v59 }
 0xd97   : > { %4957 = vpow2.f32 %v3136_v29 }
 0xd98   : > { %v3070_v58 = vpop.xlane.xlu0 %3069  ;;  %v3103_v38 = vpop.xlane.xlu1 %3102 }
 0xd99   : > { %v3116_v18 = vsub.f32 %v6627_v3, %v3070_v58  ;;  %v3127_v35 = vsub.f32 %v6635_v22, %v3103_v38  ;;  %v3182_v3 = vsel %vm1454_vm6, %v6707_v42, 0.0 }
 0xd9a   : > { %v3085_v10 = vpop.xlane.xlu2 %3084 }
 0xd9b   : > { %v6709_v57 = vpop.eup %4953  ;;  %v3132_v51 = vmul.f32 1.442695, %v3116_v18  ;;  %v3154_v28 = vmul.f32 1.442695, %v3127_v35  ;;  %v3121_v16 = vsub.f32 %v6638_v55, %v3085_v10 }
 0xd9c   : > { %v6712_v9 = vpop.eup %4955  ;;  %v3173_v50 = vsel %vm1454_vm6, %v6709_v57, 0.0 }
 0xd9d   : > { %4959 = vpow2.f32 %v3132_v51  ;;  %3174 = vadd.xlane.f32.xlu0 %v3173_v50  ;;  %v3176_v22 = vsel %vm1454_vm6, %v6712_v9, 0.0  ;;  %v3142_v63 = vmul.f32 1.442695, %v3121_v16  ;;  %v6720_v55 = vpop.eup %4957 }
 0xd9e   : > { %4961 = vpow2.f32 %v3154_v28  ;;  %3183 = vadd.xlane.f32.xlu1 %v3182_v3  ;;  %3177 = vadd.xlane.f32.xlu2 %v3176_v22  ;;  %v3170_v37 = vsel %vm1454_vm6, %v6720_v55, 0.0 }
 0xd9f   : > { %4963 = vpow2.f32 %v3142_v63 }
 0xda0   : > { %v3097_v6 = vpop.xlane.xlu0 %3096  ;;  %v3100_v43 = vpop.xlane.xlu1 %3099 }
 0xda1   : > { %v3125_v4 = vsub.f32 %v6653_v27, %v3097_v6  ;;  %v3126_v48 = vsub.f32 %v6656_v20, %v3100_v43 }
 0xda2   : > { %v3115_v45 = vpop.xlane.xlu2 %3114 }
 0xda3   : > { %v6724_v44 = vpop.eup %4959  ;;  %v3150_v61 = vmul.f32 1.442695, %v3125_v4  ;;  %v3152_v21 = vmul.f32 1.442695, %v3126_v48  ;;  %v3131_v32 = vsub.f32 %v6659_v36, %v3115_v45 }
 0xda4   : > { %v6727_v54 = vpop.eup %4961  ;;  %v3164_v11 = vsel %vm1454_vm6, %v6724_v44, 0.0 }
 0xda5   : > { %4965 = vpow2.f32 %v3150_v61  ;;  %3171 = vadd.xlane.f32.xlu0 %v3170_v37  ;;  %v3197_v27 = vsel %vm1454_vm6, %v6727_v54, 0.0  ;;  %v3162_v20 = vmul.f32 1.442695, %v3131_v32  ;;  %v6735_v36 = vpop.eup %4963 }
 0xda6   : > { %4967 = vpow2.f32 %v3152_v21  ;;  %3165 = vadd.xlane.f32.xlu1 %v3164_v11  ;;  %3198 = vadd.xlane.f32.xlu2 %v3197_v27  ;;  %v3179_v53 = vsel %vm1454_vm6, %v6735_v36, 0.0 }
 0xda7   : > { %4969 = vpow2.f32 %v3162_v20 }
 0xda8   : > { %v3106_v13 = vpop.xlane.xlu0 %3105  ;;  %v3109_v31 = vpop.xlane.xlu1 %3108 }
 0xda9   : > { %v3128_v24 = vsub.f32 %v6671_v8, %v3106_v13  ;;  %v3129_v12 = vsub.f32 %v6674_v5, %v3109_v31 }
 0xdaa   : > { %v3112_v0 = vpop.xlane.xlu2 %3111 }
 0xdab   : > { %v6739_v34 = vpop.eup %4965  ;;  %v3156_v33 = vmul.f32 1.442695, %v3128_v24  ;;  %v3158_v7 = vmul.f32 1.442695, %v3129_v12  ;;  %v3130_v14 = vsub.f32 %v6677_v40, %v3112_v0 }
 0xdac   : > { %v6742_v23 = vpop.eup %4967  ;;  %v3191_v15 = vsel %vm1454_vm6, %v6739_v34, 0.0 }
 0xdad   : > { %4971 = vpow2.f32 %v3156_v33  ;;  %3180 = vadd.xlane.f32.xlu0 %v3179_v53  ;;  %v3194_v8 = vsel %vm1454_vm6, %v6742_v23, 0.0  ;;  %v3160_v5 = vmul.f32 1.442695, %v3130_v14  ;;  %v6750_v2 = vpop.eup %4969 }
 0xdae   : > { %4973 = vpow2.f32 %v3158_v7  ;;  %3192 = vadd.xlane.f32.xlu1 %v3191_v15  ;;  %3195 = vadd.xlane.f32.xlu2 %v3194_v8  ;;  %v3209_v39 = vsel %vm1454_vm6, %v6750_v2, 0.0 }
 0xdaf   : > { %4975 = vpow2.f32 %v3160_v5 }
 0xdb2   : > { %v3094_v40 = vpop.xlane.xlu2 %3093 }
 0xdb3   : > { %v6752_v56 = vpop.eup %4971  ;;  %v3124_v49 = vsub.f32 %v6687_v52, %v3094_v40 }
 0xdb4   : > { %v6755_v1 = vpop.eup %4973  ;;  %v3200_v19 = vsel %vm1454_vm6, %v6752_v56, 0.0 }
 0xdb5   : > { %3210 = vadd.xlane.f32.xlu0 %v3209_v39  ;;  %v3203_v41 = vsel %vm1454_vm6, %v6755_v1, 0.0  ;;  %v3148_v59 = vmul.f32 1.442695, %v3124_v49  ;;  %v6763_v29 = vpop.eup %4975 }
 0xdb6   : > { %3201 = vadd.xlane.f32.xlu1 %v3200_v19  ;;  %3204 = vadd.xlane.f32.xlu2 %v3203_v41  ;;  %v3206_v52 = vsel %vm1454_vm6, %v6763_v29, 0.0 }
 0xdb7   : > { %4977 = vpow2.f32 %v3148_v59 }
 0xdbd   : > { %3207 = vadd.xlane.f32.xlu0 %v3206_v52  ;;  %v6767_v58 = vpop.eup %4977 }
 0xdbe   : > { %v3188_v38 = vsel %vm1454_vm6, %v6767_v58, 0.0 }
 0xdc5   : > { %3189 = vadd.xlane.f32.xlu0 %v3188_v38 }
 0xe08   : > { %v3169_v18 = vpop.xlane.xlu2 %3168 }
 0xe09   : > { %4979 = vrcp.f32 %v3169_v18  ;;  %v3187_v35 = vpop.xlane.xlu1 %3186  ;;  %v3236_v50 = vand.u32 2147483647, %v3169_v18  ;;  %vm3232_vm0 = vweird.f32 %v3169_v18  ;;  %v3238_v43 = vand.u32 2147483648, %v3169_v18 }
 0xe0a   : > { %4981 = vrcp.f32 %v3187_v35  ;;  %vm3322_vm1 = vweird.f32 %v3187_v35  ;;  %v3326_v48 = vand.u32 2147483647, %v3187_v35  ;;  %v3328_v45 = vand.u32 2147483648, %v3187_v35 }
 0xe0b   : > { %vm6781_vm5 = vcmp.eq.f32.partialorder %v3236_v50, 8.507059e+37  ;;  %v3239_v20 = vor.u32 1.1754944e-38, %v3238_v43 }
 0xe0c   : > { %vm6793_vm14 = vcmp.eq.f32.partialorder %v3326_v48, 8.507059e+37  ;;  %v3329_v7 = vor.u32 1.1754944e-38, %v3328_v45 }
 0xe0f   : > { %v4980_v10 = vpop.eup %4979 }
 0xe10   : > { %v4982_v51 = vpop.eup %4981  ;;  %v3228_v28 = vmul.f32 %v4980_v10, %v3169_v18  ;;  %v6771_v16 = vpop.xlane.xlu0 %3174  ;;  %vm3233_vm2 = vweird.f32 %v4980_v10 }
 0xe11   : > { %v3318_v3 = vmul.f32 %v4982_v51, %v3187_v35  ;;  %4983 = vrcp.f32 %v6771_v16  ;;  %v6774_v22 = vpop.xlane.xlu2 %3177  ;;  %v6776_v63 = vpop.xlane.xlu1 %3183  ;;  %v3266_v21 = vand.u32 2147483647, %v6771_v16  ;;  %vm3323_vm11 = vweird.f32 %v4982_v51  ;;  %vm6789_vm13 = vmor %vm3232_vm0, %vm3233_vm2 }
 0xe12   : > { %v3229_v6 = vsub.f32 1.0, %v3228_v28  ;;  %4985 = vrcp.f32 %v6774_v22  ;;  %v3268_v11 = vand.u32 2147483648, %v6771_v16  ;;  %v3281_v13 = vand.u32 2147483647, %v6774_v22  ;;  %vm6801_vm9 = vmor %vm3322_vm1, %vm3323_vm11 }
 0xe13   : > { %v3319_v4 = vsub.f32 1.0, %v3318_v3  ;;  %4987 = vrcp.f32 %v6776_v63  ;;  %v3283_v31 = vand.u32 2147483648, %v6774_v22  ;;  %vm3262_vm10 = vweird.f32 %v6771_v16 }
 0xe14   : > { %v3230_v61 = vmul.f32 %v4980_v10, %v3229_v6  ;;  %vm6806_vm0 = vcmp.eq.f32.partialorder %v3266_v21, 8.507059e+37  ;;  %vm3277_vm2 = vweird.f32 %v6774_v22  ;;  %v3269_v39 = vor.u32 1.1754944e-38, %v3268_v11 }
 0xe15   : > { %v3320_v37 = vmul.f32 %v4982_v51, %v3319_v4  ;;  %v3311_v41 = vand.u32 2147483647, %v6776_v63  ;;  %vm6817_vm1 = vcmp.eq.f32.partialorder %v3281_v13, 8.507059e+37  ;;  %v3284_v18 = vor.u32 1.1754944e-38, %v3283_v31 }
 0xe16   : > { %v3231_v27 = vadd.f32 %v4980_v10, %v3230_v61  ;;  %v3313_v35 = vand.u32 2147483648, %v6776_v63 }
 0xe17   : > { %v4984_v24 = vpop.eup %4983  ;;  %v3321_v0 = vadd.f32 %v4982_v51, %v3320_v37  ;;  %vm6831_vm15 = vcmp.eq.f32.partialorder %v3311_v41, 8.507059e+37 }
 0xe18   : > { %v4986_v14 = vpop.eup %4985  ;;  %v3235_v53 = vsel %vm6789_vm13, %v4980_v10, %v3231_v27  ;;  %v3258_v8 = vmul.f32 %v4984_v24, %v6771_v16  ;;  %v6811_v40 = vpop.xlane.xlu0 %3171  ;;  %vm3263_vm11 = vweird.f32 %v4984_v24  ;;  %v3314_v32 = vor.u32 1.1754944e-38, %v3313_v35 }
 0xe19   : > { %v3325_v49 = vsel %vm6801_vm9, %v4982_v51, %v3321_v0  ;;  %v3273_v19 = vmul.f32 %v4986_v14, %v6774_v22  ;;  %v4988_v59 = vpop.eup %4987  ;;  %v3240_v10 = vsel %vm6781_vm5, %v3239_v20, %v3235_v53  ;;  %vm3307_vm9 = vweird.f32 %v6776_v63  ;;  %v6826_v50 = vpop.xlane.xlu2 %3198  ;;  %vm3264_vm5 = vmor %vm3262_vm10, %vm3263_vm11 }
 0xe1a   : > { %v3259_v52 = vsub.f32 1.0, %v3258_v8  ;;  %v3303_v51 = vmul.f32 %v4988_v59, %v6776_v63  ;;  %v3330_v3 = vsel %vm6793_vm14, %v3329_v7, %v3325_v49  ;;  %4989 = vrcp.f32 %v6811_v40  ;;  %v6835_v45 = vpop.xlane.xlu1 %3165 }
 0xe1b   : > { %v3274_v28 = vsub.f32 1.0, %v3273_v19  ;;  %vm3278_vm13 = vweird.f32 %v4986_v14  ;;  %v6838_v61 = vmul.f32 %v6696_v17, %v3240_v10  ;;  %4991 = vrcp.f32 %v6826_v50 }
 0xe1c   : > { %v3260_v6 = vmul.f32 %v4984_v24, %v3259_v52  ;;  %v3304_v4 = vsub.f32 1.0, %v3303_v51  ;;  %v6842_v37 = vmul.f32 %v6699_v62, %v3330_v3  ;;  %vm3308_vm14 = vweird.f32 %v4988_v59  ;;  %vm3279_vm12 = vmor %vm3277_vm2, %vm3278_vm13 }
 0xe1d   : > { %v3275_v43 = vmul.f32 %v4986_v14, %v3274_v28  ;;  %v3251_v17 = vand.u32 2147483647, %v6811_v40  ;;  %v3253_v13 = vand.u32 2147483648, %v6811_v40  ;;  %4993 = vrcp.f32 %v6835_v45  ;;  %vm3309_vm10 = vmor %vm3307_vm9, %vm3308_vm14 }
 0xe1e   : > { %v3261_v21 = vadd.f32 %v4984_v24, %v3260_v6  ;;  %v3305_v27 = vmul.f32 %v4988_v59, %v3304_v4  ;;  %v3386_v0 = vand.u32 2147483647, %v6826_v50  ;;  %vm3247_vm2 = vweird.f32 %v6811_v40 }
 0xe1f   : > { %v3276_v11 = vadd.f32 %v4986_v14, %v3275_v43  ;;  %v3388_v7 = vand.u32 2147483648, %v6826_v50  ;;  %v3488_v53 = vrot.slane %v6842_v37, 4  ;;  %v3254_v41 = vor.u32 1.1754944e-38, %v3253_v13 }
 0xe20   : > { %v3265_v20 = vsel %vm3264_vm5, %v4984_v24, %v3261_v21  ;;  %v6851_v31 = vpop.xlane.xlu0 %3180  ;;  %v3306_v12 = vadd.f32 %v4988_v59, %v3305_v27  ;;  %v4990_v33 = vpop.eup %4989  ;;  %v3466_v24 = vrot.slane %v6838_v61, 4  ;;  %vm3217_vm9 = vweird.f32 %v6835_v45 }
 0xe21   : > { %v3270_v62 = vsel %vm6806_vm0, %v3269_v39, %v3265_v20  ;;  %v3280_v16 = vsel %vm3279_vm12, %v4986_v14, %v3276_v11  ;;  %v3243_v14 = vmul.f32 %v4990_v33, %v6811_v40  ;;  %vm3382_vm12 = vweird.f32 %v6826_v50  ;;  %v4992_v8 = vpop.eup %4991  ;;  %v6889_v51 = vpop.xlane.xlu2 %3195 }
 0xe22   : > { %v3285_v22 = vsel %vm6817_vm1, %v3284_v18, %v3280_v16  ;;  %v3310_v15 = vsel %vm3309_vm10, %v4988_v59, %v3306_v12  ;;  %v6867_v5 = vmul.f32 %v6709_v57, %v3270_v62  ;;  %vm6874_vm0 = vcmp.eq.f32.partialorder %v3251_v17, 8.507059e+37  ;;  %v6895_v21 = vpop.xlane.xlu1 %3192 }
 0xe23   : > { %v6870_v49 = vmul.f32 %v6712_v9, %v3285_v22  ;;  %v3315_v63 = vsel %vm6831_vm15, %v3314_v32, %v3310_v15  ;;  %v3244_v19 = vsub.f32 1.0, %v3243_v14  ;;  %v3378_v59 = vmul.f32 %v4992_v8, %v6826_v50  ;;  %v4994_v57 = vpop.eup %4993 }
 0xe24   : > { %vm6879_vm1 = vcmp.eq.f32.partialorder %v3386_v0, 8.507059e+37  ;;  %v6884_v38 = vmul.f32 %v6707_v42, %v3315_v63  ;;  %v3389_v9 = vor.u32 1.1754944e-38, %v3388_v7  ;;  %v3221_v18 = vand.u32 2147483647, %v6835_v45 }
 0xe25   : > { %4995 = vrcp.f32 %v6851_v31  ;;  %v3245_v35 = vmul.f32 %v4990_v33, %v3244_v19  ;;  %vm3248_vm15 = vweird.f32 %v4990_v33  ;;  %v3379_v10 = vsub.f32 1.0, %v3378_v59 }
 0xe26   : > { %v3213_v28 = vmul.f32 %v4994_v57, %v6835_v45  ;;  %v3464_v3 = vrot.slane %v6867_v5, 4  ;;  %v3478_v6 = vrot.slane %v6870_v49, 4  ;;  %v3223_v42 = vand.u32 2147483648, %v6835_v45  ;;  %vm3249_vm13 = vmor %vm3247_vm2, %vm3248_vm15 }
 0xe27   : > { %v3246_v43 = vadd.f32 %v4990_v33, %v3245_v35  ;;  %v3380_v4 = vmul.f32 %v4992_v8, %v3379_v10  ;;  %vm3383_vm11 = vweird.f32 %v4992_v8  ;;  %v3476_v32 = vrot.slane %v6884_v38, 4 }
 0xe28   : > { %v3214_v48 = vsub.f32 1.0, %v3213_v28  ;;  %vm6900_vm5 = vcmp.eq.f32.partialorder %v3221_v18, 8.507059e+37  ;;  %v3296_v27 = vand.u32 2147483647, %v6851_v31  ;;  %4997 = vrcp.f32 %v6889_v51  ;;  %v6906_v20 = vpop.xlane.xlu0 %3210  ;;  %vm3384_vm10 = vmor %vm3382_vm12, %vm3383_vm11 }
 0xe29   : > { %v3250_v17 = vsel %vm3249_vm13, %v4990_v33, %v3246_v43  ;;  %v3381_v13 = vadd.f32 %v4992_v8, %v3380_v4  ;;  %vm3218_vm14 = vweird.f32 %v4994_v57  ;;  %v3224_v40 = vor.u32 1.1754944e-38, %v3223_v42  ;;  %v6949_v28 = vpop.xlane.xlu2 %3204 }
 0xe2a   : > { %v3215_v62 = vmul.f32 %v4994_v57, %v3214_v48  ;;  %v3255_v12 = vsel %vm6874_vm0, %v3254_v41, %v3250_v17  ;;  %v3298_v0 = vand.u32 2147483648, %v6851_v31  ;;  %4999 = vrcp.f32 %v6895_v21  ;;  %vm3219_vm12 = vmor %vm3217_vm9, %vm3218_vm14 }
 0xe2b   : > { %v4996_v16 = vpop.eup %4995  ;;  %v3385_v22 = vsel %vm3384_vm10, %v4992_v8, %v3381_v13  ;;  %vm3292_vm2 = vweird.f32 %v6851_v31  ;;  %v6919_v15 = vsel %vm1208_vm3, %v3476_v32, %v6870_v49  ;;  %vm6925_vm0 = vcmp.eq.f32.partialorder %v3296_v27, 8.507059e+37 }
 0xe2c   : > { %v3216_v7 = vadd.f32 %v4994_v57, %v3215_v62  ;;  %v3288_v33 = vmul.f32 %v4996_v16, %v6851_v31  ;;  %v3390_v14 = vsel %vm6879_vm1, %v3389_v9, %v3385_v22  ;;  %v3371_v8 = vand.u32 2147483647, %v6889_v51 }
 0xe2d   : > { %v6931_v63 = vmul.f32 %v6720_v55, %v3255_v12  ;;  %v3373_v41 = vand.u32 2147483648, %v6889_v51  ;;  %v6935_v52 = vmul.f32 %v6727_v54, %v3390_v14  ;;  %vm3293_vm1 = vweird.f32 %v4996_v16 }
 0xe2e   : > { %v3220_v39 = vsel %vm3219_vm12, %v4994_v57, %v3216_v7  ;;  %v3289_v19 = vsub.f32 1.0, %v3288_v33  ;;  %v4998_v59 = vpop.eup %4997  ;;  %v3299_v45 = vor.u32 1.1754944e-38, %v3298_v0  ;;  %5001 = vrcp.f32 %v6906_v20  ;;  %vm3294_vm13 = vmor %vm3292_vm2, %vm3293_vm1 }
 0xe2f   : > { %v3225_v9 = vsel %vm6900_vm5, %v3224_v40, %v3220_v39  ;;  %v3363_v35 = vmul.f32 %v4998_v59, %v6889_v51  ;;  %v3356_v55 = vand.u32 2147483647, %v6895_v21  ;;  %vm3367_vm15 = vweird.f32 %v6889_v51  ;;  %v6967_v40 = vpop.xlane.xlu1 %3201 }
 0xe30   : > { %v3290_v18 = vmul.f32 %v4996_v16, %v3289_v19  ;;  %v5000_v57 = vpop.eup %4999  ;;  %vm6943_vm9 = vcmp.eq.f32.partialorder %v3371_v8, 8.507059e+37  ;;  %vm3352_vm11 = vweird.f32 %v6895_v21  ;;  %v3358_v54 = vand.u32 2147483648, %v6895_v21  ;;  %v6960_v17 = vpop.xlane.xlu0 %3207 }
 0xe31   : > { %v3452_v42 = vrot.slane %v6931_v63, 4  ;;  %v3364_v4 = vsub.f32 1.0, %v3363_v35  ;;  %v3374_v48 = vor.u32 1.1754944e-38, %v3373_v41  ;;  %v3576_v32 = vrot.slane %v6935_v52, 4 }
 0xe32   : > { %v3291_v43 = vadd.f32 %v4996_v16, %v3290_v18  ;;  %v6954_v11 = vmul.f32 %v6724_v44, %v3225_v9  ;;  %vm3368_vm5 = vweird.f32 %v4998_v59  ;;  %v3348_v27 = vmul.f32 %v5000_v57, %v6895_v21 }
 0xe33   : > { %v3365_v62 = vmul.f32 %v4998_v59, %v3364_v4  ;;  %vm6962_vm14 = vcmp.eq.f32.partialorder %v3356_v55, 8.507059e+37  ;;  %5003 = vrcp.f32 %v6949_v28  ;;  %v3359_v22 = vor.u32 1.1754944e-38, %v3358_v54  ;;  %vm3369_vm2 = vmor %vm3367_vm15, %vm3368_vm5 }
 0xe34   : > { %v3295_v13 = vsel %vm3294_vm13, %v4996_v16, %v3291_v43  ;;  %v5002_v44 = vpop.eup %5001  ;;  %v3349_v0 = vsub.f32 1.0, %v3348_v27  ;;  %v3446_v7 = vand.u32 2147483647, %v6906_v20  ;;  %vm3442_vm10 = vweird.f32 %v6906_v20 }
 0xe35   : > { %v3300_v31 = vsel %vm6925_vm0, %v3299_v45, %v3295_v13  ;;  %v3366_v33 = vadd.f32 %v4998_v59, %v3365_v62  ;;  %v3438_v16 = vmul.f32 %v5002_v44, %v6906_v20  ;;  %v3448_v14 = vand.u32 2147483648, %v6906_v20 }
 0xe36   : > { %v6976_v8 = vmul.f32 %v6735_v36, %v3300_v31  ;;  %v3350_v50 = vmul.f32 %v5000_v57, %v3349_v0  ;;  %vm3353_vm12 = vweird.f32 %v5000_v57  ;;  %5005 = vrcp.f32 %v6967_v40 }
 0xe37   : > { %v3453_v39 = vsel %vm1208_vm3, %v3452_v42, %v6954_v11  ;;  %v3370_v19 = vsel %vm3369_vm2, %v4998_v59, %v3366_v33  ;;  %v3439_v41 = vsub.f32 1.0, %v3438_v16  ;;  %v3416_v45 = vand.u32 2147483647, %v6949_v28  ;;  %vm3354_vm15 = vmor %vm3352_vm11, %vm3353_vm12 }
 0xe38   : > { %v3454_v9 = vrot.slane %v6954_v11, 4  ;;  %v3351_v18 = vadd.f32 %v5000_v57, %v3350_v50  ;;  %vm6986_vm0 = vcmp.eq.f32.partialorder %v3446_v7, 8.507059e+37  ;;  %vm3412_vm1 = vweird.f32 %v6949_v28  ;;  %v7015_v31 = vpop.xlane.xlu0 %3189 }
 0xe39   : > { %v5004_v51 = vpop.eup %5003  ;;  %v3375_v35 = vsel %vm6943_vm9, %v3374_v48, %v3370_v19  ;;  %v3440_v59 = vmul.f32 %v5002_v44, %v3439_v41  ;;  %vm3443_vm13 = vweird.f32 %v5002_v44  ;;  %v3449_v55 = vor.u32 1.1754944e-38, %v3448_v14 }
 0xe3a   : > { %v3489_v54 = vsel %vm1208_vm3, %v3488_v53, %v6976_v8  ;;  %v3355_v42 = vsel %vm3354_vm15, %v5000_v57, %v3351_v18  ;;  %v3408_v43 = vmul.f32 %v5004_v51, %v6949_v28  ;;  %v3418_v4 = vand.u32 2147483648, %v6949_v28  ;;  %vm3444_vm11 = vmor %vm3442_vm10, %vm3443_vm13 }
 0xe3b   : > { %v3490_v27 = vrot.slane %v6976_v8, 4  ;;  %v3360_v10 = vsel %vm6962_vm14, %v3359_v22, %v3355_v42  ;;  %v3441_v21 = vadd.f32 %v5002_v44, %v3440_v59  ;;  %vm7004_vm9 = vcmp.eq.f32.partialorder %v3416_v45, 8.507059e+37 }
 0xe3c   : > { %v5006_v13 = vpop.eup %5005  ;;  %v7009_v62 = vmul.f32 %v6742_v23, %v3375_v35  ;;  %v3361_v53 = vmul.f32 %v6739_v34, %v3360_v10  ;;  %v3409_v57 = vsub.f32 1.0, %v3408_v43  ;;  %5007 = vrcp.f32 %v6960_v17 }
 0xe3d   : > { %v3445_v12 = vsel %vm3444_vm11, %v5002_v44, %v3441_v21  ;;  %vm3413_vm5 = vweird.f32 %v5004_v51  ;;  %v3393_v0 = vmul.f32 %v5006_v13, %v6967_v40  ;;  %v3401_v22 = vand.u32 2147483647, %v6967_v40 }
 0xe3e   : > { %v3578_v7 = vrot.slane %v3361_v53, 4  ;;  %v3450_v23 = vsel %vm6986_vm0, %v3449_v55, %v3445_v12  ;;  %v3410_v33 = vmul.f32 %v5004_v51, %v3409_v57  ;;  %v3403_v34 = vand.u32 2147483648, %v6967_v40  ;;  %vm3414_vm10 = vmor %vm3412_vm1, %vm3413_vm5 }
 0xe3f   : > { %v3419_v20 = vor.u32 1.1754944e-38, %v3418_v4  ;;  %v3394_v16 = vsub.f32 1.0, %v3393_v0  ;;  %v3431_v14 = vand.u32 2147483647, %v6960_v17  ;;  %5009 = vrcp.f32 %v7015_v31 }
 0xe40   : > { %v7025_v44 = vmul.f32 %v6750_v2, %v3450_v23  ;;  %v3411_v50 = vadd.f32 %v5004_v51, %v3410_v33  ;;  %vm3397_vm14 = vweird.f32 %v6967_v40  ;;  %v3433_v19 = vand.u32 2147483648, %v6960_v17 }
 0xe41   : > { %v3564_v41 = vrot.slane %v7009_v62, 4  ;;  %v3395_v45 = vmul.f32 %v5006_v13, %v3394_v16  ;;  %vm3398_vm2 = vweird.f32 %v5006_v13  ;;  %vm7033_vm12 = vcmp.eq.f32.partialorder %v3401_v22, 8.507059e+37 }
 0xe42   : > { %v5008_v36 = vpop.eup %5007  ;;  %v7039_v2 = vsel %vm1208_vm3, %v6935_v52, %v3578_v7  ;;  %v3415_v35 = vsel %vm3414_vm10, %v5004_v51, %v3411_v50  ;;  %v3404_v59 = vor.u32 1.1754944e-38, %v3403_v34  ;;  %vm3427_vm0 = vweird.f32 %v6960_v17  ;;  %vm3399_vm1 = vmor %vm3397_vm14, %vm3398_vm2 }
 0xe43   : > { %v3396_v55 = vadd.f32 %v5006_v13, %v3395_v45  ;;  %v3423_v42 = vmul.f32 %v5008_v36, %v6960_v17  ;;  %vm7043_vm15 = vcmp.eq.f32.partialorder %v3431_v14, 8.507059e+37  ;;  %v3459_v43 = vperm.slane %v3453_v39, %v5571_v26 }
 0xe44   : > { %v3600_v4 = vrot.slane %v7025_v44, 4  ;;  %v3420_v10 = vsel %vm7004_vm9, %v3419_v20, %v3415_v35  ;;  %v3434_v51 = vor.u32 1.1754944e-38, %v3433_v19  ;;  %vm3337_vm13 = vweird.f32 %v7015_v31 }
 0xe45   : > { %v3465_v21 = vsel %vm1208_vm3, %v3464_v3, %v6838_v61  ;;  %v5010_v57 = vpop.eup %5009  ;;  %v3400_v12 = vsel %vm3399_vm1, %v5006_v13, %v3396_v55  ;;  %v3424_v0 = vsub.f32 1.0, %v3423_v42  ;;  %v3341_v39 = vand.u32 2147483647, %v7015_v31 }
 0xe46   : > { %v3483_v48 = vperm.slane %v6919_v15, %v5571_v26  ;;  %v3405_v40 = vsel %vm7033_vm12, %v3404_v59, %v3400_v12  ;;  %vm3428_vm9 = vweird.f32 %v5008_v36  ;;  %v3333_v22 = vmul.f32 %v5010_v57, %v7015_v31 }
 0xe47   : > { %v3495_v7 = vperm.slane %v3489_v54, %v5571_v26  ;;  %v7066_v23 = vmul.f32 %v6755_v1, %v3420_v10  ;;  %v3425_v3 = vmul.f32 %v5008_v36, %v3424_v0  ;;  %v3471_v13 = vperm.slane %v3465_v21, %v5571_v26  ;;  %vm3429_vm5 = vmor %vm3427_vm0, %vm3428_vm9 }
 0xe48   : > { %v3502_v33 = vrot.slane %v3459_v43, 4  ;;  %v3334_v34 = vsub.f32 1.0, %v3333_v22  ;;  %v3343_v20 = vand.u32 2147483648, %v7015_v31  ;;  %v3526_v16 = vrot.slane %v3483_v48, 4 }
 0xe49   : > { %v3577_v15 = vsel %vm1208_vm3, %v3576_v32, %v3361_v53  ;;  %v3601_v14 = vsel %vm1208_vm3, %v3600_v4, %v7066_v23  ;;  %v7076_v54 = vmul.f32 %v6752_v56, %v3405_v40  ;;  %v3426_v1 = vadd.f32 %v5008_v36, %v3425_v3 }
 0xe4a   : > { %vm3338_vm11 = vweird.f32 %v5010_v57  ;;  %v3335_v50 = vmul.f32 %v5010_v57, %v3334_v34  ;;  %v3503_v19 = vsel %vm1208_vm3, %v3471_v13, %v3502_v33  ;;  %v3527_v45 = vsel %vm1208_vm3, %v3495_v7, %v3526_v16 }
 0xe4b   : > { %v3583_v52 = vperm.slane %v3577_v15, %v5571_v26  ;;  %v3430_v32 = vsel %vm3429_vm5, %v5008_v36, %v3426_v1  ;;  %v3535_v53 = vperm.slane %v3527_v45, %v5593_v60  ;;  %v3500_v18 = vrot.slane %v3471_v13, 4  ;;  %vm3339_vm10 = vmor %vm3337_vm13, %vm3338_vm11 }
 0xe4c   : > { %v3524_v35 = vrot.slane %v3495_v7, 4  ;;  %v3435_v56 = vsel %vm7043_vm15, %v3434_v51, %v3430_v32  ;;  %v3336_v59 = vadd.f32 %v5010_v57, %v3335_v50  ;;  %vm3342_vm14 = vcmp.eq.f32.partialorder %v3341_v39, 8.507059e+37 }
 0xe4d   : > { %v3607_v17 = vperm.slane %v3601_v14, %v5571_v26  ;;  %v7089_v55 = vmul.f32 %v6763_v29, %v3435_v56  ;;  %v3344_v42 = vor.u32 1.1754944e-38, %v3343_v20  ;;  %v3501_v36 = vsel %vm1208_vm3, %v3500_v18, %v3459_v43 }
 0xe4e   : > { %v3525_v4 = vsel %vm1208_vm3, %v3524_v35, %v3483_v48  ;;  %v3602_v10 = vrot.slane %v7066_v23, 4  ;;  %v3340_v28 = vsel %vm3339_vm10, %v5010_v57, %v3336_v59  ;;  %v3511_v51 = vperm.slane %v3503_v19, %v5593_v60 }
 0xe4f   : > { %v3552_v21 = vrot.slane %v3535_v53, 4  ;;  %v3590_v12 = vrot.slane %v7076_v54, 4  ;;  %v3588_v29 = vrot.slane %v7089_v55, 4  ;;  %v3345_v0 = vsel %vm3342_vm14, %v3344_v42, %v3340_v28 }
 0xe50   : > { %v3612_v39 = vrot.slane %v3583_v52, 4  ;;  %v3346_v31 = vmul.f32 %v6767_v58, %v3345_v0  ;;  %v7102_v40 = vperm.slane %v3501_v36, %v5593_v60  ;;  %v7105_v43 = vperm.slane %v3525_v4, %v5593_v60 }
 0xe51   : > { %v3636_v48 = vrot.slane %v3607_v17, 4  ;;  %v3589_v57 = vsel %vm1208_vm3, %v3588_v29, %v7076_v54  ;;  %v3455_v22 = vsel %vm1208_vm3, %v6931_v63, %v3454_v9  ;;  %v3467_v58 = vsel %vm1208_vm3, %v6867_v5, %v3466_v24 }
 0xe52   : > { %v3479_v7 = vsel %vm1208_vm3, %v6884_v38, %v3478_v6  ;;  %v3565_v3 = vsel %vm1208_vm3, %v3564_v41, %v3346_v31  ;;  %v3553_v13 = vsel %vm1208_vm3, %v3552_v21, %v3511_v51  ;;  %v3595_v11 = vperm.slane %v3589_v57, %v5571_v26 }
 0xe53   : > { %v3554_v33 = vrot.slane %v3511_v51, 4  ;;  %v3571_v63 = vperm.slane %v3565_v3, %v5571_v26  ;;  %v3475_v61 = vperm.slane %v3467_v58, %v5571_v26  ;;  %v3487_v24 = vperm.slane %v3479_v7, %v5571_v26 }
 0xe54   : > { %v3491_v5 = vsel %vm1208_vm3, %v6842_v37, %v3490_v27  ;;  %v3638_v49 = vrot.slane %v3595_v11, 4  ;;  %v3550_v38 = vrot.slane %v7102_v40, 4  ;;  %v3463_v6 = vperm.slane %v3455_v22, %v5571_v26 }
 0xe55   : > { %v3499_v9 = vperm.slane %v3491_v5, %v5571_v26  ;;  %v3566_v41 = vrot.slane %v3346_v31, 4  ;;  %v3614_v34 = vrot.slane %v3571_v63, 4  ;;  %v3613_v20 = vsel %vm1208_vm3, %v3612_v39, %v3571_v63 }
 0xe56   : > { %v3637_v16 = vsel %vm1208_vm3, %v3636_v48, %v3595_v11  ;;  %v3639_v15 = vsel %vm1208_vm3, %v3607_v17, %v3638_v49  ;;  %v3548_v8 = vrot.slane %v7105_v43, 4  ;;  %v3619_v14 = vperm.slane %v3613_v20, %v5593_v60 }
 0xe57   : > { %v3538_v37 = vrot.slane %v3487_v24, 4  ;;  %v3615_v27 = vsel %vm1208_vm3, %v3583_v52, %v3614_v34  ;;  %v3647_v54 = vperm.slane %v3639_v15, %v5593_v60  ;;  %v3555_v1 = vsel %vm1208_vm3, %v3535_v53, %v3554_v33 }
 0xe58   : > { %v3512_v50 = vrot.slane %v3475_v61, 4  ;;  %v3623_v19 = vperm.slane %v3615_v27, %v5593_v60  ;;  %v3643_v45 = vperm.slane %v3637_v16, %v5593_v60  ;;  %v3662_v32 = vrot.slane %v3619_v14, 4 }
 0xe59   : > { %v3539_v18 = vsel %vm1208_vm3, %v3499_v9, %v3538_v37  ;;  %v3664_v35 = vrot.slane %v3647_v54, 4  ;;  %v3514_v56 = vrot.slane %v3463_v6, 4  ;;  %v3536_v59 = vrot.slane %v3499_v9, 4 }
 0xe5a   : > { %v3567_v17 = vsel %vm1208_vm3, %v7009_v62, %v3566_v41  ;;  %v3551_v52 = vsel %vm1208_vm3, %v7105_v43, %v3550_v38  ;;  %v3663_v42 = vsel %vm1208_vm3, %v3643_v45, %v3662_v32  ;;  %v3666_v53 = vrot.slane %v3623_v19, 4 }
 0xe5b   : > { %v3513_v36 = vsel %vm1208_vm3, %v3512_v50, %v3463_v6  ;;  %v3665_v4 = vsel %vm1208_vm3, %v3664_v35, %v3623_v19  ;;  %v4816_v28 = vpack.i.bf16 %v3663_v42, %v3551_v52  ;;  %v3547_v51 = vperm.slane %v3539_v18, %v5593_v60 }
 0xe5c   : > { %v3575_v21 = vperm.slane %v3567_v17, %v5571_v26  ;;  %v4821_v29 = vpack.i.bf16 %v3665_v4, %v3553_v13  ;;  %v3667_v0 = vsel %vm1208_vm3, %v3647_v54, %v3666_v53  ;;  %v3537_v62 = vsel %vm1208_vm3, %v3536_v59, %v3487_v24 }
 0xe5d   : > { %v3587_v39 = vperm.slane %v7039_v2, %v5571_v26  ;;  %4817 = vrot.lane.b32.xlu1 %v4816_v28, %s7606_s30  ;;  %v4826_v31 = vpack.i.bf16 %v3667_v0, %v3555_v1  ;;  %v3515_v43 = vsel %vm1208_vm3, %v3475_v61, %v3514_v56  ;;  %v3591_v48 = vsel %vm1208_vm3, %v7089_v55, %v3590_v12 }
 0xe5e   : > { %v3603_v57 = vsel %vm1208_vm3, %v7025_v44, %v3602_v10  ;;  %4822 = vrot.lane.b32.xlu2 %v4821_v29, %s7607_s27  ;;  %v3660_v22 = vrot.slane %v3643_v45, 4  ;;  %v3599_v58 = vperm.slane %v3591_v48, %v5571_v26  ;;  %v3519_v3 = vperm.slane %v3513_v36, %v5593_v60 }
 0xe5f   : > { %v3611_v2 = vperm.slane %v3603_v57, %v5571_v26  ;;  %v3624_v7 = vrot.slane %v3587_v39, 4  ;;  %4827 = vrot.lane.b32.xlu0 %v4826_v31, %s7608_s20  ;;  %v3543_v13 = vperm.slane %v3537_v62, %v5593_v60  ;;  %v3626_v55 = vrot.slane %v3575_v21, 4 }
 0xe60   : > { %v3549_v23 = vsel %vm1208_vm3, %v3548_v8, %v7102_v40  ;;  %v3560_v12 = vrot.slane %v3547_v51, 4  ;;  %v3661_v11 = vsel %vm1208_vm3, %v3660_v22, %v3619_v14  ;;  %v3523_v26 = vperm.slane %v3515_v43, %v5593_v60 }
 0xe61   : > { %v3625_v44 = vsel %vm1208_vm3, %v3624_v7, %v3575_v21  ;;  %v3648_v10 = vrot.slane %v3611_v2, 4  ;;  %v3627_v61 = vsel %vm1208_vm3, %v3587_v39, %v3626_v55  ;;  %v3650_v24 = vrot.slane %v3599_v58, 4 }
 0xe62   : > { %v3631_v33 = vperm.slane %v3625_v44, %v5593_v60  ;;  %v3558_v5 = vrot.slane %v3519_v3, 4  ;;  %v3556_v40 = vrot.slane %v3543_v13, 4  ;;  %v3561_v6 = vsel %vm1208_vm3, %v3560_v12, %v3523_v26 }
 0xe63   : > { %v3649_v63 = vsel %vm1208_vm3, %v3648_v10, %v3599_v58  ;;  %v3635_v20 = vperm.slane %v3627_v61, %v5593_v60  ;;  %v3651_v15 = vsel %vm1208_vm3, %v3611_v2, %v3650_v24  ;;  %v3562_v45 = vrot.slane %v3523_v26, 4 }
 0xe64   : > { %v3655_v49 = vperm.slane %v3649_v63, %v5593_v60  ;;  %v3670_v38 = vrot.slane %v3631_v33, 4  ;;  %v3559_v9 = vsel %vm1208_vm3, %v3543_v13, %v3558_v5  ;;  %v3557_v8 = vsel %vm1208_vm3, %v3556_v40, %v3519_v3  ;;  %v4707_v63 = vld [vmem:[%s7448_s10 + $0x10] sm:$0xff] }
 0xe65   : > { %v3659_v27 = vperm.slane %v3651_v15, %v5593_v60  ;;  %v3674_v54 = vrot.slane %v3635_v20, 4  ;;  %v3563_v32 = vsel %vm1208_vm3, %v3547_v51, %v3562_v45  ;;  %v4708_v60 = vld [vmem:[%s7448_s10 + $0x18] sm:$0xff]  ;;  %vm7616_vm2 = vcmask 457728   ;;  %v7226_v40 = vld [vmem:[%s7525_s6 + $0x10] sm:$0xff] }
 0xe66   : > { %v3671_v41 = vsel %vm1208_vm3, %v3655_v49, %v3670_v38  ;;  %v3668_v34 = vrot.slane %v3655_v49, 4  ;;  %3718 = vrot.lane.b32.xlu2 %v3561_v6, %s7609_s26  ;;  %3872 = vmatpush.bf16.msrb.mxu3 %v4708_v60  ;;  %vm7619_vm0 = vcmask 523264   ;;  %v3850_v6 = vperm.slane %v7226_v40, 5 }
 0xe67   : > { %v4836_v16 = vpack.i.bf16 %v3671_v41, %v3559_v9  ;;  %v3675_v1 = vsel %vm1208_vm3, %v3659_v27, %v3674_v54  ;;  %v3672_v50 = vrot.slane %v3659_v27, 4  ;;  %vm7620_vm15 = vmmov %vm7619_vm0 }
 0xe68   : > { %v3669_v14 = vsel %vm1208_vm3, %v3668_v34, %v3631_v33 }
 0xe69   : > { %4837 = vrot.lane.b32.xlu1 %v4836_v16, %s7610_s18  ;;  %v4831_v37 = vpack.i.bf16 %v3669_v14, %v3557_v8  ;;  %v3673_v19 = vsel %vm1208_vm3, %v3672_v50, %v3635_v20  ;;  %vm7613_vm3 = vcmask 326656   ;;  %s7622_s18 = sshll.u32 %s5341_s19, 3  ;;  %s4717_s19 = sshll.u32 %s5301_s0, 4 }
 0xe6a   : > { %3873 = vmatpush.bf16.msrb.mxu3 %v4707_v63  ;;  %s632_s1 = scalar_lea.vmem %s7623_s21, %s7622_s18  ;;  %s4315_s18 = scalar_lea.hbm %s7454_s16, %s4717_s19 }
 0xe6b   : > { %4832 = vrot.lane.b32.xlu0 %v4831_v37, %s7611_s25  ;;  %s4316_s25 = sshll.u32 %s7317_s23, 4  ;;  %s4295_s21 = scalar_lea.sflag [#allocation3], %s7313_s29  ;;  %s4317_s25 = int_to_ptr.vmem [resolvable:$true] %s4316_s25 }
 0xe6e   : > { %3728 = vrot.lane.b32.xlu2 %v3675_v1, %s7612_s22 }
 0xe71   : > { %3720 = vrot.lane.b32.xlu1 %v3673_v19, %s7609_s26 }
 0xe73   : > { %3726 = vrot.lane.b32.xlu0 %v3563_v32, %s7612_s22  ;;  %s4318_s22 = sshll.u32 %s4315_s18, 4  ;;  %s4319_s22 = int_to_ptr.hbm [resolvable:$true] %s4318_s22 }
 0xeb8   : > { %v4823_v18 = vpop.permute.xlu2 %4822 }
 0xeb9   : > { %v4825_v53 = vunpack.i.h.bf16 %v4823_v18  ;;  %v4824_v36 = vunpack.i.l.bf16 %v4823_v18 }
 0xec0   : > { %v3719_v4 = vpop.permute.xlu2 %3718 }
 0xec8   : > { %v3729_v55 = vpop.permute.xlu2 %3728 }
 0xecf   : > { %v4818_v35 = vpop.permute.xlu1 %4817 }
 0xed0   : > { %v4820_v59 = vunpack.i.h.bf16 %v4818_v35  ;;  %v4819_v17 = vunpack.i.l.bf16 %v4818_v35  ;;  %v4710_v35 = vld [vmem:[%s7449_s11 + $0x18] sm:$0xff] }
 0xed1   : > { %v4828_v56 = vpop.permute.xlu0 %4827  ;;  %3996 = vmatpush.bf16.msrb.mxu0 %v4710_v35  ;;  %v4844_v35 = vld [vmem:[%s7450_s12 + $0x1] ss:$0 sm:$0xff] }
 0xed2   : > { %v3732_v52 = vsel %vm1454_vm6, %v3549_v23, %v4819_v17  ;;  %v3733_v42 = vsel %vm1454_vm6, %v3661_v11, %v4820_v59  ;;  %v4830_v28 = vunpack.i.h.bf16 %v4828_v56  ;;  %v4829_v51 = vunpack.i.l.bf16 %v4828_v56  ;;  %vm7614_vm6 = vmmov %vm7613_vm3  ;;  %v4709_v56 = vld [vmem:[%s7449_s11 + $0x10] sm:$0xff] }
 0xed3   : > { %v3734_v29 = vsel %vm2121_vm8, %v3732_v52, %v4824_v36  ;;  %v3735_v0 = vsel %vm2121_vm8, %v3733_v42, %v4825_v53  ;;  %vm7615_vm8 = vcmask 392192  }
 0xed4   : > { %v3736_v43 = vsel %vm2124_vm7, %v3734_v29, %v4829_v51  ;;  %v3737_v48 = vsel %vm2124_vm7, %v3735_v0, %v4830_v28  ;;  %vm7617_vm12 = vmmov %vm7615_vm8 }
 0xed5   : > { %vm7618_vm7 = vmmov %vm7616_vm2  ;;  %3997 = vmatpush.bf16.msrb.mxu0 %v4709_v56 }
 0xedb   : > { %v4838_v21 = vpop.permute.xlu1 %4837 }
 0xedc   : > { %v4839_v57 = vunpack.i.l.bf16 %v4838_v21  ;;  %v4840_v2 = vunpack.i.h.bf16 %v4838_v21 }
 0xedd   : > { %v4833_v62 = vpop.permute.xlu0 %4832 }
 0xede   : > { %v4835_v39 = vunpack.i.h.bf16 %v4833_v62  ;;  %v4834_v31 = vunpack.i.l.bf16 %v4833_v62 }
 0xee0   : > { %v3738_v22 = vsel %vm698_vm4, %v3736_v43, %v4834_v31  ;;  %v3739_v58 = vsel %vm698_vm4, %v3737_v48, %v4835_v39 }
 0xee1   : > { %v3740_v7 = vsel %vm7613_vm3, %v3738_v22, %v4839_v57  ;;  %v3741_v13 = vsel %vm7614_vm6, %v3739_v58, %v4840_v2  ;;  %v4714_v22 = vld [vmem:[%s7451_s13 + $0x38] sm:$0xff] }
 0xee2   : > { %v3742_v10 = vsel %vm7617_vm12, %v3740_v7, %v3719_v4  ;;  %4047 = vmatpush.bf16.msra.mxu1 %v4714_v22 }
 0xee3   : > { %v3721_v3 = vpop.permute.xlu1 %3720 }
 0xee4   : > { %v3743_v23 = vsel %vm7615_vm8, %v3741_v13, %v3721_v3 }
 0xee5   : > { %v3745_v12 = vsel %vm7616_vm2, %v3743_v23, %v3729_v55  ;;  %v3727_v44 = vpop.permute.xlu0 %3726 }
 0xee6   : > { %v3747_v11 = vpack.c.bf16 %v3745_v12, %v3745_v12  ;;  %v3744_v33 = vsel %vm7618_vm7, %v3742_v10, %v3727_v44  ;;  %vm7621_vm7 = vmmov %vm7619_vm0 }
 0xee7   : > { %v3746_v26 = vpack.c.bf16 %v3744_v33, %v3744_v33 }
 0xee8   : > { %4616 = vmatmul.msk.bf16.vlgmr.msra.gmra.mxu0 %vm7619_vm0, %v3747_v11 }
 0xee9   : > { %4615 = vmatmul.msk.bf16.vlgmr.msra.gmra.mxu3 %vm7620_vm15, %v3746_v26 }
 0xf65   : > { %v3840_v61 = vpop.f32.mrf.mxu0 }
 0xf6c   : > { %v3800_v24 = vpop.f32.mrf.mxu3 }
 0xf6d   : > { %v3844_v5 = vpack.c.bf16 %v3840_v61, %v3800_v24  ;;  %v3842_v49 = vpop.f32.mrf.mxu0  ;;  %v3926_v24 = vperm.slane %v7226_v40, 6 }
 0xf6f   : > { %4629 = vmatmul.msk.bf16.vlgmr.msrb.gmra.mxu3 %vm698_vm4, %v3844_v5 }
 0xf74   : > { %v3802_v38 = vpop.f32.mrf.mxu3 }
 0xff2   : > { %v3875_v9 = vpop.f32.mrf.mxu3 }
 0xff3   : > { %v3876_v41 = vadd.f32 %v3875_v9, %v3850_v6 }
 0xff5   : > { %v7230_v34 = vadd.f32 %v3876_v41, %v6372_v46 }
 0xff7   : > { %v3882_v20 = vsel %vm698_vm4, %v7230_v34, 0.0 }
 0xff8   : > { %3883 = vadd.xlane.f32.xlu0 %v3882_v20 }
 0xffa   : > { %v3877_v16 = vpop.f32.mrf.mxu3 }
 0xffb   : > { %v3878_v15 = vadd.f32 %v3877_v16, %v3850_v6 }
 0xffd   : > { %v7235_v8 = vadd.f32 %v3878_v15, %v6377_v25 }
 0xfff   : > { %v3885_v14 = vsel %vm698_vm4, %v7235_v8, 0.0 }
0x1000   : > { %3886 = vadd.xlane.f32.xlu1 %v3885_v14 }
0x106b   : > { %v3884_v37 = vpop.xlane.xlu0 %3883 }
0x106c   : > { %v3888_v27 = vmul.f32 %v3884_v37, %v5376_v30 }
0x106e   : > { %v7241_v54 = vsub.f32 %v7230_v34, %v3888_v27 }
0x1070   : > { %v3892_v46 = vmul.f32 %v7241_v54, %v7241_v54  ;;  %v3927_v16 = vmul.f32 %v3926_v24, %v7241_v54  ;;  %v4713_v54 = vld [vmem:[%s7451_s13 + $0x30] sm:$0xff] }
0x1071   : > { %4048 = vmatpush.bf16.msra.mxu1 %v4713_v54 }
0x1072   : > { %v3894_v1 = vsel %vm698_vm4, %v3892_v46, 0.0 }
0x1073   : > { %v3887_v50 = vpop.xlane.xlu1 %3886  ;;  %3895 = vadd.xlane.f32.xlu2 %v3894_v1  ;;  %v3961_v1 = vperm.slane %v7226_v40, 7  ;;  %v4711_v40 = vld [vmem:[%s7451_s13 + $0x20] sm:$0xff] }
0x1074   : > { %v3889_v25 = vmul.f32 %v3887_v50, %v5376_v30 }
0x1076   : > { %v7248_v19 = vsub.f32 %v7235_v8, %v3889_v25 }
0x1078   : > { %v3893_v45 = vmul.f32 %v7248_v19, %v7248_v19  ;;  %v3928_v14 = vmul.f32 %v3926_v24, %v7248_v19  ;;  %v4712_v19 = vld [vmem:[%s7451_s13 + $0x28] sm:$0xff] }
0x1079   : > { %4049 = vmatpush.bf16.msra.mxu1 %v4712_v19 }
0x107a   : > { %v3897_v32 = vsel %vm698_vm4, %v3893_v45, 0.0 }
0x107b   : > { %3898 = vadd.xlane.f32.xlu0 %v3897_v32 }
0x107d   : > { %4050 = vmatpush.bf16.msra.mxu1 %v4711_v40 }
0x10e6   : > { %v3896_v60 = vpop.xlane.xlu2 %3895 }
0x10e7   : > { %v3900_v18 = vmul.f32 %v3896_v60, %v5390_v47 }
0x10e9   : > { %5011 = vrsqrt.f32 %v3900_v18  ;;  %vm3909_vm1 = vcmp.eq.f32.partialorder %v3900_v18, inf  ;;  %v3912_v62 = vand.u32 2147483648, %v3900_v18  ;;  %vm3911_vm13 = vcmp.eq.f32.partialorder %v3900_v18, 0.0 }
0x10ee   : > { %v3899_v59 = vpop.xlane.xlu0 %3898 }
0x10ef   : > { %v5012_v17 = vpop.eup %5011  ;;  %v3901_v52 = vmul.f32 %v3899_v59, %v5390_v47 }
0x10f0   : > { %v3903_v42 = vmul.f32 %v5012_v17, %v3900_v18 }
0x10f1   : > { %5013 = vrsqrt.f32 %v3901_v52  ;;  %vm3921_vm9 = vcmp.eq.f32.partialorder %v3901_v52, inf  ;;  %v3924_v7 = vand.u32 2147483648, %v3901_v52  ;;  %vm3923_vm11 = vcmp.eq.f32.partialorder %v3901_v52, 0.0 }
0x10f2   : > { %v3904_v53 = vmul.f32 %v5012_v17, %v3903_v42 }
0x10f4   : > { %v3905_v36 = vmul.f32 0.5, %v3904_v53 }
0x10f6   : > { %v3906_v4 = vsub.f32 1.5, %v3905_v36  ;;  %v4845_v36 = vld [vmem:[%s7525_s6 + $0x18] ss:$0 sm:$0xff]  ;;  %s5058_s6 = scalar_lea.hbm %s7454_s16, 32 }
0x10f7   : > { %v5014_v28 = vpop.eup %5013 }
0x10f8   : > { %v3907_v51 = vmul.f32 %v5012_v17, %v3906_v4  ;;  %v3915_v21 = vmul.f32 %v5014_v28, %v3901_v52 }
0x10fa   : > { %v3908_v29 = vmul.f32 %v3907_v51, %v3900_v18  ;;  %v3916_v0 = vmul.f32 %v5014_v28, %v3915_v21 }
0x10fc   : > { %v3910_v39 = vsel %vm3909_vm1, %v3900_v18, %v3908_v29  ;;  %v3917_v31 = vmul.f32 0.5, %v3916_v0 }
0x10fd   : > { %v3913_v43 = vsel %vm3911_vm13, %v3912_v62, %v3910_v39 }
0x10fe   : > { %v3929_v48 = vadd.f32 1e-06, %v3913_v43  ;;  %v3918_v57 = vsub.f32 1.5, %v3917_v31 }
0x1100   : > { %5015 = vrcp.f32 %v3929_v48  ;;  %v3919_v58 = vmul.f32 %v5014_v28, %v3918_v57  ;;  %v3942_v26 = vand.u32 2147483648, %v3929_v48  ;;  %vm3936_vm14 = vweird.f32 %v3929_v48 }
0x1101   : > { %v3940_v63 = vand.u32 2147483647, %v3929_v48 }
0x1102   : > { %v3920_v2 = vmul.f32 %v3919_v58, %v3901_v52  ;;  %v3943_v38 = vor.u32 1.1754944e-38, %v3942_v26 }
0x1103   : > { %vm3941_vm3 = vcmp.eq.f32.partialorder %v3940_v63, 8.507059e+37 }
0x1104   : > { %v3922_v3 = vsel %vm3921_vm9, %v3901_v52, %v3920_v2 }
0x1105   : > { %v3925_v13 = vsel %vm3923_vm11, %v3924_v7, %v3922_v3 }
0x1106   : > { %v5016_v55 = vpop.eup %5015  ;;  %v3930_v23 = vadd.f32 1e-06, %v3925_v13 }
0x1107   : > { %v3932_v12 = vmul.f32 %v5016_v55, %v3929_v48  ;;  %vm3937_vm5 = vweird.f32 %v5016_v55 }
0x1108   : > { %5017 = vrcp.f32 %v3930_v23  ;;  %vm3938_vm10 = vmor %vm3936_vm14, %vm3937_vm5  ;;  %v3957_v6 = vand.u32 2147483648, %v3930_v23  ;;  %v3955_v41 = vand.u32 2147483647, %v3930_v23  ;;  %vm3951_vm8 = vweird.f32 %v3930_v23 }
0x1109   : > { %v3933_v44 = vsub.f32 1.0, %v3932_v12 }
0x110a   : > { %v3958_v37 = vor.u32 1.1754944e-38, %v3957_v6  ;;  %vm3956_vm12 = vcmp.eq.f32.partialorder %v3955_v41, 8.507059e+37 }
0x110b   : > { %v3934_v10 = vmul.f32 %v5016_v55, %v3933_v44 }
0x110d   : > { %v3935_v11 = vadd.f32 %v5016_v55, %v3934_v10 }
0x110e   : > { %v5018_v33 = vpop.eup %5017 }
0x110f   : > { %v3947_v61 = vmul.f32 %v5018_v33, %v3930_v23  ;;  %v3939_v5 = vsel %vm3938_vm10, %v5016_v55, %v3935_v11  ;;  %vm3952_vm6 = vweird.f32 %v5018_v33  ;;  %v4716_v55 = vld [vmem:[%s7452_s14 + $0x8] sm:$0xff] }
0x1110   : > { %v3944_v20 = vsel %vm3941_vm3, %v3943_v38, %v3939_v5  ;;  %vm3953_vm2 = vmor %vm3951_vm8, %vm3952_vm6  ;;  %4176 = vmatpush.bf16.msra.mxu2 %v4716_v55 }
0x1111   : > { %v3948_v49 = vsub.f32 1.0, %v3947_v61  ;;  %v3945_v27 = vmul.f32 %v3944_v20, %v3927_v16 }
0x1113   : > { %v3949_v9 = vmul.f32 %v5018_v33, %v3948_v49  ;;  %v3962_v45 = vadd.f32 %v3961_v1, %v3945_v27 }
0x1115   : > { %v3950_v15 = vadd.f32 %v5018_v33, %v3949_v9 }
0x1117   : > { %v3954_v46 = vsel %vm3953_vm2, %v5018_v33, %v3950_v15  ;;  %vm4184_vm2 = vcmask 72704  }
0x1118   : > { %v3959_v50 = vsel %vm3956_vm12, %v3958_v37, %v3954_v46 }
0x1119   : > { %v3960_v25 = vmul.f32 %v3959_v50, %v3928_v14 }
0x111b   : > { %v3963_v32 = vadd.f32 %v3961_v1, %v3960_v25 }
0x111d   : > { %v3964_v60 = vpack.c.bf16 %v3963_v32, %v3962_v45  ;;  %v5037_v32 = vld [vmem:[%s7522_s5] sm:$0xf] }
0x111f   : > { %4643 = vmatmul.msk.bf16.vlgmr.msrb.gmra.mxu0 %vm698_vm4, %v3964_v60  ;;  %v4106_v60 = vperm.slane %v5037_v32, 2 }
0x119c   : > { %v3999_v18 = vpop.f32.mrf.mxu0 }
0x119d   : > { %v4000_v56 = vadd.f32 %v4844_v35, %v3999_v18 }
0x119f   : > { %v4004_v52 = vmax.f32 %v4000_v56, 0.0 }
0x11a4   : > { %v4001_v59 = vpop.f32.mrf.mxu0 }
0x11a5   : > { %v4002_v17 = vadd.f32 %v4844_v35, %v4001_v59  ;;  %v4141_v35 = vperm.slane %v5037_v32, 3 }
0x11a7   : > { %v4005_v42 = vmax.f32 %v4002_v17, 0.0 }
0x11a9   : > { %v4006_v53 = vpack.c.bf16 %v4005_v42, %v4004_v52 }
0x11ab   : > { %4668 = vmatmul.msk.bf16.vlgmr.msra.gmra.mxu1 %vm7621_vm7, %v4006_v53 }
0x1228   : > { %v4052_v4 = vpop.f32.mrf.mxu1 }
0x1229   : > { %v4057_v28 = vadd.f32 %v4052_v4, %v7230_v34 }
0x122b   : > { %v4060_v51 = vadd.f32 %v4845_v36, %v4057_v28 }
0x122d   : > { %v4062_v21 = vsel %vm698_vm4, %v4060_v51, 0.0 }
0x122e   : > { %4063 = vadd.xlane.f32.xlu1 %v4062_v21 }
0x1230   : > { %v4054_v29 = vpop.f32.mrf.mxu1 }
0x1231   : > { %v4058_v0 = vadd.f32 %v4054_v29, %v7235_v8 }
0x1233   : > { %v4061_v62 = vadd.f32 %v4845_v36, %v4058_v0 }
0x1235   : > { %v4065_v39 = vsel %vm698_vm4, %v4061_v62, 0.0 }
0x1236   : > { %4066 = vadd.xlane.f32.xlu2 %v4065_v39 }
0x12a1   : > { %v4064_v31 = vpop.xlane.xlu1 %4063 }
0x12a2   : > { %v4068_v43 = vmul.f32 %v4064_v31, %v5376_v30 }
0x12a4   : > { %v7290_v48 = vsub.f32 %v4060_v51, %v4068_v43 }
0x12a6   : > { %v4072_v57 = vmul.f32 %v7290_v48, %v7290_v48  ;;  %v4107_v59 = vmul.f32 %v4106_v60, %v7290_v48 }
0x12a8   : > { %v4074_v34 = vsel %vm698_vm4, %v4072_v57, 0.0 }
0x12a9   : > { %4075 = vadd.xlane.f32.xlu0 %v4074_v34  ;;  %v4067_v22 = vpop.xlane.xlu2 %4066  ;;  %v4846_v34 = vld [vmem:[%s7453_s15] ss:$0 sm:$0xff] }
0x12aa   : > { %v4069_v58 = vmul.f32 %v4067_v22, %v5376_v30  ;;  %v4715_v30 = vld [vmem:[%s7452_s14] sm:$0xff] }
0x12ab   : > { %4177 = vmatpush.bf16.msra.mxu2 %v4715_v30 }
0x12ac   : > { %v7296_v2 = vsub.f32 %v4061_v62, %v4069_v58 }
0x12ae   : > { %v4073_v8 = vmul.f32 %v7296_v2, %v7296_v2  ;;  %v4108_v62 = vmul.f32 %v4106_v60, %v7296_v2 }
0x12b0   : > { %v4077_v7 = vsel %vm698_vm4, %v4073_v8, 0.0 }
0x12b1   : > { %4078 = vadd.xlane.f32.xlu1 %v4077_v7 }
0x131c   : > { %v4076_v3 = vpop.xlane.xlu0 %4075 }
0x131d   : > { %v4080_v13 = vmul.f32 %v4076_v3, %v5390_v47 }
0x131f   : > { %5019 = vrsqrt.f32 %v4080_v13  ;;  %vm4089_vm0 = vcmp.eq.f32.partialorder %v4080_v13, inf  ;;  %v4092_v38 = vand.u32 2147483648, %v4080_v13  ;;  %vm4091_vm15 = vcmp.eq.f32.partialorder %v4080_v13, 0.0 }
0x1324   : > { %v4079_v23 = vpop.xlane.xlu1 %4078 }
0x1325   : > { %v5020_v12 = vpop.eup %5019  ;;  %v4081_v44 = vmul.f32 %v4079_v23, %v5390_v47 }
0x1326   : > { %v4083_v10 = vmul.f32 %v5020_v12, %v4080_v13 }
0x1327   : > { %5021 = vrsqrt.f32 %v4081_v44  ;;  %vm4101_vm1 = vcmp.eq.f32.partialorder %v4081_v44, inf  ;;  %v4104_v14 = vand.u32 2147483648, %v4081_v44  ;;  %vm4103_vm13 = vcmp.eq.f32.partialorder %v4081_v44, 0.0 }
0x1328   : > { %v4084_v11 = vmul.f32 %v5020_v12, %v4083_v10 }
0x132a   : > { %v4085_v33 = vmul.f32 0.5, %v4084_v11 }
0x132c   : > { %v4086_v26 = vsub.f32 1.5, %v4085_v33 }
0x132d   : > { %v5022_v63 = vpop.eup %5021 }
0x132e   : > { %v4087_v61 = vmul.f32 %v5020_v12, %v4086_v26  ;;  %v4095_v24 = vmul.f32 %v5022_v63, %v4081_v44 }
0x1330   : > { %v4088_v5 = vmul.f32 %v4087_v61, %v4080_v13  ;;  %v4096_v49 = vmul.f32 %v5022_v63, %v4095_v24 }
0x1332   : > { %v4090_v6 = vsel %vm4089_vm0, %v4080_v13, %v4088_v5  ;;  %v4097_v9 = vmul.f32 0.5, %v4096_v49 }
0x1333   : > { %v4093_v41 = vsel %vm4091_vm15, %v4092_v38, %v4090_v6 }
0x1334   : > { %v4109_v20 = vadd.f32 1e-06, %v4093_v41  ;;  %v4098_v16 = vsub.f32 1.5, %v4097_v9 }
0x1336   : > { %5023 = vrcp.f32 %v4109_v20  ;;  %v4099_v47 = vmul.f32 %v5022_v63, %v4098_v16  ;;  %v4122_v45 = vand.u32 2147483648, %v4109_v20  ;;  %v4120_v19 = vand.u32 2147483647, %v4109_v20  ;;  %v4209_v63 = vld [vmem:[%s632_s1] sm:$0xff] }
0x1337   : > { %vm4116_vm11 = vweird.f32 %v4109_v20 }
0x1338   : > { %v4100_v15 = vmul.f32 %v4099_v47, %v4081_v44  ;;  %v4123_v56 = vor.u32 1.1754944e-38, %v4122_v45  ;;  %vm4121_vm14 = vcmp.eq.f32.partialorder %v4120_v19, 8.507059e+37  ;;  %v7624_v47 = vld [vmem:[#allocation15_spill] sm:$0xff] }
0x133a   : > { %v4102_v37 = vsel %vm4101_vm1, %v4081_v44, %v4100_v15  ;;  %vm4237_vm1 = vcmask 1041409  }
0x133b   : > { %v4105_v27 = vsel %vm4103_vm13, %v4104_v14, %v4102_v37  ;;  %v7625_v14 = vmov 0.0   ;;  %vm4240_vm13 = vcmask 58368  }
0x133c   : > { %v5024_v46 = vpop.eup %5023  ;;  %v4110_v1 = vadd.f32 1e-06, %v4105_v27 }
0x133d   : > { %v4112_v50 = vmul.f32 %v5024_v46, %v4109_v20  ;;  %vm4117_vm9 = vweird.f32 %v5024_v46 }
0x133e   : > { %5025 = vrcp.f32 %v4110_v1  ;;  %vm4118_vm5 = vmor %vm4116_vm11, %vm4117_vm9  ;;  %v4137_v4 = vand.u32 2147483648, %v4110_v1  ;;  %v4135_v51 = vand.u32 2147483647, %v4110_v1  ;;  %vm4131_vm3 = vweird.f32 %v4110_v1 }
0x133f   : > { %v4113_v25 = vsub.f32 1.0, %v4112_v50 }
0x1340   : > { %v4138_v0 = vor.u32 1.1754944e-38, %v4137_v4  ;;  %vm4136_vm8 = vcmp.eq.f32.partialorder %v4135_v51, 8.507059e+37 }
0x1341   : > { %v4114_v54 = vmul.f32 %v5024_v46, %v4113_v25 }
0x1343   : > { %v4115_v40 = vadd.f32 %v5024_v46, %v4114_v54 }
0x1344   : > { %v5026_v18 = vpop.eup %5025 }
0x1345   : > { %v4119_v17 = vsel %vm4118_vm5, %v5024_v46, %v4115_v40  ;;  %v4127_v52 = vmul.f32 %v5026_v18, %v4110_v1  ;;  %vm4132_vm10 = vweird.f32 %v5026_v18  ;;  %v4210_v1 = vld [vmem:[%s632_s1 + $0x8] sm:$0xff]  ;;  %s5052_s1 = sshra.s32 %s4319_s22, 4  ;;  %s5053_s1 = int_to_ptr.hbm [resolvable:$true] %s5052_s1 }
0x1346   : > { %v4124_v42 = vsel %vm4121_vm14, %v4123_v56, %v4119_v17  ;;  %vm4133_vm6 = vmor %vm4131_vm3, %vm4132_vm10  ;;  %s5054_s3 = scalar_lea.hbm %s5053_s1, 16  ;;  %p5059_p0 = scmp.lt.s32.totalorder %s5053_s1, %s7454_s16 }
0x1347   : > { %v4125_v53 = vmul.f32 %v4124_v42, %v4107_v59  ;;  %v4128_v36 = vsub.f32 1.0, %v4127_v52  ;;  %p5055_p11 = scmp.ne.s32.totalorder %s5053_s1, %s5054_s3  ;;  %p5060_p1 = scmp.lt.s32.totalorder %s5058_s6, %s5054_s3 }
0x1349   : > { %v4129_v28 = vmul.f32 %v5026_v18, %v4128_v36  ;;  %v4142_v21 = vadd.f32 %v4141_v35, %v4125_v53  ;;  %p5056_p12 = pnand %p5055_p11, %p5320_p5  ;;  %p5061_p2 = por %p5060_p1, %p5059_p0 }
0x134b   : > { %v4130_v29 = vadd.f32 %v5026_v18, %v4129_v28  ;;  %4144 = vst.msk [vmem:[%s7317_s23] sm:$0xff] %vm698_vm4, %v4142_v21  ;;  %p5057_p13 = pneg %p5056_p12 }
0x134d   : > { %v4134_v39 = vsel %vm4133_vm6, %v5026_v18, %v4130_v29  ;;  %p5062_p3 = pnand %p5061_p2, %p5057_p13 }
0x134e   : > { %v4139_v31 = vsel %vm4136_vm8, %v4138_v0, %v4134_v39 }
0x134f   : > { %v4140_v43 = vmul.f32 %v4139_v31, %v4108_v62 }
0x1351   : > { %v4143_v48 = vadd.f32 %v4141_v35, %v4140_v43 }
0x1353   : > { %v4146_v57 = vpack.c.bf16 %v4143_v48, %v4142_v21  ;;  %4145 = vst.msk [vmem:[%s7317_s23 + $0x8] sm:$0xff] %vm698_vm4, %v4143_v48 }
0x1355   : > { %4677 = vmatmul.msk.bf16.vlgmr.msra.gmra.mxu2 %vm698_vm4, %v4146_v57 }
0x13d8   : > { %v4179_v22 = vpop.f32.mrf.mxu2 }
0x13d9   : > { %v4180_v58 = vadd.f32 %v4846_v34, %v4179_v22 }
0x13db   : > { %v4185_v8 = vsel %vm4184_vm2, %v4180_v58, -inf }
0x13dc   : > { %4186 = vmax.xlane.f32.xlu2 %v4185_v8 }
0x13e0   : > { %v4181_v2 = vpop.f32.mrf.mxu2 }
0x13e1   : > { %v4182_v7 = vadd.f32 %v4846_v34, %v4181_v2 }
0x13e3   : > { %v4188_v3 = vsel %vm4184_vm2, %v4182_v7, -inf }
0x13e4   : > { %4189 = vmax.xlane.f32.xlu0 %v4188_v3 }
0x144f   : > { %v4187_v13 = vpop.xlane.xlu2 %4186 }
0x1450   : > { %v4191_v55 = vsub.f32 %v4180_v58, %v4187_v13 }
0x1452   : > { %v4193_v30 = vmul.f32 1.442695, %v4191_v55 }
0x1454   : > { %5027 = vpow2.f32 %v4193_v30 }
0x1457   : > { %v4190_v23 = vpop.xlane.xlu0 %4189 }
0x1458   : > { %v4192_v12 = vsub.f32 %v4182_v7, %v4190_v23 }
0x145a   : > { %v5028_v44 = vpop.eup %5027  ;;  %v4195_v10 = vmul.f32 1.442695, %v4192_v12 }
0x145b   : > { %v4197_v11 = vsel %vm4184_vm2, %v5028_v44, 0.0 }
0x145c   : > { %5029 = vpow2.f32 %v4195_v10  ;;  %4198 = vadd.xlane.f32.xlu1 %v4197_v11 }
0x1462   : > { %v5030_v33 = vpop.eup %5029 }
0x1463   : > { %v4200_v26 = vsel %vm4184_vm2, %v5030_v33, 0.0 }
0x1464   : > { %4201 = vadd.xlane.f32.xlu2 %v4200_v26 }
0x147c   : > { %4212 = vperm.xlu2 %4841, %v4209_v63  }
0x14cf   : > { %v4199_v61 = vpop.xlane.xlu1 %4198 }
0x14d0   : > { %5031 = vlog2.f32 %v4199_v61 }
0x14d6   : > { %v5032_v24 = vpop.eup %5031 }
0x14d7   : > { %v4204_v5 = vmul.f32 0.6931472, %v5032_v24  ;;  %v4202_v49 = vpop.xlane.xlu2 %4201 }
0x14d8   : > { %5033 = vlog2.f32 %v4202_v49 }
0x14d9   : > { %v4207_v38 = vsub.f32 %v4191_v55, %v4204_v5 }
0x14db   : > { %v4249_v6 = vsel %vm4184_vm2, %v4207_v38, -inf }
0x14dc   : > { %4250 = vmax.xlane.f32.xlu0 %v4249_v6 }
0x14de   : > { %v5034_v9 = vpop.eup %5033 }
0x14df   : > { %v4206_v41 = vmul.f32 0.6931472, %v5034_v9  ;;  %v4213_v20 = vpop.permute.xlu2 %4212 }
0x14e0   : > { %vm4217_vm4 = vcmp.eq.s32.totalorder %v4213_v20, %v7624_v47 }
0x14e1   : > { %v4208_v16 = vsub.f32 %v4192_v12, %v4206_v41  ;;  %v4678_v37 = vsel %vm4217_vm4, 1.0, %v7625_v14 }
0x14e2   : > { %v4223_v27 = vmul.f32 %v4678_v37, %v4207_v38 }
0x14e3   : > { %v4252_v15 = vsel %vm4184_vm2, %v4208_v16, -inf }
0x14e4   : > { %4253 = vmax.xlane.f32.xlu1 %v4252_v15  ;;  %v4225_v46 = vsel %vm4184_vm2, %v4223_v27, 0.0 }
0x14ec   : > { %4226 = vadd.xlane.f32.xlu1 %v4225_v46 }
0x14f0   : > { %4215 = vperm.xlu0 %4790, %v4210_v1  }
0x154f   : > { %v4251_v45 = vpop.xlane.xlu0 %4250 }
0x1550   : > { %vm4255_vm7 = vcmp.eq.f32.partialorder %v4207_v38, %v4251_v45 }
0x1551   : > { %v4257_v40 = vsel %vm4255_vm7, %v7624_v47, 9 }
0x1552   : > { %v4259_v56 = vsel %vm4184_vm2, %v4257_v40, 2147483647 }
0x1553   : > { %v4261_v17 = vshra.s32 %v4259_v56, 16  ;;  %v4260_v39 = vand.u32 65535, %v4259_v56 }
0x1555   : > { %v4263_v52 = vcvt.s32.f32 %v4261_v17  ;;  %v4262_v57 = vcvt.s32.f32 %v4260_v39 }
0x1557   : > { %v4254_v50 = vpop.xlane.xlu1 %4253 }
0x1558   : > { %vm4256_vm12 = vcmp.eq.f32.partialorder %v4208_v16, %v4254_v50 }
0x1559   : > { %v4258_v25 = vsel %vm4256_vm12, %v7624_v47, 9 }
0x155a   : > { %v4274_v32 = vsel %vm4184_vm2, %v4258_v25, 2147483647 }
0x155b   : > { %v4276_v60 = vshra.s32 %v4274_v32, 16  ;;  %v4275_v42 = vand.u32 65535, %v4274_v32 }
0x155d   : > { %v4278_v54 = vcvt.s32.f32 %v4276_v60  ;;  %v4277_v53 = vcvt.s32.f32 %v4275_v42 }
0x155f   : > { %4279 = vmin.xlane.f32.xlu2 %v4278_v54  ;;  %v4227_v4 = vpop.xlane.xlu1 %4226 }
0x1560   : > { %v4231_v51 = vsub.f32 0.0, %v4227_v4 }
0x1562   : > { %v4216_v19 = vpop.permute.xlu0 %4215  ;;  %v4235_v0 = vperm.slane %v4231_v51, %v7624_v47 }
0x1563   : > { %vm4218_vm0 = vcmp.eq.s32.totalorder %v4216_v19, %v7624_v47 }
0x1564   : > { %v4679_v18 = vsel %vm4218_vm0, 1.0, %v7625_v14 }
0x1565   : > { %v4224_v35 = vmul.f32 %v4679_v18, %v4208_v16 }
0x1567   : > { %v4228_v59 = vsel %vm4184_vm2, %v4224_v35, 0.0 }
0x1568   : > { %4229 = vadd.xlane.f32.xlu1 %v4228_v59 }
0x1570   : > { %4264 = vmin.xlane.f32.xlu1 %v4263_v52 }
0x15d2   : > { %v4280_v36 = vpop.xlane.xlu2 %4279 }
0x15d3   : > { %vm4281_vm15 = vcmp.eq.f32.partialorder %v4278_v54, %v4280_v36 }
0x15d4   : > { %v4282_v28 = vsel %vm4281_vm15, %v4277_v53, inf }
0x15d5   : > { %4283 = vmin.xlane.f32.xlu1 %v4282_v28 }
0x15db   : > { %v4230_v21 = vpop.xlane.xlu1 %4229 }
0x15dc   : > { %v4232_v29 = vsub.f32 0.0, %v4230_v21 }
0x15de   : > { %v4236_v62 = vperm.slane %v4232_v29, %v7624_v47 }
0x15e0   : > { %v4238_v31 = vsel %vm4237_vm1, %v4236_v62, %v4235_v0 }
0x15e1   : > { %v4241_v43 = vsel %vm4240_vm13, %v4238_v31, 0.0 }
0x15e2   : > { %4242 = vadd.xlane.f32.xlu1 %v4241_v43 }
0x15e3   : > { %v7351_v48 = vpop.xlane.xlu1 %4264 }
0x15e4   : > { %vm4266_vm9 = vcmp.eq.f32.partialorder %v4263_v52, %v7351_v48 }
0x15e5   : > { %v4267_v34 = vsel %vm4266_vm9, %v4262_v57, inf }
0x15e6   : > { %4268 = vmin.xlane.f32.xlu0 %v4267_v34 }
0x15e7   : > { %5065 = shalt.err (!%p5062_p3)
}
0x15e8   : > { %s5183_s23 = smov 128   ;;  %v4286_v22 = vcvt.f32.s32 %v4280_v36  ;;  %s4494_s4 = sshll.u32 %s7313_s29, 1  ;;  %vm4291_vm11 = vcmask 57344   ;;  %vm4247_vm5 = vcmask 8192   ;;  %v4271_v55 = vcvt.f32.s32 %v7351_v48 }
0x15e9   : > { %4718 = dma.vmem_to_hbm [thread:$0]  (%p5320_p5), %s4317_s25, 256, %s4319_s22, %s4295_s21, %s5183_s23, %s5183_s23, %s7606_s30  }
0x15ea   : > { %v4287_v8 = vshll.u32 %v4286_v22, 16  ;;  %s7373_s3 = scalar_lea.vmem [#allocation6], %s4494_s4  ;;  %s4330_s7 = scalar_lea.hbm %s7455_s17, %s5301_s0 }
0x15eb   : > { %s4299_s8 = sand.u32 1, %s5301_s0   ;;  %s609_s30 = scalar_lea.vmem [#allocation4], %s7313_s29 }
0x15ec   : > { %s4332_s19 = sshll.u32 %s609_s30, 4  ;;  %s4334_s20 = sshll.u32 %s4330_s7, 4  ;;  %s4333_s19 = int_to_ptr.vmem [resolvable:$true] %s4332_s19  ;;  %s4335_s20 = int_to_ptr.hbm [resolvable:$true] %s4334_s20 }
0x15ed   : > { %s7626_s25 = sld [smem:[#allocation26_spill]]  ;;  %s7389_s21 = scalar_lea.sflag [#allocation5], %s4299_s8 }
0x15ee   : > { %s5080_s0 = sshra.s32 %s4335_s20, 4  ;;  %s5086_s4 = scalar_lea.hbm %s7455_s17, 2  ;;  %s5081_s0 = int_to_ptr.hbm [resolvable:$true] %s5080_s0 }
0x15ef   : > { %s5082_s29 = scalar_lea.hbm %s5081_s0, 1  ;;  %p5087_p9 = scmp.lt.s32.totalorder %s5081_s0, %s7455_s17 }
0x15f0   : > { %p5083_p4 = scmp.ne.s32.totalorder %s5081_s0, %s5082_s29  ;;  %p5088_p10 = scmp.lt.s32.totalorder %s5086_s4, %s5082_s29 }
0x15f2   : > { %p5084_p7 = pnand %p5083_p4, %p5320_p5  ;;  %p5089_p11 = por %p5088_p10, %p5087_p9 }
0x15f3   : > { %s4344_s22 = scalar_lea.hbm %s7626_s25, %s5331_s24 }
0x15f4   : > { %p5085_p8 = pneg %p5084_p7 }
0x15f6   : > { %p5090_p12 = pnand %p5089_p11, %p5085_p8 }
0x1648   : > { %v4284_v58 = vpop.xlane.xlu1 %4283 }
0x1649   : > { %v4285_v2 = vcvt.f32.s32 %v4284_v58 }
0x164b   : > { %v4288_v7 = vadd.s32 %v4287_v8, %v4285_v2 }
0x164d   : > { %v4290_v3 = vperm.slane %v4288_v7, %v7624_v47 }
0x164f   : > { %4293 = vst.msk [vmem:[%s7373_s3 + $0x1] sm:$0x1] %vm4291_vm11, %v4290_v3 }
0x1655   : > { %v4243_v13 = vpop.xlane.xlu1 %4242 }
0x1656   : > { %v4245_v30 = vperm.slane %v4243_v13, %v7624_v47 }
0x1658   : > { %4248 = vst.msk [vmem:[%s609_s30] sm:$0x1] %vm4247_vm5, %v4245_v30 }
0x1659   : > { %v4269_v23 = vpop.xlane.xlu0 %4268 }
0x165a   : > { %5093 = shalt.err (!%p5090_p12)
}
0x165b   : > { %4719 = dma.vmem_to_hbm [thread:$0]  (%p5320_p5), %s4333_s19, 16, %s4335_s20, %s7389_s21   ;;  %v4272_v12 = vshll.u32 %v4271_v55, 16  ;;  %v4270_v44 = vcvt.f32.s32 %v4269_v23 }
0x165c   : > { %s4347_s24 = sshll.u32 %s4344_s22, 4  ;;  %s4345_s7 = sshll.u32 %s7373_s3, 4  ;;  %s4348_s24 = int_to_ptr.hbm [resolvable:$true] %s4347_s24  ;;  %s4346_s7 = int_to_ptr.vmem [resolvable:$true] %s4345_s7 }
0x165d   : > { %v4273_v10 = vadd.s32 %v4272_v12, %v4270_v44  ;;  %s5108_s8 = sshra.s32 %s4348_s24, 4  ;;  %s5114_s20 = scalar_lea.hbm %s7626_s25, 4  ;;  %s5109_s8 = int_to_ptr.hbm [resolvable:$true] %s5108_s8 }
0x165e   : > { %s5110_s30 = scalar_lea.hbm %s5109_s8, 2  ;;  %p5115_p2 = scmp.lt.s32.totalorder %s5109_s8, %s7626_s25 }
0x165f   : > { %v4289_v11 = vperm.slane %v4273_v10, %v7624_v47  ;;  %p5111_p13 = scmp.ne.s32.totalorder %s5109_s8, %s5110_s30  ;;  %p5116_p3 = scmp.lt.s32.totalorder %s5114_s20, %s5110_s30 }
0x1661   : > { %4292 = vst.msk [vmem:[%s7373_s3] sm:$0x1] %vm4291_vm11, %v4289_v11  ;;  %p5112_p0 = pnand %p5111_p13, %p5320_p5  ;;  %p5117_p4 = por %p5116_p3, %p5115_p2 }
0x1663   : > { %p5113_p1 = pneg %p5112_p0 }
0x1665   : > { %p5118_p7 = pnand %p5117_p4, %p5113_p1 }
0x1667   : > { %5121 = shalt.err (!%p5118_p7)
}
0x1668   : > { %s5184_s3 = smov 1  }
0x1669   : > { %4720 = dma.vmem_to_hbm [thread:$0]  (%p5320_p5), %s4346_s7, 32, %s4348_s24, %s7389_s21, %s7607_s27, %s7607_s27, %s5184_s3  }
0x166a PF: > { %s7627_s0 = sld [smem:[#allocation11_spill]] }
0x166b   : > { %s7628_s29 = sld [smem:[#allocation9_spill]] }
0x1670   : > { %p4734_p8 = scmp.ge.s32.totalorder %s7627_s0, 2 }
0x1671   : > { %s4362_s23 = sand.u32 1, %s7628_s29  }
0x1672   : > { %p4725_p9 = pnand %p4734_p8, %p5324_p6  ;;  %s4363_s4 = scalar_lea.sflag [#allocation3], %s4362_s23 }
0x1674   : > { %p4726_p10 = pneg %p4725_p9 }
0x1676   : > { %5139 = dma.done.wait (%p4726_p10), %s4363_s4, 256  }
0x1677   : > { %5141 = vsyncadd (%p4726_p10), %s4363_s4, 4294967040  ;;  %s7630_s5 = sadd.s32 4294967294, %s7627_s0  }
0x1678   : > { %s4372_s6 = sand.u32 1, %s7630_s5  }
0x1679   : > { %s4373_s2 = scalar_lea.sflag [#allocation5], %s4372_s6 }
0x167a   : > { %5143 = dma.done.wait (%p4726_p10), %s4373_s2, 48  }
0x167b   : > { %5145 = vsyncadd (%p4726_p10), %s4373_s2, 4294967248  ;;  %s7631_s30 = sld [smem:[#allocation12_spill]]  ;;  %s7634_s27 = smov %s5152_s28 }
0x167c   : > { %s7632_s21 = sld [smem:[#allocation10_spill]] }
0x167d   : > { %s7633_s29 = sld [smem:[#allocation13_spill]] }
0x1681   : > { %p32_p5 = scmp.ge.s32.totalorder %s7631_s30, 4  }
0x1682   : > { %s7635_s28 = smov %s7632_s21 }
0x1683   :  { %34 = sbr.rel (!%p32_p5) target bundleno = 16 (0x10), region = 165 }
0x1688   :  { %4388 = vsyncpa [#allocation3], 1 }
0x1689   :  { %4390 = vsyncpa [#allocation3 + $0x1], 1 }
0x168a   :  { %4391 = vsyncpa [#allocation5], 1 }
0x168b   :  { %4393 = vsyncpa [#allocation5 + $0x1], 1 }

</bundles_post_ra>
